<compile_context>
chip_gen: v7x
topology: tpu7x:2x2x1
jax: 0.10.0
libtpu: 0.0.40
codegen_flags: <defaults>
</compile_context>

<pallas_src>
import math

import jax
import jax.numpy as jnp
from jax.experimental import pallas as pl
from jax.experimental.pallas import tpu as pltpu

NUM_SEEDS = 8
NUM_NODES = 16
DIM = 32
NUM_HEADS = 2
HEAD_DIM = DIM // NUM_HEADS
LN_EPS = 1e-5

# Constant-slab row layout (lanes are 2*DIM = 64 wide).
R_REL = 0                      # rows  0:32  -> [Wk_rel  | Wv_rel ] (applied to A @ X)
R_ROOT = DIM                   # rows 32:64  -> [Wk_root | Wv_root] (applied to X)
R_OUT = 2 * DIM                # rows 64:96  -> [Wo^T    | Wrff^T ]
R_QS = 3 * DIM                 # rows 96:104 -> [q(folded,scaled) | S]
R_BIAS = 3 * DIM + NUM_SEEDS   # row 104 [bk|bv], 105 [b_o|b_rff], 106 [ln_g|ln_b]
CONST_ROWS = 112               # padded to a multiple of 8 sublanes


# --------------------------------------------------------------------------
# Kernel: one grid step == one block of B graphs.
# --------------------------------------------------------------------------
def pma_kernel(x_ref, a_ref, c_ref, out_ref):
    f32 = jnp.float32

    X = x_ref[...]            # (B*N, DIM)   node features, graphs stacked on sublanes
    A = a_ref[...]            # (B*N, B*N)   block-diagonal dense adjacency (dst, src)
    C = c_ref[...]            # (CONST_ROWS, 2*DIM) constant slab

    W_rel = C[R_REL:R_REL + DIM, :]                   # (32, 64) fused [k|v], on A @ X
    W_root = C[R_ROOT:R_ROOT + DIM, :]                # (32, 64) fused [k|v], on X
    Wo = C[R_OUT:R_OUT + DIM, :DIM]                   # (32, 32) out-proj (pre-transposed)
    Wrff = C[R_OUT:R_OUT + DIM, DIM:]                 # (32, 32) rFF (pre-transposed)
    q = C[R_QS:R_QS + NUM_SEEDS, :DIM]                # (8, 32)  hoisted, pre-scaled query
    Sseed = C[R_QS:R_QS + NUM_SEEDS, DIM:]            # (8, 32)  seed parameter (residual)
    b_kv = C[R_BIAS:R_BIAS + 1, :]                    # (1, 64)  [bk | bv] (folded)
    b_o = C[R_BIAS + 1:R_BIAS + 2, :DIM]              # (1, 32)
    b_rff = C[R_BIAS + 1:R_BIAS + 2, DIM:]            # (1, 32)
    ln_g = C[R_BIAS + 2:R_BIAS + 3, :DIM]             # (1, 32)
    ln_b = C[R_BIAS + 2:R_BIAS + 3, DIM:]             # (1, 32)

    # ---- GraphConv aggregation for all B graphs at once (block-diag A). ----
    Xagg = jnp.dot(A, X, preferred_element_type=f32)                 # (B*N, 32)

    # ---- fused K|V projection (GraphConv + MHA in-proj, folded); lanes [k|v]. ----
    KV = (jnp.dot(Xagg, W_rel, preferred_element_type=f32)
          + jnp.dot(X, W_root, preferred_element_type=f32)
          + b_kv)                                                    # (B*N, 64)

    n_graphs = out_ref.shape[0]
    for b in range(n_graphs):                                        # static unroll
        kv = KV[b * NUM_NODES:(b + 1) * NUM_NODES, :]                # (16, 64)

        def head(h):
            lo, hi = h * HEAD_DIM, (h + 1) * HEAD_DIM
            k_h = kv[:, lo:hi]                                       # (16, 16)
            v_h = kv[:, DIM + lo:DIM + hi]                           # (16, 16)
            # scores = q_h @ k_h^T (q already scaled by 1/sqrt(head_dim))
            s = jax.lax.dot_general(
                q[:, lo:hi], k_h, dimension_numbers=(((1,), (1,)), ((), ())),
                preferred_element_type=f32)                          # (8, 16)
            s = s - jnp.max(s, axis=-1, keepdims=True)
            p = jnp.exp(s)
            p = p * pl.reciprocal(jnp.sum(p, axis=-1, keepdims=True), approx=True)
            ho = jnp.dot(p, v_h, preferred_element_type=f32)         # (8, 16)
            # per-head slice of the out-proj replaces concat + (32,32) matmul
            return jnp.dot(ho, Wo[lo:hi, :], preferred_element_type=f32)

        O = head(0)
        for h in range(1, NUM_HEADS):
            O = O + head(h)
        O = O + b_o                                                  # (8, 32)

        # ---- PMA: residual + LayerNorm + rFF residual ----
        Z = Sseed + O
        mu = jnp.mean(Z, axis=-1, keepdims=True)
        var = jnp.mean((Z - mu) ** 2, axis=-1, keepdims=True)
        Zn = (Z - mu) * jax.lax.rsqrt(var + LN_EPS) * ln_g + ln_b
        out_ref[b] = Zn + jnp.dot(Zn, Wrff, preferred_element_type=f32) + b_rff


# --------------------------------------------------------------------------
# Host-side algebraic folding + single-slab packing (trace-time, all linear).
# --------------------------------------------------------------------------
def _fold_and_pack(S, p):
    scale = 1.0 / math.sqrt(HEAD_DIM)

    # q path fully hoisted (graph-invariant): Linear -> MHA q in-proj -> scale.
    q = ((S @ p["wq_lin"].T + p["bq_lin"]) @ p["w_iq"].T + p["b_iq"]) * scale   # (8, 32)

    # k path: GraphConv (rel + root) -> MHA k in-proj.
    wk_rel = p["wk_rel"].T @ p["w_ik"].T
    wk_root = p["wk_root"].T @ p["w_ik"].T
    bk = p["bk_rel"] @ p["w_ik"].T + p["b_ik"]

    # v path: GraphConv (rel + root) -> MHA v in-proj.
    wv_rel = p["wv_rel"].T @ p["w_iv"].T
    wv_root = p["wv_root"].T @ p["w_iv"].T
    bv = p["bv_rel"] @ p["w_iv"].T + p["b_iv"]

    C = jnp.zeros((CONST_ROWS, 2 * DIM), dtype=jnp.float32)
    C = C.at[R_REL:R_REL + DIM, :DIM].set(wk_rel)
    C = C.at[R_REL:R_REL + DIM, DIM:].set(wv_rel)
    C = C.at[R_ROOT:R_ROOT + DIM, :DIM].set(wk_root)
    C = C.at[R_ROOT:R_ROOT + DIM, DIM:].set(wv_root)
    C = C.at[R_OUT:R_OUT + DIM, :DIM].set(p["w_o"].T)
    C = C.at[R_OUT:R_OUT + DIM, DIM:].set(p["w_rff"].T)
    C = C.at[R_QS:R_QS + NUM_SEEDS, :DIM].set(q)
    C = C.at[R_QS:R_QS + NUM_SEEDS, DIM:].set(S)
    C = C.at[R_BIAS, :DIM].set(bk[0])
    C = C.at[R_BIAS, DIM:].set(bv[0])
    C = C.at[R_BIAS + 1, :DIM].set(p["b_o"][0])
    C = C.at[R_BIAS + 1, DIM:].set(p["b_rff"][0])
    C = C.at[R_BIAS + 2, :DIM].set(p["ln_g"][0])
    C = C.at[R_BIAS + 2, DIM:].set(p["ln_b"][0])
    return C


# --------------------------------------------------------------------------
# Wrapper: B graphs per grid step; grid = cdiv(G, B) steps ("parallel").
# --------------------------------------------------------------------------
def pma_forward(S, X, A, params, graphs_per_block=8):
    """S: (NUM_SEEDS, DIM); X: (G, NUM_NODES, DIM); A: (G, NUM_NODES, NUM_NODES)."""
    G = X.shape[0]
    B = min(graphs_per_block, G)
    n_steps = pl.cdiv(G, B)
    G_pad = n_steps * B
    if G_pad != G:
        X = jnp.concatenate(
            [X, jnp.zeros((G_pad - G, NUM_NODES, DIM), X.dtype)], axis=0)
        A = jnp.concatenate(
            [A, jnp.zeros((G_pad - G, NUM_NODES, NUM_NODES), A.dtype)], axis=0)

    C = _fold_and_pack(S, params)

    # Stack graphs along sublanes: (G_pad*N, DIM) node-feature slab.
    X_flat = X.reshape(G_pad * NUM_NODES, DIM)

    # Block-diagonal adjacency per step -> one (B*N, B*N) @ (B*N, DIM) matmul.
    A_r = A.reshape(n_steps, B, NUM_NODES, NUM_NODES)
    eye = jnp.eye(B, dtype=A.dtype)
    A_bd = (A_r[:, :, :, None, :] * eye[None, :, None, :, None]).reshape(
        n_steps, B * NUM_NODES, B * NUM_NODES)

    BN = B * NUM_NODES
    out = pl.pallas_call(
        pma_kernel,
        out_shape=jax.ShapeDtypeStruct((G_pad, NUM_SEEDS, DIM), jnp.float32),
        grid_spec=pltpu.PrefetchScalarGridSpec(
            num_scalar_prefetch=0,
            grid=(n_steps,),
            in_specs=[
                pl.BlockSpec((BN, DIM), lambda g: (g, 0)),            # node features
                pl.BlockSpec((None, BN, BN), lambda g: (g, 0, 0)),    # block-diag adjacency
                pl.BlockSpec((CONST_ROWS, 2 * DIM), lambda g: (0, 0)),  # constant slab (resident)
            ],
            out_specs=pl.BlockSpec((B, NUM_SEEDS, DIM), lambda g: (g, 0, 0)),
        ),
        compiler_params=pltpu.CompilerParams(
            dimension_semantics=("parallel",)),
    )(X_flat, A_bd, C)
    return out[:G]


# --------------------------------------------------------------------------
# Pure-JAX mirror of the (unfolded) PyTorch forward, for correctness checking.
# --------------------------------------------------------------------------
def pma_reference(S, X, A, p):
    Q = S @ p["wq_lin"].T + p["bq_lin"]
    Xagg = A @ X
    K = Xagg @ p["wk_rel"].T + p["bk_rel"] + X @ p["wk_root"].T
    V = Xagg @ p["wv_rel"].T + p["bv_rel"] + X @ p["wv_root"].T
    q = Q @ p["w_iq"].T + p["b_iq"]
    k = K @ p["w_ik"].T + p["b_ik"]
    v = V @ p["w_iv"].T + p["b_iv"]
    outs = []
    for h in range(NUM_HEADS):
        sl = slice(h * HEAD_DIM, (h + 1) * HEAD_DIM)
        s = (q[:, sl] / math.sqrt(HEAD_DIM)) @ k[:, sl].T
        pmat = jax.nn.softmax(s, axis=-1)
        outs.append(pmat @ v[:, sl])
    attn = jnp.concatenate(outs, axis=-1)
    O = attn @ p["w_o"].T + p["b_o"]
    Z = S + O
    mu = jnp.mean(Z, axis=-1, keepdims=True)
    var = jnp.mean((Z - mu) ** 2, axis=-1, keepdims=True)
    Zn = (Z - mu) / jnp.sqrt(var + LN_EPS) * p["ln_g"] + p["ln_b"]
    return Zn + Zn @ p["w_rff"].T + p["b_rff"]


def _init_params(key):
    """Deterministic synthetic weights (xavier-ish); biases kept 2-D (1, dim)."""
    def mat(k, shape):
        fan_in, fan_out = shape[1], shape[0]
        scale = math.sqrt(2.0 / (fan_in + fan_out))
        return scale * jax.random.normal(k, shape, dtype=jnp.float32)

    names_mats = ["wq_lin", "wk_rel", "wk_root", "wv_rel", "wv_root",
                  "w_iq", "w_ik", "w_iv", "w_o", "w_rff"]
    names_bias = ["bq_lin", "bk_rel", "bv_rel", "b_iq", "b_ik", "b_iv",
                  "b_o", "b_rff"]
    keys = jax.random.split(key, len(names_mats) + len(names_bias))
    params = {}
    for i, n in enumerate(names_mats):
        params[n] = mat(keys[i], (DIM, DIM))
    for j, n in enumerate(names_bias):
        params[n] = 0.01 * jax.random.normal(
            keys[len(names_mats) + j], (1, DIM), dtype=jnp.float32)
    params["ln_g"] = jnp.ones((1, DIM), dtype=jnp.float32)
    params["ln_b"] = jnp.zeros((1, DIM), dtype=jnp.float32)
    return params


if __name__ == "__main__":
    root = jax.random.PRNGKey(0)
    k_s, k_x, k_a, k_p = jax.random.split(root, 4)

    G = 16  # graphs; 8 per grid step -> grid=(2,) so both v7x TensorCores are used

    # Shared seed parameter S (num_seeds, dim); per-graph node features X.
    S = jax.random.normal(k_s, (NUM_SEEDS, DIM), dtype=jnp.float32)
    X = jax.random.normal(k_x, (G, NUM_NODES, DIM), dtype=jnp.float32)

    # Per-graph adjacency: bidirectional ring + a few random extra edges.
    # A[g, dst, src] = #edges src -> dst (dense form of edge_index).
    idx = jnp.arange(NUM_NODES)
    ring_src = jnp.concatenate([idx, (idx + 1) % NUM_NODES])
    ring_dst = jnp.concatenate([(idx + 1) % NUM_NODES, idx])
    ring = jnp.zeros((NUM_NODES, NUM_NODES), jnp.float32).at[ring_dst, ring_src].add(1.0)
    extra = (jax.random.uniform(k_a, (G, NUM_NODES, NUM_NODES)) < 0.1).astype(jnp.float32)
    A = ring[None, :, :] + extra

    params = _init_params(k_p)

    out = pma_forward(S, X, A, params)
    out = jax.block_until_ready(out)

    ref = jnp.stack([pma_reference(S, X[g], A[g], params) for g in range(G)])
    assert out.shape == (G, NUM_SEEDS, DIM)
    assert jnp.allclose(out, ref, rtol=1e-2, atol=1e-2), "kernel/reference mismatch"

    print("KERNEL_OK")
</pallas_src>

<mosaic_0001>
module attributes {stable_mosaic.version = 11 : i64} {
  func.func @pma_kernel(%arg0: i32, %arg1: memref<128x32xf32, #tpu.memory_space<vmem>>, %arg2: memref<1x128x128xf32, #tpu.memory_space<vmem>>, %arg3: memref<112x64xf32, #tpu.memory_space<vmem>>, %arg4: memref<8x8x32xf32, #tpu.memory_space<vmem>>) attributes {dimension_semantics = [#tpu.dimension_semantics<parallel>], iteration_bounds = array<i64: 2>, scalar_prefetch = 0 : i64, scratch_operands = 0 : i64, tpu.core_type = #tpu.core_type<tc>, window_params = [{transform_indices = @transform_0, window_bounds = array<i64: 128, 32>}, {transform_indices = @transform_1, window_bounds = array<i64: 1, 128, 128>}, {pipeline_mode = #tpu.pipeline_mode<synchronous>, transform_indices = @transform_2, window_bounds = array<i64: 112, 64>}, {transform_indices = @transform_3, window_bounds = array<i64: 8, 8, 32>}]} {
    %c0 = arith.constant 0 : index
    %c0_0 = arith.constant 0 : index
    %0 = vector.load %arg1[%c0, %c0_0] : memref<128x32xf32, #tpu.memory_space<vmem>>, vector<128x32xf32>
    %c0_1 = arith.constant 0 : index
    %c0_2 = arith.constant 0 : index
    %c0_3 = arith.constant 0 : index
    %1 = vector.load %arg2[%c0_1, %c0_2, %c0_3] : memref<1x128x128xf32, #tpu.memory_space<vmem>>, vector<1x128x128xf32>
    %2 = vector.shape_cast %1 : vector<1x128x128xf32> to vector<128x128xf32>
    %c0_4 = arith.constant 0 : index
    %c0_5 = arith.constant 0 : index
    %3 = vector.load %arg3[%c0_4, %c0_5] : memref<112x64xf32, #tpu.memory_space<vmem>>, vector<112x64xf32>
    %4 = vector.extract_strided_slice %3 {offsets = [0, 0], sizes = [32, 64], strides = [1, 1]} : vector<112x64xf32> to vector<32x64xf32>
    %5 = vector.extract_strided_slice %3 {offsets = [32, 0], sizes = [32, 64], strides = [1, 1]} : vector<112x64xf32> to vector<32x64xf32>
    %6 = vector.extract_strided_slice %3 {offsets = [64, 0], sizes = [32, 32], strides = [1, 1]} : vector<112x64xf32> to vector<32x32xf32>
    %7 = vector.extract_strided_slice %3 {offsets = [64, 32], sizes = [32, 32], strides = [1, 1]} : vector<112x64xf32> to vector<32x32xf32>
    %8 = vector.extract_strided_slice %3 {offsets = [96, 0], sizes = [8, 32], strides = [1, 1]} : vector<112x64xf32> to vector<8x32xf32>
    %9 = vector.extract_strided_slice %3 {offsets = [96, 32], sizes = [8, 32], strides = [1, 1]} : vector<112x64xf32> to vector<8x32xf32>
    %10 = vector.extract_strided_slice %3 {offsets = [104, 0], sizes = [1, 64], strides = [1, 1]} : vector<112x64xf32> to vector<1x64xf32>
    %11 = vector.extract_strided_slice %3 {offsets = [105, 0], sizes = [1, 32], strides = [1, 1]} : vector<112x64xf32> to vector<1x32xf32>
    %12 = vector.extract_strided_slice %3 {offsets = [105, 32], sizes = [1, 32], strides = [1, 1]} : vector<112x64xf32> to vector<1x32xf32>
    %13 = vector.extract_strided_slice %3 {offsets = [106, 0], sizes = [1, 32], strides = [1, 1]} : vector<112x64xf32> to vector<1x32xf32>
    %14 = vector.extract_strided_slice %3 {offsets = [106, 32], sizes = [1, 32], strides = [1, 1]} : vector<112x64xf32> to vector<1x32xf32>
    %cst = arith.constant dense<0.000000e+00> : vector<128x32xf32>
    %15 = tpu.matmul %2, %0, %cst {dimension_numbers = #tpu.dot_dimension_numbers<[1], [0], [0], [1], [0, 0, 1, 1], [], []>} : vector<128x128xf32>, vector<128x32xf32>, vector<128x32xf32> -> vector<128x32xf32>
    %cst_6 = arith.constant dense<0.000000e+00> : vector<128x64xf32>
    %16 = tpu.matmul %15, %4, %cst_6 {dimension_numbers = #tpu.dot_dimension_numbers<[1], [0], [0], [1], [0, 0, 1, 1], [], []>} : vector<128x32xf32>, vector<32x64xf32>, vector<128x64xf32> -> vector<128x64xf32>
    %cst_7 = arith.constant dense<0.000000e+00> : vector<128x64xf32>
    %17 = tpu.matmul %0, %5, %cst_7 {dimension_numbers = #tpu.dot_dimension_numbers<[1], [0], [0], [1], [0, 0, 1, 1], [], []>} : vector<128x32xf32>, vector<32x64xf32>, vector<128x64xf32> -> vector<128x64xf32>
    %18 = arith.addf %16, %17 : vector<128x64xf32>
    %19 = vector.broadcast %10 : vector<1x64xf32> to vector<128x64xf32>
    %20 = arith.addf %18, %19 : vector<128x64xf32>
    %21 = vector.extract_strided_slice %20 {offsets = [0, 0], sizes = [16, 64], strides = [1, 1]} : vector<128x64xf32> to vector<16x64xf32>
    %22 = vector.extract_strided_slice %21 {offsets = [0, 0], sizes = [16, 16], strides = [1, 1]} : vector<16x64xf32> to vector<16x16xf32>
    %23 = vector.extract_strided_slice %21 {offsets = [0, 32], sizes = [16, 16], strides = [1, 1]} : vector<16x64xf32> to vector<16x16xf32>
    %24 = vector.extract_strided_slice %8 {offsets = [0, 0], sizes = [8, 16], strides = [1, 1]} : vector<8x32xf32> to vector<8x16xf32>
    %cst_8 = arith.constant dense<0.000000e+00> : vector<8x16xf32>
    %25 = tpu.matmul %24, %22, %cst_8 {dimension_numbers = #tpu.dot_dimension_numbers<[1], [1], [0], [0], [0, 0, 1, 0], [], []>} : vector<8x16xf32>, vector<16x16xf32>, vector<8x16xf32> -> vector<8x16xf32>
    %cst_9 = arith.constant dense<0xFF800000> : vector<8xf32>
    %26 = vector.multi_reduction <maximumf>, %25, %cst_9 [1] : vector<8x16xf32> to vector<8xf32>
    %27 = vector.shape_cast %26 : vector<8xf32> to vector<8x1xf32>
    %28 = vector.broadcast %27 : vector<8x1xf32> to vector<8x16xf32>
    %29 = arith.subf %25, %28 : vector<8x16xf32>
    %30 = math.exp %29 : vector<8x16xf32>
    %cst_10 = arith.constant dense<0.000000e+00> : vector<8xf32>
    %31 = vector.multi_reduction <add>, %30, %cst_10 [1] : vector<8x16xf32> to vector<8xf32>
    %32 = vector.shape_cast %31 : vector<8xf32> to vector<8x1xf32>
    %33 = tpu.reciprocal %32 {approx = true} : vector<8x1xf32> -> vector<8x1xf32>
    %34 = vector.broadcast %33 : vector<8x1xf32> to vector<8x16xf32>
    %35 = arith.mulf %30, %34 : vector<8x16xf32>
    %cst_11 = arith.constant dense<0.000000e+00> : vector<8x16xf32>
    %36 = tpu.matmul %35, %23, %cst_11 {dimension_numbers = #tpu.dot_dimension_numbers<[1], [0], [0], [1], [0, 0, 1, 1], [], []>} : vector<8x16xf32>, vector<16x16xf32>, vector<8x16xf32> -> vector<8x16xf32>
    %37 = vector.extract_strided_slice %6 {offsets = [0, 0], sizes = [16, 32], strides = [1, 1]} : vector<32x32xf32> to vector<16x32xf32>
    %cst_12 = arith.constant dense<0.000000e+00> : vector<8x32xf32>
    %38 = tpu.matmul %36, %37, %cst_12 {dimension_numbers = #tpu.dot_dimension_numbers<[1], [0], [0], [1], [0, 0, 1, 1], [], []>} : vector<8x16xf32>, vector<16x32xf32>, vector<8x32xf32> -> vector<8x32xf32>
    %39 = vector.extract_strided_slice %21 {offsets = [0, 16], sizes = [16, 16], strides = [1, 1]} : vector<16x64xf32> to vector<16x16xf32>
    %40 = vector.extract_strided_slice %21 {offsets = [0, 48], sizes = [16, 16], strides = [1, 1]} : vector<16x64xf32> to vector<16x16xf32>
    %41 = vector.extract_strided_slice %8 {offsets = [0, 16], sizes = [8, 16], strides = [1, 1]} : vector<8x32xf32> to vector<8x16xf32>
    %cst_13 = arith.constant dense<0.000000e+00> : vector<8x16xf32>
    %42 = tpu.matmul %41, %39, %cst_13 {dimension_numbers = #tpu.dot_dimension_numbers<[1], [1], [0], [0], [0, 0, 1, 0], [], []>} : vector<8x16xf32>, vector<16x16xf32>, vector<8x16xf32> -> vector<8x16xf32>
    %cst_14 = arith.constant dense<0xFF800000> : vector<8xf32>
    %43 = vector.multi_reduction <maximumf>, %42, %cst_14 [1] : vector<8x16xf32> to vector<8xf32>
    %44 = vector.shape_cast %43 : vector<8xf32> to vector<8x1xf32>
    %45 = vector.broadcast %44 : vector<8x1xf32> to vector<8x16xf32>
    %46 = arith.subf %42, %45 : vector<8x16xf32>
    %47 = math.exp %46 : vector<8x16xf32>
    %cst_15 = arith.constant dense<0.000000e+00> : vector<8xf32>
    %48 = vector.multi_reduction <add>, %47, %cst_15 [1] : vector<8x16xf32> to vector<8xf32>
    %49 = vector.shape_cast %48 : vector<8xf32> to vector<8x1xf32>
    %50 = tpu.reciprocal %49 {approx = true} : vector<8x1xf32> -> vector<8x1xf32>
    %51 = vector.broadcast %50 : vector<8x1xf32> to vector<8x16xf32>
    %52 = arith.mulf %47, %51 : vector<8x16xf32>
    %cst_16 = arith.constant dense<0.000000e+00> : vector<8x16xf32>
    %53 = tpu.matmul %52, %40, %cst_16 {dimension_numbers = #tpu.dot_dimension_numbers<[1], [0], [0], [1], [0, 0, 1, 1], [], []>} : vector<8x16xf32>, vector<16x16xf32>, vector<8x16xf32> -> vector<8x16xf32>
    %54 = vector.extract_strided_slice %6 {offsets = [16, 0], sizes = [16, 32], strides = [1, 1]} : vector<32x32xf32> to vector<16x32xf32>
    %cst_17 = arith.constant dense<0.000000e+00> : vector<8x32xf32>
    %55 = tpu.matmul %53, %54, %cst_17 {dimension_numbers = #tpu.dot_dimension_numbers<[1], [0], [0], [1], [0, 0, 1, 1], [], []>} : vector<8x16xf32>, vector<16x32xf32>, vector<8x32xf32> -> vector<8x32xf32>
    %56 = arith.addf %38, %55 : vector<8x32xf32>
    %57 = vector.broadcast %11 : vector<1x32xf32> to vector<8x32xf32>
    %58 = arith.addf %56, %57 : vector<8x32xf32>
    %59 = arith.addf %9, %58 : vector<8x32xf32>
    %cst_18 = arith.constant dense<0.000000e+00> : vector<8xf32>
    %60 = vector.multi_reduction <add>, %59, %cst_18 [1] : vector<8x32xf32> to vector<8xf32>
    %61 = vector.shape_cast %60 : vector<8xf32> to vector<8x1xf32>
    %cst_19 = arith.constant 3.200000e+01 : f32
    %62 = vector.broadcast %cst_19 : f32 to vector<8x1xf32>
    %63 = arith.divf %61, %62 : vector<8x1xf32>
    %64 = vector.broadcast %63 : vector<8x1xf32> to vector<8x32xf32>
    %65 = arith.subf %59, %64 : vector<8x32xf32>
    %66 = arith.mulf %65, %65 : vector<8x32xf32>
    %cst_20 = arith.constant dense<0.000000e+00> : vector<8xf32>
    %67 = vector.multi_reduction <add>, %66, %cst_20 [1] : vector<8x32xf32> to vector<8xf32>
    %68 = vector.shape_cast %67 : vector<8xf32> to vector<8x1xf32>
    %cst_21 = arith.constant 3.200000e+01 : f32
    %69 = vector.broadcast %cst_21 : f32 to vector<8x1xf32>
    %70 = arith.divf %68, %69 : vector<8x1xf32>
    %71 = vector.broadcast %63 : vector<8x1xf32> to vector<8x32xf32>
    %72 = arith.subf %59, %71 : vector<8x32xf32>
    %cst_22 = arith.constant 9.99999974E-6 : f32
    %73 = vector.broadcast %cst_22 : f32 to vector<8x1xf32>
    %74 = arith.addf %70, %73 : vector<8x1xf32>
    %75 = math.rsqrt %74 : vector<8x1xf32>
    %76 = vector.broadcast %75 : vector<8x1xf32> to vector<8x32xf32>
    %77 = arith.mulf %72, %76 : vector<8x32xf32>
    %78 = vector.broadcast %13 : vector<1x32xf32> to vector<8x32xf32>
    %79 = arith.mulf %77, %78 : vector<8x32xf32>
    %80 = vector.broadcast %14 : vector<1x32xf32> to vector<8x32xf32>
    %81 = arith.addf %79, %80 : vector<8x32xf32>
    %cst_23 = arith.constant dense<0.000000e+00> : vector<8x32xf32>
    %82 = tpu.matmul %81, %7, %cst_23 {dimension_numbers = #tpu.dot_dimension_numbers<[1], [0], [0], [1], [0, 0, 1, 1], [], []>} : vector<8x32xf32>, vector<32x32xf32>, vector<8x32xf32> -> vector<8x32xf32>
    %83 = arith.addf %81, %82 : vector<8x32xf32>
    %84 = vector.broadcast %12 : vector<1x32xf32> to vector<8x32xf32>
    %85 = arith.addf %83, %84 : vector<8x32xf32>
    %c0_24 = arith.constant 0 : index
    %c0_25 = arith.constant 0 : index
    %c0_26 = arith.constant 0 : index
    %86 = vector.load %arg4[%c0_24, %c0_25, %c0_26] : memref<8x8x32xf32, #tpu.memory_space<vmem>>, vector<1x8x32xf32>
    %87 = vector.shape_cast %86 : vector<1x8x32xf32> to vector<8x32xf32>
    %88 = vector.shape_cast %85 : vector<8x32xf32> to vector<1x8x32xf32>
    tpu.vector_store %arg4[%c0_24, %c0_25, %c0_26], %88 {strides = array<i32>} : memref<8x8x32xf32, #tpu.memory_space<vmem>>, vector<1x8x32xf32>,
    %89 = vector.extract_strided_slice %20 {offsets = [16, 0], sizes = [16, 64], strides = [1, 1]} : vector<128x64xf32> to vector<16x64xf32>
    %90 = vector.extract_strided_slice %89 {offsets = [0, 0], sizes = [16, 16], strides = [1, 1]} : vector<16x64xf32> to vector<16x16xf32>
    %91 = vector.extract_strided_slice %89 {offsets = [0, 32], sizes = [16, 16], strides = [1, 1]} : vector<16x64xf32> to vector<16x16xf32>
    %92 = vector.extract_strided_slice %8 {offsets = [0, 0], sizes = [8, 16], strides = [1, 1]} : vector<8x32xf32> to vector<8x16xf32>
    %cst_27 = arith.constant dense<0.000000e+00> : vector<8x16xf32>
    %93 = tpu.matmul %92, %90, %cst_27 {dimension_numbers = #tpu.dot_dimension_numbers<[1], [1], [0], [0], [0, 0, 1, 0], [], []>} : vector<8x16xf32>, vector<16x16xf32>, vector<8x16xf32> -> vector<8x16xf32>
    %cst_28 = arith.constant dense<0xFF800000> : vector<8xf32>
    %94 = vector.multi_reduction <maximumf>, %93, %cst_28 [1] : vector<8x16xf32> to vector<8xf32>
    %95 = vector.shape_cast %94 : vector<8xf32> to vector<8x1xf32>
    %96 = vector.broadcast %95 : vector<8x1xf32> to vector<8x16xf32>
    %97 = arith.subf %93, %96 : vector<8x16xf32>
    %98 = math.exp %97 : vector<8x16xf32>
    %cst_29 = arith.constant dense<0.000000e+00> : vector<8xf32>
    %99 = vector.multi_reduction <add>, %98, %cst_29 [1] : vector<8x16xf32> to vector<8xf32>
    %100 = vector.shape_cast %99 : vector<8xf32> to vector<8x1xf32>
    %101 = tpu.reciprocal %100 {approx = true} : vector<8x1xf32> -> vector<8x1xf32>
    %102 = vector.broadcast %101 : vector<8x1xf32> to vector<8x16xf32>
    %103 = arith.mulf %98, %102 : vector<8x16xf32>
    %cst_30 = arith.constant dense<0.000000e+00> : vector<8x16xf32>
    %104 = tpu.matmul %103, %91, %cst_30 {dimension_numbers = #tpu.dot_dimension_numbers<[1], [0], [0], [1], [0, 0, 1, 1], [], []>} : vector<8x16xf32>, vector<16x16xf32>, vector<8x16xf32> -> vector<8x16xf32>
    %105 = vector.extract_strided_slice %6 {offsets = [0, 0], sizes = [16, 32], strides = [1, 1]} : vector<32x32xf32> to vector<16x32xf32>
    %cst_31 = arith.constant dense<0.000000e+00> : vector<8x32xf32>
    %106 = tpu.matmul %104, %105, %cst_31 {dimension_numbers = #tpu.dot_dimension_numbers<[1], [0], [0], [1], [0, 0, 1, 1], [], []>} : vector<8x16xf32>, vector<16x32xf32>, vector<8x32xf32> -> vector<8x32xf32>
    %107 = vector.extract_strided_slice %89 {offsets = [0, 16], sizes = [16, 16], strides = [1, 1]} : vector<16x64xf32> to vector<16x16xf32>
    %108 = vector.extract_strided_slice %89 {offsets = [0, 48], sizes = [16, 16], strides = [1, 1]} : vector<16x64xf32> to vector<16x16xf32>
    %109 = vector.extract_strided_slice %8 {offsets = [0, 16], sizes = [8, 16], strides = [1, 1]} : vector<8x32xf32> to vector<8x16xf32>
    %cst_32 = arith.constant dense<0.000000e+00> : vector<8x16xf32>
    %110 = tpu.matmul %109, %107, %cst_32 {dimension_numbers = #tpu.dot_dimension_numbers<[1], [1], [0], [0], [0, 0, 1, 0], [], []>} : vector<8x16xf32>, vector<16x16xf32>, vector<8x16xf32> -> vector<8x16xf32>
    %cst_33 = arith.constant dense<0xFF800000> : vector<8xf32>
    %111 = vector.multi_reduction <maximumf>, %110, %cst_33 [1] : vector<8x16xf32> to vector<8xf32>
    %112 = vector.shape_cast %111 : vector<8xf32> to vector<8x1xf32>
    %113 = vector.broadcast %112 : vector<8x1xf32> to vector<8x16xf32>
    %114 = arith.subf %110, %113 : vector<8x16xf32>
    %115 = math.exp %114 : vector<8x16xf32>
    %cst_34 = arith.constant dense<0.000000e+00> : vector<8xf32>
    %116 = vector.multi_reduction <add>, %115, %cst_34 [1] : vector<8x16xf32> to vector<8xf32>
    %117 = vector.shape_cast %116 : vector<8xf32> to vector<8x1xf32>
    %118 = tpu.reciprocal %117 {approx = true} : vector<8x1xf32> -> vector<8x1xf32>
    %119 = vector.broadcast %118 : vector<8x1xf32> to vector<8x16xf32>
    %120 = arith.mulf %115, %119 : vector<8x16xf32>
    %cst_35 = arith.constant dense<0.000000e+00> : vector<8x16xf32>
    %121 = tpu.matmul %120, %108, %cst_35 {dimension_numbers = #tpu.dot_dimension_numbers<[1], [0], [0], [1], [0, 0, 1, 1], [], []>} : vector<8x16xf32>, vector<16x16xf32>, vector<8x16xf32> -> vector<8x16xf32>
    %122 = vector.extract_strided_slice %6 {offsets = [16, 0], sizes = [16, 32], strides = [1, 1]} : vector<32x32xf32> to vector<16x32xf32>
    %cst_36 = arith.constant dense<0.000000e+00> : vector<8x32xf32>
    %123 = tpu.matmul %121, %122, %cst_36 {dimension_numbers = #tpu.dot_dimension_numbers<[1], [0], [0], [1], [0, 0, 1, 1], [], []>} : vector<8x16xf32>, vector<16x32xf32>, vector<8x32xf32> -> vector<8x32xf32>
    %124 = arith.addf %106, %123 : vector<8x32xf32>
    %125 = vector.broadcast %11 : vector<1x32xf32> to vector<8x32xf32>
    %126 = arith.addf %124, %125 : vector<8x32xf32>
    %127 = arith.addf %9, %126 : vector<8x32xf32>
    %cst_37 = arith.constant dense<0.000000e+00> : vector<8xf32>
    %128 = vector.multi_reduction <add>, %127, %cst_37 [1] : vector<8x32xf32> to vector<8xf32>
    %129 = vector.shape_cast %128 : vector<8xf32> to vector<8x1xf32>
    %cst_38 = arith.constant 3.200000e+01 : f32
    %130 = vector.broadcast %cst_38 : f32 to vector<8x1xf32>
    %131 = arith.divf %129, %130 : vector<8x1xf32>
    %132 = vector.broadcast %131 : vector<8x1xf32> to vector<8x32xf32>
    %133 = arith.subf %127, %132 : vector<8x32xf32>
    %134 = arith.mulf %133, %133 : vector<8x32xf32>
    %cst_39 = arith.constant dense<0.000000e+00> : vector<8xf32>
    %135 = vector.multi_reduction <add>, %134, %cst_39 [1] : vector<8x32xf32> to vector<8xf32>
    %136 = vector.shape_cast %135 : vector<8xf32> to vector<8x1xf32>
    %cst_40 = arith.constant 3.200000e+01 : f32
    %137 = vector.broadcast %cst_40 : f32 to vector<8x1xf32>
    %138 = arith.divf %136, %137 : vector<8x1xf32>
    %139 = vector.broadcast %131 : vector<8x1xf32> to vector<8x32xf32>
    %140 = arith.subf %127, %139 : vector<8x32xf32>
    %cst_41 = arith.constant 9.99999974E-6 : f32
    %141 = vector.broadcast %cst_41 : f32 to vector<8x1xf32>
    %142 = arith.addf %138, %141 : vector<8x1xf32>
    %143 = math.rsqrt %142 : vector<8x1xf32>
    %144 = vector.broadcast %143 : vector<8x1xf32> to vector<8x32xf32>
    %145 = arith.mulf %140, %144 : vector<8x32xf32>
    %146 = vector.broadcast %13 : vector<1x32xf32> to vector<8x32xf32>
    %147 = arith.mulf %145, %146 : vector<8x32xf32>
    %148 = vector.broadcast %14 : vector<1x32xf32> to vector<8x32xf32>
    %149 = arith.addf %147, %148 : vector<8x32xf32>
    %cst_42 = arith.constant dense<0.000000e+00> : vector<8x32xf32>
    %150 = tpu.matmul %149, %7, %cst_42 {dimension_numbers = #tpu.dot_dimension_numbers<[1], [0], [0], [1], [0, 0, 1, 1], [], []>} : vector<8x32xf32>, vector<32x32xf32>, vector<8x32xf32> -> vector<8x32xf32>
    %151 = arith.addf %149, %150 : vector<8x32xf32>
    %152 = vector.broadcast %12 : vector<1x32xf32> to vector<8x32xf32>
    %153 = arith.addf %151, %152 : vector<8x32xf32>
    %c1 = arith.constant 1 : index
    %c0_43 = arith.constant 0 : index
    %c0_44 = arith.constant 0 : index
    %154 = vector.load %arg4[%c1, %c0_43, %c0_44] : memref<8x8x32xf32, #tpu.memory_space<vmem>>, vector<1x8x32xf32>
    %155 = vector.shape_cast %154 : vector<1x8x32xf32> to vector<8x32xf32>
    %156 = vector.shape_cast %153 : vector<8x32xf32> to vector<1x8x32xf32>
    tpu.vector_store %arg4[%c1, %c0_43, %c0_44], %156 {strides = array<i32>} : memref<8x8x32xf32, #tpu.memory_space<vmem>>, vector<1x8x32xf32>,
    %157 = vector.extract_strided_slice %20 {offsets = [32, 0], sizes = [16, 64], strides = [1, 1]} : vector<128x64xf32> to vector<16x64xf32>
    %158 = vector.extract_strided_slice %157 {offsets = [0, 0], sizes = [16, 16], strides = [1, 1]} : vector<16x64xf32> to vector<16x16xf32>
    %159 = vector.extract_strided_slice %157 {offsets = [0, 32], sizes = [16, 16], strides = [1, 1]} : vector<16x64xf32> to vector<16x16xf32>
    %160 = vector.extract_strided_slice %8 {offsets = [0, 0], sizes = [8, 16], strides = [1, 1]} : vector<8x32xf32> to vector<8x16xf32>
    %cst_45 = arith.constant dense<0.000000e+00> : vector<8x16xf32>
    %161 = tpu.matmul %160, %158, %cst_45 {dimension_numbers = #tpu.dot_dimension_numbers<[1], [1], [0], [0], [0, 0, 1, 0], [], []>} : vector<8x16xf32>, vector<16x16xf32>, vector<8x16xf32> -> vector<8x16xf32>
    %cst_46 = arith.constant dense<0xFF800000> : vector<8xf32>
    %162 = vector.multi_reduction <maximumf>, %161, %cst_46 [1] : vector<8x16xf32> to vector<8xf32>
    %163 = vector.shape_cast %162 : vector<8xf32> to vector<8x1xf32>
    %164 = vector.broadcast %163 : vector<8x1xf32> to vector<8x16xf32>
    %165 = arith.subf %161, %164 : vector<8x16xf32>
    %166 = math.exp %165 : vector<8x16xf32>
    %cst_47 = arith.constant dense<0.000000e+00> : vector<8xf32>
    %167 = vector.multi_reduction <add>, %166, %cst_47 [1] : vector<8x16xf32> to vector<8xf32>
    %168 = vector.shape_cast %167 : vector<8xf32> to vector<8x1xf32>
    %169 = tpu.reciprocal %168 {approx = true} : vector<8x1xf32> -> vector<8x1xf32>
    %170 = vector.broadcast %169 : vector<8x1xf32> to vector<8x16xf32>
    %171 = arith.mulf %166, %170 : vector<8x16xf32>
    %cst_48 = arith.constant dense<0.000000e+00> : vector<8x16xf32>
    %172 = tpu.matmul %171, %159, %cst_48 {dimension_numbers = #tpu.dot_dimension_numbers<[1], [0], [0], [1], [0, 0, 1, 1], [], []>} : vector<8x16xf32>, vector<16x16xf32>, vector<8x16xf32> -> vector<8x16xf32>
    %173 = vector.extract_strided_slice %6 {offsets = [0, 0], sizes = [16, 32], strides = [1, 1]} : vector<32x32xf32> to vector<16x32xf32>
    %cst_49 = arith.constant dense<0.000000e+00> : vector<8x32xf32>
    %174 = tpu.matmul %172, %173, %cst_49 {dimension_numbers = #tpu.dot_dimension_numbers<[1], [0], [0], [1], [0, 0, 1, 1], [], []>} : vector<8x16xf32>, vector<16x32xf32>, vector<8x32xf32> -> vector<8x32xf32>
    %175 = vector.extract_strided_slice %157 {offsets = [0, 16], sizes = [16, 16], strides = [1, 1]} : vector<16x64xf32> to vector<16x16xf32>
    %176 = vector.extract_strided_slice %157 {offsets = [0, 48], sizes = [16, 16], strides = [1, 1]} : vector<16x64xf32> to vector<16x16xf32>
    %177 = vector.extract_strided_slice %8 {offsets = [0, 16], sizes = [8, 16], strides = [1, 1]} : vector<8x32xf32> to vector<8x16xf32>
    %cst_50 = arith.constant dense<0.000000e+00> : vector<8x16xf32>
    %178 = tpu.matmul %177, %175, %cst_50 {dimension_numbers = #tpu.dot_dimension_numbers<[1], [1], [0], [0], [0, 0, 1, 0], [], []>} : vector<8x16xf32>, vector<16x16xf32>, vector<8x16xf32> -> vector<8x16xf32>
    %cst_51 = arith.constant dense<0xFF800000> : vector<8xf32>
    %179 = vector.multi_reduction <maximumf>, %178, %cst_51 [1] : vector<8x16xf32> to vector<8xf32>
    %180 = vector.shape_cast %179 : vector<8xf32> to vector<8x1xf32>
    %181 = vector.broadcast %180 : vector<8x1xf32> to vector<8x16xf32>
    %182 = arith.subf %178, %181 : vector<8x16xf32>
    %183 = math.exp %182 : vector<8x16xf32>
    %cst_52 = arith.constant dense<0.000000e+00> : vector<8xf32>
    %184 = vector.multi_reduction <add>, %183, %cst_52 [1] : vector<8x16xf32> to vector<8xf32>
    %185 = vector.shape_cast %184 : vector<8xf32> to vector<8x1xf32>
    %186 = tpu.reciprocal %185 {approx = true} : vector<8x1xf32> -> vector<8x1xf32>
    %187 = vector.broadcast %186 : vector<8x1xf32> to vector<8x16xf32>
    %188 = arith.mulf %183, %187 : vector<8x16xf32>
    %cst_53 = arith.constant dense<0.000000e+00> : vector<8x16xf32>
    %189 = tpu.matmul %188, %176, %cst_53 {dimension_numbers = #tpu.dot_dimension_numbers<[1], [0], [0], [1], [0, 0, 1, 1], [], []>} : vector<8x16xf32>, vector<16x16xf32>, vector<8x16xf32> -> vector<8x16xf32>
    %190 = vector.extract_strided_slice %6 {offsets = [16, 0], sizes = [16, 32], strides = [1, 1]} : vector<32x32xf32> to vector<16x32xf32>
    %cst_54 = arith.constant dense<0.000000e+00> : vector<8x32xf32>
    %191 = tpu.matmul %189, %190, %cst_54 {dimension_numbers = #tpu.dot_dimension_numbers<[1], [0], [0], [1], [0, 0, 1, 1], [], []>} : vector<8x16xf32>, vector<16x32xf32>, vector<8x32xf32> -> vector<8x32xf32>
    %192 = arith.addf %174, %191 : vector<8x32xf32>
    %193 = vector.broadcast %11 : vector<1x32xf32> to vector<8x32xf32>
    %194 = arith.addf %192, %193 : vector<8x32xf32>
    %195 = arith.addf %9, %194 : vector<8x32xf32>
    %cst_55 = arith.constant dense<0.000000e+00> : vector<8xf32>
    %196 = vector.multi_reduction <add>, %195, %cst_55 [1] : vector<8x32xf32> to vector<8xf32>
    %197 = vector.shape_cast %196 : vector<8xf32> to vector<8x1xf32>
    %cst_56 = arith.constant 3.200000e+01 : f32
    %198 = vector.broadcast %cst_56 : f32 to vector<8x1xf32>
    %199 = arith.divf %197, %198 : vector<8x1xf32>
    %200 = vector.broadcast %199 : vector<8x1xf32> to vector<8x32xf32>
    %201 = arith.subf %195, %200 : vector<8x32xf32>
    %202 = arith.mulf %201, %201 : vector<8x32xf32>
    %cst_57 = arith.constant dense<0.000000e+00> : vector<8xf32>
    %203 = vector.multi_reduction <add>, %202, %cst_57 [1] : vector<8x32xf32> to vector<8xf32>
    %204 = vector.shape_cast %203 : vector<8xf32> to vector<8x1xf32>
    %cst_58 = arith.constant 3.200000e+01 : f32
    %205 = vector.broadcast %cst_58 : f32 to vector<8x1xf32>
    %206 = arith.divf %204, %205 : vector<8x1xf32>
    %207 = vector.broadcast %199 : vector<8x1xf32> to vector<8x32xf32>
    %208 = arith.subf %195, %207 : vector<8x32xf32>
    %cst_59 = arith.constant 9.99999974E-6 : f32
    %209 = vector.broadcast %cst_59 : f32 to vector<8x1xf32>
    %210 = arith.addf %206, %209 : vector<8x1xf32>
    %211 = math.rsqrt %210 : vector<8x1xf32>
    %212 = vector.broadcast %211 : vector<8x1xf32> to vector<8x32xf32>
    %213 = arith.mulf %208, %212 : vector<8x32xf32>
    %214 = vector.broadcast %13 : vector<1x32xf32> to vector<8x32xf32>
    %215 = arith.mulf %213, %214 : vector<8x32xf32>
    %216 = vector.broadcast %14 : vector<1x32xf32> to vector<8x32xf32>
    %217 = arith.addf %215, %216 : vector<8x32xf32>
    %cst_60 = arith.constant dense<0.000000e+00> : vector<8x32xf32>
    %218 = tpu.matmul %217, %7, %cst_60 {dimension_numbers = #tpu.dot_dimension_numbers<[1], [0], [0], [1], [0, 0, 1, 1], [], []>} : vector<8x32xf32>, vector<32x32xf32>, vector<8x32xf32> -> vector<8x32xf32>
    %219 = arith.addf %217, %218 : vector<8x32xf32>
    %220 = vector.broadcast %12 : vector<1x32xf32> to vector<8x32xf32>
    %221 = arith.addf %219, %220 : vector<8x32xf32>
    %c2 = arith.constant 2 : index
    %c0_61 = arith.constant 0 : index
    %c0_62 = arith.constant 0 : index
    %222 = vector.load %arg4[%c2, %c0_61, %c0_62] : memref<8x8x32xf32, #tpu.memory_space<vmem>>, vector<1x8x32xf32>
    %223 = vector.shape_cast %222 : vector<1x8x32xf32> to vector<8x32xf32>
    %224 = vector.shape_cast %221 : vector<8x32xf32> to vector<1x8x32xf32>
    tpu.vector_store %arg4[%c2, %c0_61, %c0_62], %224 {strides = array<i32>} : memref<8x8x32xf32, #tpu.memory_space<vmem>>, vector<1x8x32xf32>,
    %225 = vector.extract_strided_slice %20 {offsets = [48, 0], sizes = [16, 64], strides = [1, 1]} : vector<128x64xf32> to vector<16x64xf32>
    %226 = vector.extract_strided_slice %225 {offsets = [0, 0], sizes = [16, 16], strides = [1, 1]} : vector<16x64xf32> to vector<16x16xf32>
    %227 = vector.extract_strided_slice %225 {offsets = [0, 32], sizes = [16, 16], strides = [1, 1]} : vector<16x64xf32> to vector<16x16xf32>
    %228 = vector.extract_strided_slice %8 {offsets = [0, 0], sizes = [8, 16], strides = [1, 1]} : vector<8x32xf32> to vector<8x16xf32>
    %cst_63 = arith.constant dense<0.000000e+00> : vector<8x16xf32>
    %229 = tpu.matmul %228, %226, %cst_63 {dimension_numbers = #tpu.dot_dimension_numbers<[1], [1], [0], [0], [0, 0, 1, 0], [], []>} : vector<8x16xf32>, vector<16x16xf32>, vector<8x16xf32> -> vector<8x16xf32>
    %cst_64 = arith.constant dense<0xFF800000> : vector<8xf32>
    %230 = vector.multi_reduction <maximumf>, %229, %cst_64 [1] : vector<8x16xf32> to vector<8xf32>
    %231 = vector.shape_cast %230 : vector<8xf32> to vector<8x1xf32>
    %232 = vector.broadcast %231 : vector<8x1xf32> to vector<8x16xf32>
    %233 = arith.subf %229, %232 : vector<8x16xf32>
    %234 = math.exp %233 : vector<8x16xf32>
    %cst_65 = arith.constant dense<0.000000e+00> : vector<8xf32>
    %235 = vector.multi_reduction <add>, %234, %cst_65 [1] : vector<8x16xf32> to vector<8xf32>
    %236 = vector.shape_cast %235 : vector<8xf32> to vector<8x1xf32>
    %237 = tpu.reciprocal %236 {approx = true} : vector<8x1xf32> -> vector<8x1xf32>
    %238 = vector.broadcast %237 : vector<8x1xf32> to vector<8x16xf32>
    %239 = arith.mulf %234, %238 : vector<8x16xf32>
    %cst_66 = arith.constant dense<0.000000e+00> : vector<8x16xf32>
    %240 = tpu.matmul %239, %227, %cst_66 {dimension_numbers = #tpu.dot_dimension_numbers<[1], [0], [0], [1], [0, 0, 1, 1], [], []>} : vector<8x16xf32>, vector<16x16xf32>, vector<8x16xf32> -> vector<8x16xf32>
    %241 = vector.extract_strided_slice %6 {offsets = [0, 0], sizes = [16, 32], strides = [1, 1]} : vector<32x32xf32> to vector<16x32xf32>
    %cst_67 = arith.constant dense<0.000000e+00> : vector<8x32xf32>
    %242 = tpu.matmul %240, %241, %cst_67 {dimension_numbers = #tpu.dot_dimension_numbers<[1], [0], [0], [1], [0, 0, 1, 1], [], []>} : vector<8x16xf32>, vector<16x32xf32>, vector<8x32xf32> -> vector<8x32xf32>
    %243 = vector.extract_strided_slice %225 {offsets = [0, 16], sizes = [16, 16], strides = [1, 1]} : vector<16x64xf32> to vector<16x16xf32>
    %244 = vector.extract_strided_slice %225 {offsets = [0, 48], sizes = [16, 16], strides = [1, 1]} : vector<16x64xf32> to vector<16x16xf32>
    %245 = vector.extract_strided_slice %8 {offsets = [0, 16], sizes = [8, 16], strides = [1, 1]} : vector<8x32xf32> to vector<8x16xf32>
    %cst_68 = arith.constant dense<0.000000e+00> : vector<8x16xf32>
    %246 = tpu.matmul %245, %243, %cst_68 {dimension_numbers = #tpu.dot_dimension_numbers<[1], [1], [0], [0], [0, 0, 1, 0], [], []>} : vector<8x16xf32>, vector<16x16xf32>, vector<8x16xf32> -> vector<8x16xf32>
    %cst_69 = arith.constant dense<0xFF800000> : vector<8xf32>
    %247 = vector.multi_reduction <maximumf>, %246, %cst_69 [1] : vector<8x16xf32> to vector<8xf32>
    %248 = vector.shape_cast %247 : vector<8xf32> to vector<8x1xf32>
    %249 = vector.broadcast %248 : vector<8x1xf32> to vector<8x16xf32>
    %250 = arith.subf %246, %249 : vector<8x16xf32>
    %251 = math.exp %250 : vector<8x16xf32>
    %cst_70 = arith.constant dense<0.000000e+00> : vector<8xf32>
    %252 = vector.multi_reduction <add>, %251, %cst_70 [1] : vector<8x16xf32> to vector<8xf32>
    %253 = vector.shape_cast %252 : vector<8xf32> to vector<8x1xf32>
    %254 = tpu.reciprocal %253 {approx = true} : vector<8x1xf32> -> vector<8x1xf32>
    %255 = vector.broadcast %254 : vector<8x1xf32> to vector<8x16xf32>
    %256 = arith.mulf %251, %255 : vector<8x16xf32>
    %cst_71 = arith.constant dense<0.000000e+00> : vector<8x16xf32>
    %257 = tpu.matmul %256, %244, %cst_71 {dimension_numbers = #tpu.dot_dimension_numbers<[1], [0], [0], [1], [0, 0, 1, 1], [], []>} : vector<8x16xf32>, vector<16x16xf32>, vector<8x16xf32> -> vector<8x16xf32>
    %258 = vector.extract_strided_slice %6 {offsets = [16, 0], sizes = [16, 32], strides = [1, 1]} : vector<32x32xf32> to vector<16x32xf32>
    %cst_72 = arith.constant dense<0.000000e+00> : vector<8x32xf32>
    %259 = tpu.matmul %257, %258, %cst_72 {dimension_numbers = #tpu.dot_dimension_numbers<[1], [0], [0], [1], [0, 0, 1, 1], [], []>} : vector<8x16xf32>, vector<16x32xf32>, vector<8x32xf32> -> vector<8x32xf32>
    %260 = arith.addf %242, %259 : vector<8x32xf32>
    %261 = vector.broadcast %11 : vector<1x32xf32> to vector<8x32xf32>
    %262 = arith.addf %260, %261 : vector<8x32xf32>
    %263 = arith.addf %9, %262 : vector<8x32xf32>
    %cst_73 = arith.constant dense<0.000000e+00> : vector<8xf32>
    %264 = vector.multi_reduction <add>, %263, %cst_73 [1] : vector<8x32xf32> to vector<8xf32>
    %265 = vector.shape_cast %264 : vector<8xf32> to vector<8x1xf32>
    %cst_74 = arith.constant 3.200000e+01 : f32
    %266 = vector.broadcast %cst_74 : f32 to vector<8x1xf32>
    %267 = arith.divf %265, %266 : vector<8x1xf32>
    %268 = vector.broadcast %267 : vector<8x1xf32> to vector<8x32xf32>
    %269 = arith.subf %263, %268 : vector<8x32xf32>
    %270 = arith.mulf %269, %269 : vector<8x32xf32>
    %cst_75 = arith.constant dense<0.000000e+00> : vector<8xf32>
    %271 = vector.multi_reduction <add>, %270, %cst_75 [1] : vector<8x32xf32> to vector<8xf32>
    %272 = vector.shape_cast %271 : vector<8xf32> to vector<8x1xf32>
    %cst_76 = arith.constant 3.200000e+01 : f32
    %273 = vector.broadcast %cst_76 : f32 to vector<8x1xf32>
    %274 = arith.divf %272, %273 : vector<8x1xf32>
    %275 = vector.broadcast %267 : vector<8x1xf32> to vector<8x32xf32>
    %276 = arith.subf %263, %275 : vector<8x32xf32>
    %cst_77 = arith.constant 9.99999974E-6 : f32
    %277 = vector.broadcast %cst_77 : f32 to vector<8x1xf32>
    %278 = arith.addf %274, %277 : vector<8x1xf32>
    %279 = math.rsqrt %278 : vector<8x1xf32>
    %280 = vector.broadcast %279 : vector<8x1xf32> to vector<8x32xf32>
    %281 = arith.mulf %276, %280 : vector<8x32xf32>
    %282 = vector.broadcast %13 : vector<1x32xf32> to vector<8x32xf32>
    %283 = arith.mulf %281, %282 : vector<8x32xf32>
    %284 = vector.broadcast %14 : vector<1x32xf32> to vector<8x32xf32>
    %285 = arith.addf %283, %284 : vector<8x32xf32>
    %cst_78 = arith.constant dense<0.000000e+00> : vector<8x32xf32>
    %286 = tpu.matmul %285, %7, %cst_78 {dimension_numbers = #tpu.dot_dimension_numbers<[1], [0], [0], [1], [0, 0, 1, 1], [], []>} : vector<8x32xf32>, vector<32x32xf32>, vector<8x32xf32> -> vector<8x32xf32>
    %287 = arith.addf %285, %286 : vector<8x32xf32>
    %288 = vector.broadcast %12 : vector<1x32xf32> to vector<8x32xf32>
    %289 = arith.addf %287, %288 : vector<8x32xf32>
    %c3 = arith.constant 3 : index
    %c0_79 = arith.constant 0 : index
    %c0_80 = arith.constant 0 : index
    %290 = vector.load %arg4[%c3, %c0_79, %c0_80] : memref<8x8x32xf32, #tpu.memory_space<vmem>>, vector<1x8x32xf32>
    %291 = vector.shape_cast %290 : vector<1x8x32xf32> to vector<8x32xf32>
    %292 = vector.shape_cast %289 : vector<8x32xf32> to vector<1x8x32xf32>
    tpu.vector_store %arg4[%c3, %c0_79, %c0_80], %292 {strides = array<i32>} : memref<8x8x32xf32, #tpu.memory_space<vmem>>, vector<1x8x32xf32>,
    %293 = vector.extract_strided_slice %20 {offsets = [64, 0], sizes = [16, 64], strides = [1, 1]} : vector<128x64xf32> to vector<16x64xf32>
    %294 = vector.extract_strided_slice %293 {offsets = [0, 0], sizes = [16, 16], strides = [1, 1]} : vector<16x64xf32> to vector<16x16xf32>
    %295 = vector.extract_strided_slice %293 {offsets = [0, 32], sizes = [16, 16], strides = [1, 1]} : vector<16x64xf32> to vector<16x16xf32>
    %296 = vector.extract_strided_slice %8 {offsets = [0, 0], sizes = [8, 16], strides = [1, 1]} : vector<8x32xf32> to vector<8x16xf32>
    %cst_81 = arith.constant dense<0.000000e+00> : vector<8x16xf32>
    %297 = tpu.matmul %296, %294, %cst_81 {dimension_numbers = #tpu.dot_dimension_numbers<[1], [1], [0], [0], [0, 0, 1, 0], [], []>} : vector<8x16xf32>, vector<16x16xf32>, vector<8x16xf32> -> vector<8x16xf32>
    %cst_82 = arith.constant dense<0xFF800000> : vector<8xf32>
    %298 = vector.multi_reduction <maximumf>, %297, %cst_82 [1] : vector<8x16xf32> to vector<8xf32>
    %299 = vector.shape_cast %298 : vector<8xf32> to vector<8x1xf32>
    %300 = vector.broadcast %299 : vector<8x1xf32> to vector<8x16xf32>
    %301 = arith.subf %297, %300 : vector<8x16xf32>
    %302 = math.exp %301 : vector<8x16xf32>
    %cst_83 = arith.constant dense<0.000000e+00> : vector<8xf32>
    %303 = vector.multi_reduction <add>, %302, %cst_83 [1] : vector<8x16xf32> to vector<8xf32>
    %304 = vector.shape_cast %303 : vector<8xf32> to vector<8x1xf32>
    %305 = tpu.reciprocal %304 {approx = true} : vector<8x1xf32> -> vector<8x1xf32>
    %306 = vector.broadcast %305 : vector<8x1xf32> to vector<8x16xf32>
    %307 = arith.mulf %302, %306 : vector<8x16xf32>
    %cst_84 = arith.constant dense<0.000000e+00> : vector<8x16xf32>
    %308 = tpu.matmul %307, %295, %cst_84 {dimension_numbers = #tpu.dot_dimension_numbers<[1], [0], [0], [1], [0, 0, 1, 1], [], []>} : vector<8x16xf32>, vector<16x16xf32>, vector<8x16xf32> -> vector<8x16xf32>
    %309 = vector.extract_strided_slice %6 {offsets = [0, 0], sizes = [16, 32], strides = [1, 1]} : vector<32x32xf32> to vector<16x32xf32>
    %cst_85 = arith.constant dense<0.000000e+00> : vector<8x32xf32>
    %310 = tpu.matmul %308, %309, %cst_85 {dimension_numbers = #tpu.dot_dimension_numbers<[1], [0], [0], [1], [0, 0, 1, 1], [], []>} : vector<8x16xf32>, vector<16x32xf32>, vector<8x32xf32> -> vector<8x32xf32>
    %311 = vector.extract_strided_slice %293 {offsets = [0, 16], sizes = [16, 16], strides = [1, 1]} : vector<16x64xf32> to vector<16x16xf32>
    %312 = vector.extract_strided_slice %293 {offsets = [0, 48], sizes = [16, 16], strides = [1, 1]} : vector<16x64xf32> to vector<16x16xf32>
    %313 = vector.extract_strided_slice %8 {offsets = [0, 16], sizes = [8, 16], strides = [1, 1]} : vector<8x32xf32> to vector<8x16xf32>
    %cst_86 = arith.constant dense<0.000000e+00> : vector<8x16xf32>
    %314 = tpu.matmul %313, %311, %cst_86 {dimension_numbers = #tpu.dot_dimension_numbers<[1], [1], [0], [0], [0, 0, 1, 0], [], []>} : vector<8x16xf32>, vector<16x16xf32>, vector<8x16xf32> -> vector<8x16xf32>
    %cst_87 = arith.constant dense<0xFF800000> : vector<8xf32>
    %315 = vector.multi_reduction <maximumf>, %314, %cst_87 [1] : vector<8x16xf32> to vector<8xf32>
    %316 = vector.shape_cast %315 : vector<8xf32> to vector<8x1xf32>
    %317 = vector.broadcast %316 : vector<8x1xf32> to vector<8x16xf32>
    %318 = arith.subf %314, %317 : vector<8x16xf32>
    %319 = math.exp %318 : vector<8x16xf32>
    %cst_88 = arith.constant dense<0.000000e+00> : vector<8xf32>
    %320 = vector.multi_reduction <add>, %319, %cst_88 [1] : vector<8x16xf32> to vector<8xf32>
    %321 = vector.shape_cast %320 : vector<8xf32> to vector<8x1xf32>
    %322 = tpu.reciprocal %321 {approx = true} : vector<8x1xf32> -> vector<8x1xf32>
    %323 = vector.broadcast %322 : vector<8x1xf32> to vector<8x16xf32>
    %324 = arith.mulf %319, %323 : vector<8x16xf32>
    %cst_89 = arith.constant dense<0.000000e+00> : vector<8x16xf32>
    %325 = tpu.matmul %324, %312, %cst_89 {dimension_numbers = #tpu.dot_dimension_numbers<[1], [0], [0], [1], [0, 0, 1, 1], [], []>} : vector<8x16xf32>, vector<16x16xf32>, vector<8x16xf32> -> vector<8x16xf32>
    %326 = vector.extract_strided_slice %6 {offsets = [16, 0], sizes = [16, 32], strides = [1, 1]} : vector<32x32xf32> to vector<16x32xf32>
    %cst_90 = arith.constant dense<0.000000e+00> : vector<8x32xf32>
    %327 = tpu.matmul %325, %326, %cst_90 {dimension_numbers = #tpu.dot_dimension_numbers<[1], [0], [0], [1], [0, 0, 1, 1], [], []>} : vector<8x16xf32>, vector<16x32xf32>, vector<8x32xf32> -> vector<8x32xf32>
    %328 = arith.addf %310, %327 : vector<8x32xf32>
    %329 = vector.broadcast %11 : vector<1x32xf32> to vector<8x32xf32>
    %330 = arith.addf %328, %329 : vector<8x32xf32>
    %331 = arith.addf %9, %330 : vector<8x32xf32>
    %cst_91 = arith.constant dense<0.000000e+00> : vector<8xf32>
    %332 = vector.multi_reduction <add>, %331, %cst_91 [1] : vector<8x32xf32> to vector<8xf32>
    %333 = vector.shape_cast %332 : vector<8xf32> to vector<8x1xf32>
    %cst_92 = arith.constant 3.200000e+01 : f32
    %334 = vector.broadcast %cst_92 : f32 to vector<8x1xf32>
    %335 = arith.divf %333, %334 : vector<8x1xf32>
    %336 = vector.broadcast %335 : vector<8x1xf32> to vector<8x32xf32>
    %337 = arith.subf %331, %336 : vector<8x32xf32>
    %338 = arith.mulf %337, %337 : vector<8x32xf32>
    %cst_93 = arith.constant dense<0.000000e+00> : vector<8xf32>
    %339 = vector.multi_reduction <add>, %338, %cst_93 [1] : vector<8x32xf32> to vector<8xf32>
    %340 = vector.shape_cast %339 : vector<8xf32> to vector<8x1xf32>
    %cst_94 = arith.constant 3.200000e+01 : f32
    %341 = vector.broadcast %cst_94 : f32 to vector<8x1xf32>
    %342 = arith.divf %340, %341 : vector<8x1xf32>
    %343 = vector.broadcast %335 : vector<8x1xf32> to vector<8x32xf32>
    %344 = arith.subf %331, %343 : vector<8x32xf32>
    %cst_95 = arith.constant 9.99999974E-6 : f32
    %345 = vector.broadcast %cst_95 : f32 to vector<8x1xf32>
    %346 = arith.addf %342, %345 : vector<8x1xf32>
    %347 = math.rsqrt %346 : vector<8x1xf32>
    %348 = vector.broadcast %347 : vector<8x1xf32> to vector<8x32xf32>
    %349 = arith.mulf %344, %348 : vector<8x32xf32>
    %350 = vector.broadcast %13 : vector<1x32xf32> to vector<8x32xf32>
    %351 = arith.mulf %349, %350 : vector<8x32xf32>
    %352 = vector.broadcast %14 : vector<1x32xf32> to vector<8x32xf32>
    %353 = arith.addf %351, %352 : vector<8x32xf32>
    %cst_96 = arith.constant dense<0.000000e+00> : vector<8x32xf32>
    %354 = tpu.matmul %353, %7, %cst_96 {dimension_numbers = #tpu.dot_dimension_numbers<[1], [0], [0], [1], [0, 0, 1, 1], [], []>} : vector<8x32xf32>, vector<32x32xf32>, vector<8x32xf32> -> vector<8x32xf32>
    %355 = arith.addf %353, %354 : vector<8x32xf32>
    %356 = vector.broadcast %12 : vector<1x32xf32> to vector<8x32xf32>
    %357 = arith.addf %355, %356 : vector<8x32xf32>
    %c4 = arith.constant 4 : index
    %c0_97 = arith.constant 0 : index
    %c0_98 = arith.constant 0 : index
    %358 = vector.load %arg4[%c4, %c0_97, %c0_98] : memref<8x8x32xf32, #tpu.memory_space<vmem>>, vector<1x8x32xf32>
    %359 = vector.shape_cast %358 : vector<1x8x32xf32> to vector<8x32xf32>
    %360 = vector.shape_cast %357 : vector<8x32xf32> to vector<1x8x32xf32>
    tpu.vector_store %arg4[%c4, %c0_97, %c0_98], %360 {strides = array<i32>} : memref<8x8x32xf32, #tpu.memory_space<vmem>>, vector<1x8x32xf32>,
    %361 = vector.extract_strided_slice %20 {offsets = [80, 0], sizes = [16, 64], strides = [1, 1]} : vector<128x64xf32> to vector<16x64xf32>
    %362 = vector.extract_strided_slice %361 {offsets = [0, 0], sizes = [16, 16], strides = [1, 1]} : vector<16x64xf32> to vector<16x16xf32>
    %363 = vector.extract_strided_slice %361 {offsets = [0, 32], sizes = [16, 16], strides = [1, 1]} : vector<16x64xf32> to vector<16x16xf32>
    %364 = vector.extract_strided_slice %8 {offsets = [0, 0], sizes = [8, 16], strides = [1, 1]} : vector<8x32xf32> to vector<8x16xf32>
    %cst_99 = arith.constant dense<0.000000e+00> : vector<8x16xf32>
    %365 = tpu.matmul %364, %362, %cst_99 {dimension_numbers = #tpu.dot_dimension_numbers<[1], [1], [0], [0], [0, 0, 1, 0], [], []>} : vector<8x16xf32>, vector<16x16xf32>, vector<8x16xf32> -> vector<8x16xf32>
    %cst_100 = arith.constant dense<0xFF800000> : vector<8xf32>
    %366 = vector.multi_reduction <maximumf>, %365, %cst_100 [1] : vector<8x16xf32> to vector<8xf32>
    %367 = vector.shape_cast %366 : vector<8xf32> to vector<8x1xf32>
    %368 = vector.broadcast %367 : vector<8x1xf32> to vector<8x16xf32>
    %369 = arith.subf %365, %368 : vector<8x16xf32>
    %370 = math.exp %369 : vector<8x16xf32>
    %cst_101 = arith.constant dense<0.000000e+00> : vector<8xf32>
    %371 = vector.multi_reduction <add>, %370, %cst_101 [1] : vector<8x16xf32> to vector<8xf32>
    %372 = vector.shape_cast %371 : vector<8xf32> to vector<8x1xf32>
    %373 = tpu.reciprocal %372 {approx = true} : vector<8x1xf32> -> vector<8x1xf32>
    %374 = vector.broadcast %373 : vector<8x1xf32> to vector<8x16xf32>
    %375 = arith.mulf %370, %374 : vector<8x16xf32>
    %cst_102 = arith.constant dense<0.000000e+00> : vector<8x16xf32>
    %376 = tpu.matmul %375, %363, %cst_102 {dimension_numbers = #tpu.dot_dimension_numbers<[1], [0], [0], [1], [0, 0, 1, 1], [], []>} : vector<8x16xf32>, vector<16x16xf32>, vector<8x16xf32> -> vector<8x16xf32>
    %377 = vector.extract_strided_slice %6 {offsets = [0, 0], sizes = [16, 32], strides = [1, 1]} : vector<32x32xf32> to vector<16x32xf32>
    %cst_103 = arith.constant dense<0.000000e+00> : vector<8x32xf32>
    %378 = tpu.matmul %376, %377, %cst_103 {dimension_numbers = #tpu.dot_dimension_numbers<[1], [0], [0], [1], [0, 0, 1, 1], [], []>} : vector<8x16xf32>, vector<16x32xf32>, vector<8x32xf32> -> vector<8x32xf32>
    %379 = vector.extract_strided_slice %361 {offsets = [0, 16], sizes = [16, 16], strides = [1, 1]} : vector<16x64xf32> to vector<16x16xf32>
    %380 = vector.extract_strided_slice %361 {offsets = [0, 48], sizes = [16, 16], strides = [1, 1]} : vector<16x64xf32> to vector<16x16xf32>
    %381 = vector.extract_strided_slice %8 {offsets = [0, 16], sizes = [8, 16], strides = [1, 1]} : vector<8x32xf32> to vector<8x16xf32>
    %cst_104 = arith.constant dense<0.000000e+00> : vector<8x16xf32>
    %382 = tpu.matmul %381, %379, %cst_104 {dimension_numbers = #tpu.dot_dimension_numbers<[1], [1], [0], [0], [0, 0, 1, 0], [], []>} : vector<8x16xf32>, vector<16x16xf32>, vector<8x16xf32> -> vector<8x16xf32>
    %cst_105 = arith.constant dense<0xFF800000> : vector<8xf32>
    %383 = vector.multi_reduction <maximumf>, %382, %cst_105 [1] : vector<8x16xf32> to vector<8xf32>
    %384 = vector.shape_cast %383 : vector<8xf32> to vector<8x1xf32>
    %385 = vector.broadcast %384 : vector<8x1xf32> to vector<8x16xf32>
    %386 = arith.subf %382, %385 : vector<8x16xf32>
    %387 = math.exp %386 : vector<8x16xf32>
    %cst_106 = arith.constant dense<0.000000e+00> : vector<8xf32>
    %388 = vector.multi_reduction <add>, %387, %cst_106 [1] : vector<8x16xf32> to vector<8xf32>
    %389 = vector.shape_cast %388 : vector<8xf32> to vector<8x1xf32>
    %390 = tpu.reciprocal %389 {approx = true} : vector<8x1xf32> -> vector<8x1xf32>
    %391 = vector.broadcast %390 : vector<8x1xf32> to vector<8x16xf32>
    %392 = arith.mulf %387, %391 : vector<8x16xf32>
    %cst_107 = arith.constant dense<0.000000e+00> : vector<8x16xf32>
    %393 = tpu.matmul %392, %380, %cst_107 {dimension_numbers = #tpu.dot_dimension_numbers<[1], [0], [0], [1], [0, 0, 1, 1], [], []>} : vector<8x16xf32>, vector<16x16xf32>, vector<8x16xf32> -> vector<8x16xf32>
    %394 = vector.extract_strided_slice %6 {offsets = [16, 0], sizes = [16, 32], strides = [1, 1]} : vector<32x32xf32> to vector<16x32xf32>
    %cst_108 = arith.constant dense<0.000000e+00> : vector<8x32xf32>
    %395 = tpu.matmul %393, %394, %cst_108 {dimension_numbers = #tpu.dot_dimension_numbers<[1], [0], [0], [1], [0, 0, 1, 1], [], []>} : vector<8x16xf32>, vector<16x32xf32>, vector<8x32xf32> -> vector<8x32xf32>
    %396 = arith.addf %378, %395 : vector<8x32xf32>
    %397 = vector.broadcast %11 : vector<1x32xf32> to vector<8x32xf32>
    %398 = arith.addf %396, %397 : vector<8x32xf32>
    %399 = arith.addf %9, %398 : vector<8x32xf32>
    %cst_109 = arith.constant dense<0.000000e+00> : vector<8xf32>
    %400 = vector.multi_reduction <add>, %399, %cst_109 [1] : vector<8x32xf32> to vector<8xf32>
    %401 = vector.shape_cast %400 : vector<8xf32> to vector<8x1xf32>
    %cst_110 = arith.constant 3.200000e+01 : f32
    %402 = vector.broadcast %cst_110 : f32 to vector<8x1xf32>
    %403 = arith.divf %401, %402 : vector<8x1xf32>
    %404 = vector.broadcast %403 : vector<8x1xf32> to vector<8x32xf32>
    %405 = arith.subf %399, %404 : vector<8x32xf32>
    %406 = arith.mulf %405, %405 : vector<8x32xf32>
    %cst_111 = arith.constant dense<0.000000e+00> : vector<8xf32>
    %407 = vector.multi_reduction <add>, %406, %cst_111 [1] : vector<8x32xf32> to vector<8xf32>
    %408 = vector.shape_cast %407 : vector<8xf32> to vector<8x1xf32>
    %cst_112 = arith.constant 3.200000e+01 : f32
    %409 = vector.broadcast %cst_112 : f32 to vector<8x1xf32>
    %410 = arith.divf %408, %409 : vector<8x1xf32>
    %411 = vector.broadcast %403 : vector<8x1xf32> to vector<8x32xf32>
    %412 = arith.subf %399, %411 : vector<8x32xf32>
    %cst_113 = arith.constant 9.99999974E-6 : f32
    %413 = vector.broadcast %cst_113 : f32 to vector<8x1xf32>
    %414 = arith.addf %410, %413 : vector<8x1xf32>
    %415 = math.rsqrt %414 : vector<8x1xf32>
    %416 = vector.broadcast %415 : vector<8x1xf32> to vector<8x32xf32>
    %417 = arith.mulf %412, %416 : vector<8x32xf32>
    %418 = vector.broadcast %13 : vector<1x32xf32> to vector<8x32xf32>
    %419 = arith.mulf %417, %418 : vector<8x32xf32>
    %420 = vector.broadcast %14 : vector<1x32xf32> to vector<8x32xf32>
    %421 = arith.addf %419, %420 : vector<8x32xf32>
    %cst_114 = arith.constant dense<0.000000e+00> : vector<8x32xf32>
    %422 = tpu.matmul %421, %7, %cst_114 {dimension_numbers = #tpu.dot_dimension_numbers<[1], [0], [0], [1], [0, 0, 1, 1], [], []>} : vector<8x32xf32>, vector<32x32xf32>, vector<8x32xf32> -> vector<8x32xf32>
    %423 = arith.addf %421, %422 : vector<8x32xf32>
    %424 = vector.broadcast %12 : vector<1x32xf32> to vector<8x32xf32>
    %425 = arith.addf %423, %424 : vector<8x32xf32>
    %c5 = arith.constant 5 : index
    %c0_115 = arith.constant 0 : index
    %c0_116 = arith.constant 0 : index
    %426 = vector.load %arg4[%c5, %c0_115, %c0_116] : memref<8x8x32xf32, #tpu.memory_space<vmem>>, vector<1x8x32xf32>
    %427 = vector.shape_cast %426 : vector<1x8x32xf32> to vector<8x32xf32>
    %428 = vector.shape_cast %425 : vector<8x32xf32> to vector<1x8x32xf32>
    tpu.vector_store %arg4[%c5, %c0_115, %c0_116], %428 {strides = array<i32>} : memref<8x8x32xf32, #tpu.memory_space<vmem>>, vector<1x8x32xf32>,
    %429 = vector.extract_strided_slice %20 {offsets = [96, 0], sizes = [16, 64], strides = [1, 1]} : vector<128x64xf32> to vector<16x64xf32>
    %430 = vector.extract_strided_slice %429 {offsets = [0, 0], sizes = [16, 16], strides = [1, 1]} : vector<16x64xf32> to vector<16x16xf32>
    %431 = vector.extract_strided_slice %429 {offsets = [0, 32], sizes = [16, 16], strides = [1, 1]} : vector<16x64xf32> to vector<16x16xf32>
    %432 = vector.extract_strided_slice %8 {offsets = [0, 0], sizes = [8, 16], strides = [1, 1]} : vector<8x32xf32> to vector<8x16xf32>
    %cst_117 = arith.constant dense<0.000000e+00> : vector<8x16xf32>
    %433 = tpu.matmul %432, %430, %cst_117 {dimension_numbers = #tpu.dot_dimension_numbers<[1], [1], [0], [0], [0, 0, 1, 0], [], []>} : vector<8x16xf32>, vector<16x16xf32>, vector<8x16xf32> -> vector<8x16xf32>
    %cst_118 = arith.constant dense<0xFF800000> : vector<8xf32>
    %434 = vector.multi_reduction <maximumf>, %433, %cst_118 [1] : vector<8x16xf32> to vector<8xf32>
    %435 = vector.shape_cast %434 : vector<8xf32> to vector<8x1xf32>
    %436 = vector.broadcast %435 : vector<8x1xf32> to vector<8x16xf32>
    %437 = arith.subf %433, %436 : vector<8x16xf32>
    %438 = math.exp %437 : vector<8x16xf32>
    %cst_119 = arith.constant dense<0.000000e+00> : vector<8xf32>
    %439 = vector.multi_reduction <add>, %438, %cst_119 [1] : vector<8x16xf32> to vector<8xf32>
    %440 = vector.shape_cast %439 : vector<8xf32> to vector<8x1xf32>
    %441 = tpu.reciprocal %440 {approx = true} : vector<8x1xf32> -> vector<8x1xf32>
    %442 = vector.broadcast %441 : vector<8x1xf32> to vector<8x16xf32>
    %443 = arith.mulf %438, %442 : vector<8x16xf32>
    %cst_120 = arith.constant dense<0.000000e+00> : vector<8x16xf32>
    %444 = tpu.matmul %443, %431, %cst_120 {dimension_numbers = #tpu.dot_dimension_numbers<[1], [0], [0], [1], [0, 0, 1, 1], [], []>} : vector<8x16xf32>, vector<16x16xf32>, vector<8x16xf32> -> vector<8x16xf32>
    %445 = vector.extract_strided_slice %6 {offsets = [0, 0], sizes = [16, 32], strides = [1, 1]} : vector<32x32xf32> to vector<16x32xf32>
    %cst_121 = arith.constant dense<0.000000e+00> : vector<8x32xf32>
    %446 = tpu.matmul %444, %445, %cst_121 {dimension_numbers = #tpu.dot_dimension_numbers<[1], [0], [0], [1], [0, 0, 1, 1], [], []>} : vector<8x16xf32>, vector<16x32xf32>, vector<8x32xf32> -> vector<8x32xf32>
    %447 = vector.extract_strided_slice %429 {offsets = [0, 16], sizes = [16, 16], strides = [1, 1]} : vector<16x64xf32> to vector<16x16xf32>
    %448 = vector.extract_strided_slice %429 {offsets = [0, 48], sizes = [16, 16], strides = [1, 1]} : vector<16x64xf32> to vector<16x16xf32>
    %449 = vector.extract_strided_slice %8 {offsets = [0, 16], sizes = [8, 16], strides = [1, 1]} : vector<8x32xf32> to vector<8x16xf32>
    %cst_122 = arith.constant dense<0.000000e+00> : vector<8x16xf32>
    %450 = tpu.matmul %449, %447, %cst_122 {dimension_numbers = #tpu.dot_dimension_numbers<[1], [1], [0], [0], [0, 0, 1, 0], [], []>} : vector<8x16xf32>, vector<16x16xf32>, vector<8x16xf32> -> vector<8x16xf32>
    %cst_123 = arith.constant dense<0xFF800000> : vector<8xf32>
    %451 = vector.multi_reduction <maximumf>, %450, %cst_123 [1] : vector<8x16xf32> to vector<8xf32>
    %452 = vector.shape_cast %451 : vector<8xf32> to vector<8x1xf32>
    %453 = vector.broadcast %452 : vector<8x1xf32> to vector<8x16xf32>
    %454 = arith.subf %450, %453 : vector<8x16xf32>
    %455 = math.exp %454 : vector<8x16xf32>
    %cst_124 = arith.constant dense<0.000000e+00> : vector<8xf32>
    %456 = vector.multi_reduction <add>, %455, %cst_124 [1] : vector<8x16xf32> to vector<8xf32>
    %457 = vector.shape_cast %456 : vector<8xf32> to vector<8x1xf32>
    %458 = tpu.reciprocal %457 {approx = true} : vector<8x1xf32> -> vector<8x1xf32>
    %459 = vector.broadcast %458 : vector<8x1xf32> to vector<8x16xf32>
    %460 = arith.mulf %455, %459 : vector<8x16xf32>
    %cst_125 = arith.constant dense<0.000000e+00> : vector<8x16xf32>
    %461 = tpu.matmul %460, %448, %cst_125 {dimension_numbers = #tpu.dot_dimension_numbers<[1], [0], [0], [1], [0, 0, 1, 1], [], []>} : vector<8x16xf32>, vector<16x16xf32>, vector<8x16xf32> -> vector<8x16xf32>
    %462 = vector.extract_strided_slice %6 {offsets = [16, 0], sizes = [16, 32], strides = [1, 1]} : vector<32x32xf32> to vector<16x32xf32>
    %cst_126 = arith.constant dense<0.000000e+00> : vector<8x32xf32>
    %463 = tpu.matmul %461, %462, %cst_126 {dimension_numbers = #tpu.dot_dimension_numbers<[1], [0], [0], [1], [0, 0, 1, 1], [], []>} : vector<8x16xf32>, vector<16x32xf32>, vector<8x32xf32> -> vector<8x32xf32>
    %464 = arith.addf %446, %463 : vector<8x32xf32>
    %465 = vector.broadcast %11 : vector<1x32xf32> to vector<8x32xf32>
    %466 = arith.addf %464, %465 : vector<8x32xf32>
    %467 = arith.addf %9, %466 : vector<8x32xf32>
    %cst_127 = arith.constant dense<0.000000e+00> : vector<8xf32>
    %468 = vector.multi_reduction <add>, %467, %cst_127 [1] : vector<8x32xf32> to vector<8xf32>
    %469 = vector.shape_cast %468 : vector<8xf32> to vector<8x1xf32>
    %cst_128 = arith.constant 3.200000e+01 : f32
    %470 = vector.broadcast %cst_128 : f32 to vector<8x1xf32>
    %471 = arith.divf %469, %470 : vector<8x1xf32>
    %472 = vector.broadcast %471 : vector<8x1xf32> to vector<8x32xf32>
    %473 = arith.subf %467, %472 : vector<8x32xf32>
    %474 = arith.mulf %473, %473 : vector<8x32xf32>
    %cst_129 = arith.constant dense<0.000000e+00> : vector<8xf32>
    %475 = vector.multi_reduction <add>, %474, %cst_129 [1] : vector<8x32xf32> to vector<8xf32>
    %476 = vector.shape_cast %475 : vector<8xf32> to vector<8x1xf32>
    %cst_130 = arith.constant 3.200000e+01 : f32
    %477 = vector.broadcast %cst_130 : f32 to vector<8x1xf32>
    %478 = arith.divf %476, %477 : vector<8x1xf32>
    %479 = vector.broadcast %471 : vector<8x1xf32> to vector<8x32xf32>
    %480 = arith.subf %467, %479 : vector<8x32xf32>
    %cst_131 = arith.constant 9.99999974E-6 : f32
    %481 = vector.broadcast %cst_131 : f32 to vector<8x1xf32>
    %482 = arith.addf %478, %481 : vector<8x1xf32>
    %483 = math.rsqrt %482 : vector<8x1xf32>
    %484 = vector.broadcast %483 : vector<8x1xf32> to vector<8x32xf32>
    %485 = arith.mulf %480, %484 : vector<8x32xf32>
    %486 = vector.broadcast %13 : vector<1x32xf32> to vector<8x32xf32>
    %487 = arith.mulf %485, %486 : vector<8x32xf32>
    %488 = vector.broadcast %14 : vector<1x32xf32> to vector<8x32xf32>
    %489 = arith.addf %487, %488 : vector<8x32xf32>
    %cst_132 = arith.constant dense<0.000000e+00> : vector<8x32xf32>
    %490 = tpu.matmul %489, %7, %cst_132 {dimension_numbers = #tpu.dot_dimension_numbers<[1], [0], [0], [1], [0, 0, 1, 1], [], []>} : vector<8x32xf32>, vector<32x32xf32>, vector<8x32xf32> -> vector<8x32xf32>
    %491 = arith.addf %489, %490 : vector<8x32xf32>
    %492 = vector.broadcast %12 : vector<1x32xf32> to vector<8x32xf32>
    %493 = arith.addf %491, %492 : vector<8x32xf32>
    %c6 = arith.constant 6 : index
    %c0_133 = arith.constant 0 : index
    %c0_134 = arith.constant 0 : index
    %494 = vector.load %arg4[%c6, %c0_133, %c0_134] : memref<8x8x32xf32, #tpu.memory_space<vmem>>, vector<1x8x32xf32>
    %495 = vector.shape_cast %494 : vector<1x8x32xf32> to vector<8x32xf32>
    %496 = vector.shape_cast %493 : vector<8x32xf32> to vector<1x8x32xf32>
    tpu.vector_store %arg4[%c6, %c0_133, %c0_134], %496 {strides = array<i32>} : memref<8x8x32xf32, #tpu.memory_space<vmem>>, vector<1x8x32xf32>,
    %497 = vector.extract_strided_slice %20 {offsets = [112, 0], sizes = [16, 64], strides = [1, 1]} : vector<128x64xf32> to vector<16x64xf32>
    %498 = vector.extract_strided_slice %497 {offsets = [0, 0], sizes = [16, 16], strides = [1, 1]} : vector<16x64xf32> to vector<16x16xf32>
    %499 = vector.extract_strided_slice %497 {offsets = [0, 32], sizes = [16, 16], strides = [1, 1]} : vector<16x64xf32> to vector<16x16xf32>
    %500 = vector.extract_strided_slice %8 {offsets = [0, 0], sizes = [8, 16], strides = [1, 1]} : vector<8x32xf32> to vector<8x16xf32>
    %cst_135 = arith.constant dense<0.000000e+00> : vector<8x16xf32>
    %501 = tpu.matmul %500, %498, %cst_135 {dimension_numbers = #tpu.dot_dimension_numbers<[1], [1], [0], [0], [0, 0, 1, 0], [], []>} : vector<8x16xf32>, vector<16x16xf32>, vector<8x16xf32> -> vector<8x16xf32>
    %cst_136 = arith.constant dense<0xFF800000> : vector<8xf32>
    %502 = vector.multi_reduction <maximumf>, %501, %cst_136 [1] : vector<8x16xf32> to vector<8xf32>
    %503 = vector.shape_cast %502 : vector<8xf32> to vector<8x1xf32>
    %504 = vector.broadcast %503 : vector<8x1xf32> to vector<8x16xf32>
    %505 = arith.subf %501, %504 : vector<8x16xf32>
    %506 = math.exp %505 : vector<8x16xf32>
    %cst_137 = arith.constant dense<0.000000e+00> : vector<8xf32>
    %507 = vector.multi_reduction <add>, %506, %cst_137 [1] : vector<8x16xf32> to vector<8xf32>
    %508 = vector.shape_cast %507 : vector<8xf32> to vector<8x1xf32>
    %509 = tpu.reciprocal %508 {approx = true} : vector<8x1xf32> -> vector<8x1xf32>
    %510 = vector.broadcast %509 : vector<8x1xf32> to vector<8x16xf32>
    %511 = arith.mulf %506, %510 : vector<8x16xf32>
    %cst_138 = arith.constant dense<0.000000e+00> : vector<8x16xf32>
    %512 = tpu.matmul %511, %499, %cst_138 {dimension_numbers = #tpu.dot_dimension_numbers<[1], [0], [0], [1], [0, 0, 1, 1], [], []>} : vector<8x16xf32>, vector<16x16xf32>, vector<8x16xf32> -> vector<8x16xf32>
    %513 = vector.extract_strided_slice %6 {offsets = [0, 0], sizes = [16, 32], strides = [1, 1]} : vector<32x32xf32> to vector<16x32xf32>
    %cst_139 = arith.constant dense<0.000000e+00> : vector<8x32xf32>
    %514 = tpu.matmul %512, %513, %cst_139 {dimension_numbers = #tpu.dot_dimension_numbers<[1], [0], [0], [1], [0, 0, 1, 1], [], []>} : vector<8x16xf32>, vector<16x32xf32>, vector<8x32xf32> -> vector<8x32xf32>
    %515 = vector.extract_strided_slice %497 {offsets = [0, 16], sizes = [16, 16], strides = [1, 1]} : vector<16x64xf32> to vector<16x16xf32>
    %516 = vector.extract_strided_slice %497 {offsets = [0, 48], sizes = [16, 16], strides = [1, 1]} : vector<16x64xf32> to vector<16x16xf32>
    %517 = vector.extract_strided_slice %8 {offsets = [0, 16], sizes = [8, 16], strides = [1, 1]} : vector<8x32xf32> to vector<8x16xf32>
    %cst_140 = arith.constant dense<0.000000e+00> : vector<8x16xf32>
    %518 = tpu.matmul %517, %515, %cst_140 {dimension_numbers = #tpu.dot_dimension_numbers<[1], [1], [0], [0], [0, 0, 1, 0], [], []>} : vector<8x16xf32>, vector<16x16xf32>, vector<8x16xf32> -> vector<8x16xf32>
    %cst_141 = arith.constant dense<0xFF800000> : vector<8xf32>
    %519 = vector.multi_reduction <maximumf>, %518, %cst_141 [1] : vector<8x16xf32> to vector<8xf32>
    %520 = vector.shape_cast %519 : vector<8xf32> to vector<8x1xf32>
    %521 = vector.broadcast %520 : vector<8x1xf32> to vector<8x16xf32>
    %522 = arith.subf %518, %521 : vector<8x16xf32>
    %523 = math.exp %522 : vector<8x16xf32>
    %cst_142 = arith.constant dense<0.000000e+00> : vector<8xf32>
    %524 = vector.multi_reduction <add>, %523, %cst_142 [1] : vector<8x16xf32> to vector<8xf32>
    %525 = vector.shape_cast %524 : vector<8xf32> to vector<8x1xf32>
    %526 = tpu.reciprocal %525 {approx = true} : vector<8x1xf32> -> vector<8x1xf32>
    %527 = vector.broadcast %526 : vector<8x1xf32> to vector<8x16xf32>
    %528 = arith.mulf %523, %527 : vector<8x16xf32>
    %cst_143 = arith.constant dense<0.000000e+00> : vector<8x16xf32>
    %529 = tpu.matmul %528, %516, %cst_143 {dimension_numbers = #tpu.dot_dimension_numbers<[1], [0], [0], [1], [0, 0, 1, 1], [], []>} : vector<8x16xf32>, vector<16x16xf32>, vector<8x16xf32> -> vector<8x16xf32>
    %530 = vector.extract_strided_slice %6 {offsets = [16, 0], sizes = [16, 32], strides = [1, 1]} : vector<32x32xf32> to vector<16x32xf32>
    %cst_144 = arith.constant dense<0.000000e+00> : vector<8x32xf32>
    %531 = tpu.matmul %529, %530, %cst_144 {dimension_numbers = #tpu.dot_dimension_numbers<[1], [0], [0], [1], [0, 0, 1, 1], [], []>} : vector<8x16xf32>, vector<16x32xf32>, vector<8x32xf32> -> vector<8x32xf32>
    %532 = arith.addf %514, %531 : vector<8x32xf32>
    %533 = vector.broadcast %11 : vector<1x32xf32> to vector<8x32xf32>
    %534 = arith.addf %532, %533 : vector<8x32xf32>
    %535 = arith.addf %9, %534 : vector<8x32xf32>
    %cst_145 = arith.constant dense<0.000000e+00> : vector<8xf32>
    %536 = vector.multi_reduction <add>, %535, %cst_145 [1] : vector<8x32xf32> to vector<8xf32>
    %537 = vector.shape_cast %536 : vector<8xf32> to vector<8x1xf32>
    %cst_146 = arith.constant 3.200000e+01 : f32
    %538 = vector.broadcast %cst_146 : f32 to vector<8x1xf32>
    %539 = arith.divf %537, %538 : vector<8x1xf32>
    %540 = vector.broadcast %539 : vector<8x1xf32> to vector<8x32xf32>
    %541 = arith.subf %535, %540 : vector<8x32xf32>
    %542 = arith.mulf %541, %541 : vector<8x32xf32>
    %cst_147 = arith.constant dense<0.000000e+00> : vector<8xf32>
    %543 = vector.multi_reduction <add>, %542, %cst_147 [1] : vector<8x32xf32> to vector<8xf32>
    %544 = vector.shape_cast %543 : vector<8xf32> to vector<8x1xf32>
    %cst_148 = arith.constant 3.200000e+01 : f32
    %545 = vector.broadcast %cst_148 : f32 to vector<8x1xf32>
    %546 = arith.divf %544, %545 : vector<8x1xf32>
    %547 = vector.broadcast %539 : vector<8x1xf32> to vector<8x32xf32>
    %548 = arith.subf %535, %547 : vector<8x32xf32>
    %cst_149 = arith.constant 9.99999974E-6 : f32
    %549 = vector.broadcast %cst_149 : f32 to vector<8x1xf32>
    %550 = arith.addf %546, %549 : vector<8x1xf32>
    %551 = math.rsqrt %550 : vector<8x1xf32>
    %552 = vector.broadcast %551 : vector<8x1xf32> to vector<8x32xf32>
    %553 = arith.mulf %548, %552 : vector<8x32xf32>
    %554 = vector.broadcast %13 : vector<1x32xf32> to vector<8x32xf32>
    %555 = arith.mulf %553, %554 : vector<8x32xf32>
    %556 = vector.broadcast %14 : vector<1x32xf32> to vector<8x32xf32>
    %557 = arith.addf %555, %556 : vector<8x32xf32>
    %cst_150 = arith.constant dense<0.000000e+00> : vector<8x32xf32>
    %558 = tpu.matmul %557, %7, %cst_150 {dimension_numbers = #tpu.dot_dimension_numbers<[1], [0], [0], [1], [0, 0, 1, 1], [], []>} : vector<8x32xf32>, vector<32x32xf32>, vector<8x32xf32> -> vector<8x32xf32>
    %559 = arith.addf %557, %558 : vector<8x32xf32>
    %560 = vector.broadcast %12 : vector<1x32xf32> to vector<8x32xf32>
    %561 = arith.addf %559, %560 : vector<8x32xf32>
    %c7 = arith.constant 7 : index
    %c0_151 = arith.constant 0 : index
    %c0_152 = arith.constant 0 : index
    %562 = vector.load %arg4[%c7, %c0_151, %c0_152] : memref<8x8x32xf32, #tpu.memory_space<vmem>>, vector<1x8x32xf32>
    %563 = vector.shape_cast %562 : vector<1x8x32xf32> to vector<8x32xf32>
    %564 = vector.shape_cast %561 : vector<8x32xf32> to vector<1x8x32xf32>
    tpu.vector_store %arg4[%c7, %c0_151, %c0_152], %564 {strides = array<i32>} : memref<8x8x32xf32, #tpu.memory_space<vmem>>, vector<1x8x32xf32>,
    return
  }
  func.func @transform_0(%arg0: i32) -> (i32, i32) {
    %c0_i32 = arith.constant 0 : i32
    %c0_i32_0 = arith.constant 0 : i32
    return %arg0, %c0_i32 : i32, i32
  }
  func.func @transform_1(%arg0: i32) -> (i32, i32, i32) {
    %c0_i32 = arith.constant 0 : i32
    %c0_i32_0 = arith.constant 0 : i32
    %c0_i32_1 = arith.constant 0 : i32
    return %arg0, %c0_i32, %c0_i32_0 : i32, i32, i32
  }
  func.func @transform_2(%arg0: i32) -> (i32, i32) {
    %c0_i32 = arith.constant 0 : i32
    %c0_i32_0 = arith.constant 0 : i32
    %c0_i32_1 = arith.constant 0 : i32
    return %c0_i32, %c0_i32_0 : i32, i32
  }
  func.func @transform_3(%arg0: i32) -> (i32, i32, i32) {
    %c0_i32 = arith.constant 0 : i32
    %c0_i32_0 = arith.constant 0 : i32
    %c0_i32_1 = arith.constant 0 : i32
    return %arg0, %c0_i32, %c0_i32_0 : i32, i32, i32
  }
}

</mosaic_0001>

<bundles_post_ra>
// kernel: tpu_custom_call.1
= control target key start
LH: loop header
LB: loop body
LE: loop exit
PB: predicated region body
PF: predicated region fallthrough
CT: control target
= control target key end

     0   :  { %8 = vsyncpa [#allocation3], 0  ;;  %s8186_s0 = inlined_call_operand.vmem [shape: f32[256,32], index: 0, kind: input, shape index: {}]   ;;  %s8187_s1 = inlined_call_operand.vmem [shape: f32[2,128,128], index: 1, kind: input, shape index: {}]   ;;  %s8188_s2 = inlined_call_operand.vmem [shape: f32[112,64], index: 2, kind: input, shape index: {}]   ;;  %s8189_s3 = inlined_call_operand.hbm [shape: f32[16,8,32], index: 3, kind: output, shape index: {}]  }
   0x1   :  { %10 = vsyncpa [#allocation3 + $0x1], 0  ;;  %s7250_s12 = smov 0   ;;  %s7252_s13 = smov 0  }
   0x2   :  { %s7254_s14 = smov 0   ;;  %s7256_s15 = smov 0  }
   0x3 LB: > { %s7271_s16 = sadd.s32 4294967295, %s7218_s15   ;;  %s5682_s17 = sadd.s32 4294967294, %s7218_s15   ;;  %s7218_s15 = sphi %s7256_s15, %s8197_s15   ;;  %s7214_s14 = sphi %s7254_s14, %s8196_s14   ;;  %s7210_s13 = sphi %s7252_s13, %s8195_s13   ;;  %s7206_s12 = sphi %s7250_s12, %s8194_s12  }
   0x4   : > { %s7275_s18 = sadd.s32 1, %s7218_s15   ;;  %s96_s19 = sadd.s32 1, %s7214_s14 }
   0x5   : > { %s93_s20 = ssub.s32 %s7218_s15, %s7275_s18  ;;  %p106_p0 = scmp.ne.s32.totalorder %s7214_s14, %s7210_s13 }
   0x6   : > { %p94_p1 = scmp.eq.s32.totalorder %s93_s20, 0  ;;  %p107_p2 = scmp.eq.s32.totalorder %s7271_s16, 1 }
   0x7   : > { %p112_p3 = scmp.ne.s32.totalorder %s7210_s13, %s7206_s12  ;;  %p113_p4 = scmp.eq.s32.totalorder %s5682_s17, 1 }
   0x8   : > { %s7286_s21 = scalar_select %p94_p1, %s7214_s14, %s96_s19  }
   0x9   : > { %p7288_p5 = por %p107_p2, %p106_p0  ;;  %p7292_p6 = por %p113_p4, %p112_p3 }
   0xa   : > { %p5685_p7 = scmp.ge.s32.totalorder %s7218_s15, 1  ;;  %p151_p8 = scmp.lt.s32.totalorder %s7218_s15, 3 }
   0xc   : > { %p152_p9 = pnand %p5685_p7, %p151_p8 }
   0xd   : > { %s5687_s24 = sshll.u32 (!%p152_p9), %s7271_s16, 4  ;;  %p186_p10 = scmp.lt.s32.totalorder (!%p152_p9), %s7271_s16, 1  ;;  %v228_v0 = vld [vmem:[%s8188_s2 + $0x20] sm:$0xff] (!%p152_p9)  ;;  %v229_v1 = vld [vmem:[%s8188_s2 + $0x28] sm:$0xff] (!%p152_p9)  ;;  %v230_v2 = vld [vmem:[%s8188_s2 + $0x30] sm:$0xff] (!%p152_p9)  ;;  %vm383_vm0 = vcmask (!%p152_p9), 261120  }
   0xe   : > { %155 = sbr.rel (%p152_p9) target bundleno = 11297 (0x2c21), region = 32  ;;  %p181_p11 = scmp.lt.s32.totalorder (!%p152_p9), %s5687_s24, 31  ;;  %v6657_v3 = vpack.c.bf16 (!%p152_p9), %v229_v1, %v228_v0  ;;  %v231_v4 = vld [vmem:[%s8188_s2 + $0x38] sm:$0xff] (!%p152_p9)  ;;  %v224_v6 = vld [vmem:[%s8188_s2] sm:$0xff] (!%p152_p9)  ;;  %v225_v7 = vld [vmem:[%s8188_s2 + $0x8] sm:$0xff] (!%p152_p9)  ;;  %vm7221_vm1 = vmmov (!%p152_p9), 0  }
   0xf   : > { %v6661_v5 = vpack.c.bf16 (!%p152_p9), %v231_v4, %v230_v2  ;;  %v6665_v8 = vpack.c.bf16 (!%p152_p9), %v225_v7, %v224_v6  ;;  %v226_v10 = vld [vmem:[%s8188_s2 + $0x10] sm:$0xff] (!%p152_p9)  ;;  %v227_v11 = vld [vmem:[%s8188_s2 + $0x18] sm:$0xff] (!%p152_p9)  ;;  %v7220_v4 = vmov (!%p152_p9), 0.0|0.0   ;;  %v770_v6 = vlaneseq (!%p152_p9)  ;;  %s7223_s7 = smov (!%p152_p9), 112   ;;  %s7224_s10 = smov (!%p152_p9), 96  }
  0x10   : > { %6658 = vmatprep.subr.bf16.mxu1 (!%p152_p9), %v6657_v3  ;;  %v6669_v20 = vpack.c.bf16 (!%p152_p9), %v227_v11, %v226_v10  ;;  %vm790_vm2 = vcmask (!%p152_p9), 130048   ;;  %s7226_s29 = smov (!%p152_p9), 32   ;;  %s177_s5 = sand.u32 (!%p152_p9), 1, %s7210_s13  }
  0x11   : > { %6660 = vmatpush3.bf16.msra.mxu1 (!%p152_p9), %v6657_v3  ;;  %v7405_v7 = vshrl.u32 (!%p152_p9), %v770_v6, 7  ;;  %vm7416_vm3 = vmpackc.low (!%p152_p9), %vm790_vm2, %vm790_vm2  ;;  %s5824_s8 = sshll.u32 (!%p152_p9), %s7271_s16, 10  ;;  %s8145_s20 = scalar_lea.sflag (!%p152_p9), [#allocation3], %s177_s5 }
  0x12   : > { %6662 = vmatprep.subr.bf16.mxu1 (!%p152_p9), %v6661_v5  ;;  %s8137_s19 = scalar_lea.hbm (!%p152_p9), %s8189_s3, %s5824_s8 }
  0x15   : > { %s187_s6 = scalar_select %p186_p10, %s7271_s16, 1  ;;  %6664 = vmatpush3.bf16.msra.mxu1 %v6661_v5  ;;  %v7222_v5 = vmov 0.0  }
  0x16   : > { %s8199_s24 = smov (!%p181_p11, %s5687_s24), 31  ;;  %6666 = vmatprep.subr.bf16.mxu1 %v6665_v8  ;;  %s7227_s16 = smov [#allocation2]  }
  0x17   : > { %s5823_s11 = sshll.u32 %s187_s6, 7  ;;  %s5688_s17 = sshll.u32 %s8199_s24, 3 }
  0x18   : > { %s7322_s25 = scalar_lea.vmem %s8187_s1, %s5823_s11  ;;  %s7327_s28 = scalar_lea.vmem %s8186_s0, %s5688_s17 }
  0x19   : > { %v208_v9 = vld [vmem:[%s7322_s25] sm:$0xff]  ;;  %v193_v13 = vld [vmem:[%s7327_s28 + $0x8] sm:$0xff]  ;;  %v194_v14 = vld [vmem:[%s7327_s28 + $0x10] sm:$0xff]  ;;  %s7225_s11 = smov 80   ;;  %s5686_s6 = sshll.u32 %s177_s5, 6 }
  0x1a   : > { %v192_v12 = vld [vmem:[%s7327_s28] sm:$0xff]  ;;  %6113 = vmatprep.mubr.f32.mxu0 %v208_v9  ;;  %v195_v16 = vld [vmem:[%s7327_s28 + $0x18] sm:$0xff]  ;;  %v197_v19 = vld [vmem:[%s7327_s28 + $0x28] sm:$0xff] }
  0x1b   : > { %v6625_v15 = vpack.c.bf16 %v193_v13, %v192_v12  ;;  %6145 = vmatprep.mubr.msk.f32.mxu1 %vm383_vm0, %v192_v12  ;;  %v6629_v17 = vpack.c.bf16 %v195_v16, %v194_v14  ;;  %v196_v18 = vld [vmem:[%s7327_s28 + $0x20] sm:$0xff]  ;;  %v198_v22 = vld [vmem:[%s7327_s28 + $0x30] sm:$0xff]  ;;  %v199_v23 = vld [vmem:[%s7327_s28 + $0x38] sm:$0xff] }
  0x1c   : > { %6146 = vmatmul.mubr.msk.f32.vlgmr.msra.gmra.mrb[0].mxu1 %vm383_vm0, %v193_v13  ;;  %v6633_v21 = vpack.c.bf16 %v197_v19, %v196_v18  ;;  %v6637_v24 = vpack.c.bf16 %v199_v23, %v198_v22  ;;  %v200_v25 = vld [vmem:[%s7327_s28 + $0x40] sm:$0xff]  ;;  %v201_v26 = vld [vmem:[%s7327_s28 + $0x48] sm:$0xff]  ;;  %v202_v28 = vld [vmem:[%s7327_s28 + $0x50] sm:$0xff] }
  0x1d   : > { %6626 = vmatprep.subr.bf16.mxu0 %v6625_v15  ;;  %6148 = vmatprep.mubr.msk.f32.mxu1 %vm383_vm0, %v194_v14  ;;  %v6641_v27 = vpack.c.bf16 %v201_v26, %v200_v25  ;;  %v203_v29 = vld [vmem:[%s7327_s28 + $0x58] sm:$0xff]  ;;  %v204_v31 = vld [vmem:[%s7327_s28 + $0x60] sm:$0xff]  ;;  %v205_v32 = vld [vmem:[%s7327_s28 + $0x68] sm:$0xff] }
  0x1e   : > { %6628 = vmatpush3.bf16.msra.mxu0 %v6625_v15  ;;  %6668 = vmatpush3.bf16.msra.mxu1 %v6665_v8  ;;  %v6645_v30 = vpack.c.bf16 %v203_v29, %v202_v28  ;;  %v6649_v33 = vpack.c.bf16 %v205_v32, %v204_v31  ;;  %v206_v34 = vld [vmem:[%s7327_s28 + $0x70] sm:$0xff]  ;;  %v207_v35 = vld [vmem:[%s7327_s28 + $0x78] sm:$0xff]  ;;  %v209_v37 = vld [vmem:[%s7322_s25 + $0x8] sm:$0xff]  ;;  %v772_v8 = vsub.s32 0, %v7405_v7 }
  0x1f   : > { %6630 = vmatprep.subr.bf16.mxu0 %v6629_v17  ;;  %6670 = vmatprep.subr.bf16.mxu1 %v6669_v20  ;;  %v6653_v36 = vpack.c.bf16 %v207_v35, %v206_v34  ;;  %v210_v38 = vld [vmem:[%s7322_s25 + $0x10] sm:$0xff]  ;;  %v211_v39 = vld [vmem:[%s7322_s25 + $0x18] sm:$0xff]  ;;  %v212_v40 = vld [vmem:[%s7322_s25 + $0x20] sm:$0xff] }
  0x20   : > { %6149 = vmatmul.mubr.msk.f32.gmra.mrb[2].mxu1 %vm383_vm0, %v195_v16  ;;  %v213_v41 = vld [vmem:[%s7322_s25 + $0x28] sm:$0xff]  ;;  %v214_v42 = vld [vmem:[%s7322_s25 + $0x30] sm:$0xff]  ;;  %v215_v43 = vld [vmem:[%s7322_s25 + $0x38] sm:$0xff] }
  0x21   : > { %6151 = vmatprep.mubr.msk.f32.mxu1 %vm383_vm0, %v196_v18  ;;  %v216_v44 = vld [vmem:[%s7322_s25 + $0x40] sm:$0xff]  ;;  %v217_v45 = vld [vmem:[%s7322_s25 + $0x48] sm:$0xff]  ;;  %v218_v46 = vld [vmem:[%s7322_s25 + $0x50] sm:$0xff] }
  0x22   : > { %6632 = vmatpush3.bf16.msra.mxu0 %v6629_v17  ;;  %6672 = vmatpush3.bf16.msra.mxu1 %v6669_v20  ;;  %v219_v47 = vld [vmem:[%s7322_s25 + $0x58] sm:$0xff]  ;;  %v220_v48 = vld [vmem:[%s7322_s25 + $0x60] sm:$0xff]  ;;  %v221_v49 = vld [vmem:[%s7322_s25 + $0x68] sm:$0xff] }
  0x23   : > { %6634 = vmatprep.subr.bf16.mxu0 %v6633_v21  ;;  %v222_v50 = vld [vmem:[%s7322_s25 + $0x70] sm:$0xff]  ;;  %v223_v51 = vld [vmem:[%s7322_s25 + $0x78] sm:$0xff]  ;;  %6680 = vmatprep.subr.bf16.mxu1 %v7220_v4  ;;  %v7411_v9 = vld [vmem:[%s8188_s2 + $0x68] sm:$0xff] }
  0x24   : > { %6152 = vmatmul.mubr.msk.f32.gmra.mrb[4].mxu1 %vm383_vm0, %v197_v19  ;;  %v773_v10 = vrot.slane %v7411_v9, %v772_v8 }
  0x25   : > { %6154 = vmatprep.mubr.msk.f32.mxu1 %vm383_vm0, %v198_v22 }
  0x26   : > { %6636 = vmatpush3.bf16.msra.mxu0 %v6633_v21 }
  0x27   : > { %6638 = vmatprep.subr.bf16.mxu0 %v6637_v24 }
  0x28   : > { %6155 = vmatmul.mubr.msk.f32.gmra.mrb[6].mxu1 %vm383_vm0, %v199_v23 }
  0x29   : > { %6157 = vmatprep.mubr.msk.f32.mxu1 %vm383_vm0, %v200_v25 }
  0x2a   : > { %6640 = vmatpush3.bf16.msra.mxu0 %v6637_v24 }
  0x2b   : > { %6642 = vmatprep.subr.bf16.mxu0 %v6641_v27 }
  0x2c   : > { %6158 = vmatmul.mubr.msk.f32.gmra.mrb[8].mxu1 %vm383_vm0, %v201_v26 }
  0x2d   : > { %6160 = vmatprep.mubr.msk.f32.mxu1 %vm383_vm0, %v202_v28 }
  0x2e   : > { %6644 = vmatpush3.bf16.msra.mxu0 %v6641_v27  ;;  %v7442_v27 = vld [vmem:[%s8188_s2 + $0x60] sm:$0xff] }
  0x2f   : > { %6646 = vmatprep.subr.bf16.mxu0 %v6645_v30 }
  0x30   : > { %6161 = vmatmul.mubr.msk.f32.gmra.mrb[10].mxu1 %vm383_vm0, %v203_v29 }
  0x31   : > { %6163 = vmatprep.mubr.msk.f32.mxu1 %vm383_vm0, %v204_v31 }
  0x32   : > { %6648 = vmatpush3.bf16.msra.mxu0 %v6645_v30 }
  0x33   : > { %6650 = vmatprep.subr.bf16.mxu0 %v6649_v33 }
  0x34   : > { %6164 = vmatmul.mubr.msk.f32.gmra.mrb[12].mxu1 %vm383_vm0, %v205_v32 }
  0x35   : > { %6166 = vmatprep.mubr.msk.f32.mxu1 %vm383_vm0, %v206_v34 }
  0x36   : > { %6652 = vmatpush3.bf16.msra.mxu0 %v6649_v33 }
  0x37   : > { %6654 = vmatprep.subr.bf16.mxu0 %v6653_v36 }
  0x38   : > { %6167 = vmatmul.mubr.msk.f32.gmra.mrb[14].mxu1 %vm383_vm0, %v207_v35 }
  0x3a   : > { %6656 = vmatpush3.bf16.msra.mxu0 %v6653_v36 }
  0x3b   : > { %6673 = vmatprep.subr.bf16.mxu0 %v7220_v4 }
  0x3d   : > { %6114 = vmatmul.mubr.f32.vlgmr.msra.gmra.mrb[0].mxu0 %v209_v37 }
  0x3e   : > { %6116 = vmatprep.mubr.f32.mxu0 %v210_v38 }
  0x41   : > { %6117 = vmatmul.mubr.f32.gmra.mrb[2].mxu0 %v211_v39 }
  0x42   : > { %6119 = vmatprep.mubr.f32.mxu0 %v212_v40 }
  0x45   : > { %6120 = vmatmul.mubr.f32.gmra.mrb[4].mxu0 %v213_v41 }
  0x46   : > { %6122 = vmatprep.mubr.f32.mxu0 %v214_v42 }
  0x49   : > { %6123 = vmatmul.mubr.f32.gmra.mrb[6].mxu0 %v215_v43 }
  0x4a   : > { %6125 = vmatprep.mubr.f32.mxu0 %v216_v44 }
  0x4d   : > { %6126 = vmatmul.mubr.f32.gmra.mrb[8].mxu0 %v217_v45 }
  0x4e   : > { %6128 = vmatprep.mubr.f32.mxu0 %v218_v46 }
  0x51   : > { %6129 = vmatmul.mubr.f32.gmra.mrb[10].mxu0 %v219_v47 }
  0x52   : > { %6131 = vmatprep.mubr.f32.mxu0 %v220_v48 }
  0x55   : > { %6132 = vmatmul.mubr.f32.gmra.mrb[12].mxu0 %v221_v49 }
  0x56   : > { %6134 = vmatprep.mubr.f32.mxu0 %v222_v50 }
  0x59   : > { %6135 = vmatmul.mubr.f32.gmra.mrb[14].mxu0 %v223_v51 }
  0x5a   : > { %6205 = vmatprep.mubr.msk.f32.mxu0 %vm7221_vm1, %v7222_v5 }
 0x110   : > { %v6115_v52 = vpop.f32.mrb[0].mxu0 }
 0x111   : > { %v304_v53 = vpop.f32.mrb[1].mxu0 }
 0x112   : > { %6177 = vmatprep.mubr.msk.f32.mxu1 %vm383_vm0, %v304_v53 }
 0x113   : > { %6178 = vmatmul.mubr.msk.f32.vlgmr.msra.gmra.mrb[0].mxu1 %vm383_vm0, %v6115_v52 }
 0x114   : > { %v6118_v54 = vpop.f32.mrb[2].mxu0 }
 0x115   : > { %v314_v55 = vpop.f32.mrb[3].mxu0 }
 0x116   : > { %6180 = vmatprep.mubr.msk.f32.mxu1 %vm383_vm0, %v314_v55 }
 0x117   : > { %6181 = vmatmul.mubr.msk.f32.gmra.mrb[2].mxu1 %vm383_vm0, %v6118_v54 }
 0x118   : > { %v6121_v56 = vpop.f32.mrb[4].mxu0 }
 0x119   : > { %v324_v57 = vpop.f32.mrb[5].mxu0 }
 0x11a   : > { %6183 = vmatprep.mubr.msk.f32.mxu1 %vm383_vm0, %v324_v57 }
 0x11b   : > { %6184 = vmatmul.mubr.msk.f32.gmra.mrb[4].mxu1 %vm383_vm0, %v6121_v56 }
 0x11c   : > { %v6124_v58 = vpop.f32.mrb[6].mxu0 }
 0x11d   : > { %v334_v59 = vpop.f32.mrb[7].mxu0 }
 0x11e   : > { %6186 = vmatprep.mubr.msk.f32.mxu1 %vm383_vm0, %v334_v59 }
 0x11f   : > { %6187 = vmatmul.mubr.msk.f32.gmra.mrb[6].mxu1 %vm383_vm0, %v6124_v58 }
 0x120   : > { %v6127_v60 = vpop.f32.mrb[8].mxu0 }
 0x121   : > { %v344_v61 = vpop.f32.mrb[9].mxu0 }
 0x122   : > { %6189 = vmatprep.mubr.msk.f32.mxu1 %vm383_vm0, %v344_v61 }
 0x123   : > { %6190 = vmatmul.mubr.msk.f32.gmra.mrb[8].mxu1 %vm383_vm0, %v6127_v60 }
 0x124   : > { %v6130_v62 = vpop.f32.mrb[10].mxu0 }
 0x125   : > { %v354_v63 = vpop.f32.mrb[11].mxu0 }
 0x126   : > { %6192 = vmatprep.mubr.msk.f32.mxu1 %vm383_vm0, %v354_v63 }
 0x127   : > { %6193 = vmatmul.mubr.msk.f32.gmra.mrb[10].mxu1 %vm383_vm0, %v6130_v62 }
 0x128   : > { %v6133_v0 = vpop.f32.mrb[12].mxu0 }
 0x129   : > { %v364_v1 = vpop.f32.mrb[13].mxu0 }
 0x12a   : > { %6195 = vmatprep.mubr.msk.f32.mxu1 %vm383_vm0, %v364_v1 }
 0x12b   : > { %6196 = vmatmul.mubr.msk.f32.gmra.mrb[12].mxu1 %vm383_vm0, %v6133_v0 }
 0x12c   : > { %v6136_v2 = vpop.f32.mrb[14].mxu0 }
 0x12d   : > { %v374_v3 = vpop.f32.mrb[15].mxu0 }
 0x12e   : > { %6198 = vmatprep.mubr.msk.f32.mxu1 %vm383_vm0, %v374_v3 }
 0x12f   : > { %6199 = vmatmul.mubr.msk.f32.gmra.mrb[14].mxu1 %vm383_vm0, %v6136_v2 }
 0x130   : > { %6219 = vmatprep.mubr.msk.f32.mxu1 %vm7221_vm1, %v7222_v5 }
 0x1e6   : > { %v6179_v11 = vpop.f32.mrb[0].mxu1 }
 0x1e7   : > { %v775_v12 = vadd.f32 %v6179_v11, %v773_v10  ;;  %v691_v13 = vpop.f32.mrb[1].mxu1 }
 0x1e8   : > { %v774_v14 = vadd.f32 %v773_v10, %v691_v13 }
 0x1ea   : > { %v6674_v16 = vpack.c.bf16 %v775_v12, %v774_v14  ;;  %v6182_v17 = vpop.f32.mrb[2].mxu1  ;;  %v7420_v18 = vpack.i.bf16 %v775_v12, %v774_v14 }
 0x1eb   : > { %v7422_v19 = vadd.f32 %v6182_v17, %v773_v10  ;;  %v701_v20 = vpop.f32.mrb[3].mxu1 }
 0x1ec   : > { %v7424_v21 = vadd.f32 %v773_v10, %v701_v20  ;;  %6946 = vrot.lane.b32.xlu0 %v7420_v18, %s7223_s7  ;;  %6676 = vmatpush3.bf16.xpose.msk.msra.mxu0 %vm7416_vm3, %v6674_v16 }
 0x1ed   : > { %6677 = vmatprep.subr.bf16.mxu0 %v7220_v4 }
 0x1ee   : > { %v6700_v22 = vpack.c.bf16 %v7422_v19, %v7424_v21  ;;  %v6185_v23 = vpop.f32.mrb[4].mxu1  ;;  %v7435_v24 = vpack.i.bf16 %v7422_v19, %v7424_v21 }
 0x1ef   : > { %v7437_v25 = vadd.f32 %v6185_v23, %v773_v10  ;;  %v711_v26 = vpop.f32.mrb[5].mxu1 }
 0x1f0   : > { %v7444_v28 = vadd.f32 %v773_v10, %v711_v26  ;;  %960 = vrot.lane.b32.xlu0 %v7442_v27, %s7223_s7 }
 0x1f2   : > { %v6726_v29 = vpack.c.bf16 %v7437_v25, %v7444_v28  ;;  %v6188_v30 = vpop.f32.mrb[6].mxu1  ;;  %v7452_v31 = vpack.i.bf16 %v7437_v25, %v7444_v28 }
 0x1f3   : > { %v7454_v32 = vadd.f32 %v6188_v30, %v773_v10  ;;  %v721_v33 = vpop.f32.mrb[7].mxu1  ;;  %6206 = vmatmul.mubr.msk.f32.vlgmr.msra.gmra.mrb[16].mxu0 %vm790_vm2, %v7442_v27 }
 0x1f4   : > { %v7458_v34 = vadd.f32 %v773_v10, %v721_v33  ;;  %6212 = vmatprep.mubr.msk.f32.mxu0 %vm7221_vm1, %v7222_v5 }
 0x1f6   : > { %v6752_v35 = vpack.c.bf16 %v7454_v32, %v7458_v34  ;;  %v6191_v36 = vpop.f32.mrb[8].mxu1  ;;  %v7466_v37 = vpack.i.bf16 %v7454_v32, %v7458_v34 }
 0x1f7   : > { %v7468_v38 = vadd.f32 %v6191_v36, %v773_v10  ;;  %v731_v39 = vpop.f32.mrb[9].mxu1 }
 0x1f8   : > { %v7470_v40 = vadd.f32 %v773_v10, %v731_v39 }
 0x1fa   : > { %v6778_v41 = vpack.c.bf16 %v7468_v38, %v7470_v40  ;;  %v6194_v42 = vpop.f32.mrb[10].mxu1  ;;  %v7476_v43 = vpack.i.bf16 %v7468_v38, %v7470_v40 }
 0x1fb   : > { %v7478_v44 = vadd.f32 %v6194_v42, %v773_v10  ;;  %v741_v45 = vpop.f32.mrb[11].mxu1 }
 0x1fc   : > { %v7480_v46 = vadd.f32 %v773_v10, %v741_v45 }
 0x1fe   : > { %v6804_v47 = vpack.c.bf16 %v7478_v44, %v7480_v46  ;;  %v6197_v48 = vpop.f32.mrb[12].mxu1  ;;  %v7486_v49 = vpack.i.bf16 %v7478_v44, %v7480_v46 }
 0x1ff   : > { %v7488_v50 = vadd.f32 %v6197_v48, %v773_v10  ;;  %v751_v51 = vpop.f32.mrb[13].mxu1 }
 0x200   : > { %v7490_v52 = vadd.f32 %v773_v10, %v751_v51 }
 0x202   : > { %v6830_v53 = vpack.c.bf16 %v7488_v50, %v7490_v52  ;;  %v6200_v54 = vpop.f32.mrb[14].mxu1  ;;  %v7496_v55 = vpack.i.bf16 %v7488_v50, %v7490_v52 }
 0x203   : > { %v7498_v56 = vadd.f32 %v6200_v54, %v773_v10  ;;  %v761_v57 = vpop.f32.mrb[15].mxu1 }
 0x204   : > { %v7500_v58 = vadd.f32 %v773_v10, %v761_v57  ;;  %v7534_v57 = vld [vmem:[%s8188_s2 + $0x50] sm:$0xff] }
 0x206   : > { %v6856_v59 = vpack.c.bf16 %v7498_v56, %v7500_v58  ;;  %v7506_v60 = vpack.i.bf16 %v7498_v56, %v7500_v58 }
 0x25e   : > { %v6947_v61 = vpop.permute.xlu0 %6946 }
 0x25f   : > { %v6949_v62 = vunpack.i.h.bf16 %v6947_v61  ;;  %v6948_v63 = vunpack.i.l.bf16 %v6947_v61 }
 0x261   : > { %v6681_v0 = vpack.c.bf16 %v6949_v62, %v6948_v63 }
 0x262   : > { %v7511_v1 = vpop.permute.xlu0 %960 }
 0x263   : > { %6683 = vmatpush3.bf16.xpose.msk.msra.mxu1 %vm7416_vm3, %v6681_v0 }
 0x264   : > { %6684 = vmatprep.subr.bf16.mxu1 %v7220_v4 }
 0x26a   : > { %6220 = vmatmul.mubr.msk.f32.vlgmr.msra.gmra.mrb[16].mxu1 %vm790_vm2, %v7511_v1 }
 0x26b   : > { %6226 = vmatprep.mubr.msk.f32.mxu1 %vm7221_vm1, %v7222_v5 }
 0x2c6   : > { %v866_v2 = vpop.f32.mrb[16].mxu0 }
 0x2c7   : > { %v870_v3 = vsel %vm790_vm2, %v866_v2, -inf  ;;  %v6207_v6 = vpop.f32.mrb[17].mxu0 }
 0x2c8   : > { %871 = vmax.xlane.f32.xlu1 %v870_v3  ;;  %v7550_v6 = vld [vmem:[%s8188_s2 + $0x40] sm:$0xff] }
 0x33d   : > { %v1038_v8 = vpop.f32.mrb[16].mxu1 }
 0x33e   : > { %v1042_v10 = vsel %vm790_vm2, %v1038_v8, -inf  ;;  %v6221_v11 = vpop.f32.mrb[17].mxu1 }
 0x33f   : > { %1043 = vmax.xlane.f32.xlu1 %v1042_v10 }
 0x350   : > { %6951 = vrot.lane.b32.xlu1 %v7420_v18, %s7224_s10 }
 0x355   : > { %v872_v12 = vpop.xlane.xlu1 %871 }
 0x356   : > { %v873_v13 = vsub.f32 %v866_v2, %v872_v12 }
 0x358   : > { %v874_v14 = vmul.f32 1.442695, %v873_v13 }
 0x35a   : > { %7075 = vpow2.f32 %v874_v14 }
 0x364   : > { %v7076_v16 = vpop.eup %7075 }
 0x365   : > { %v876_v17 = vsel %vm790_vm2, %v7076_v16, 0.0 }
 0x366   : > { %877 = vadd.xlane.f32.xlu0 %v876_v17 }
 0x3cc   : > { %v1044_v20 = vpop.xlane.xlu1 %1043 }
 0x3cd   : > { %v1045_v23 = vsub.f32 %v1038_v8, %v1044_v20  ;;  %v7555_v8 = vld [vmem:[%s8188_s2 + $0x48] sm:$0xff] }
 0x3ce   : > { %v7560_v11 = vpack.c.bf16 %v7555_v8, %v7550_v6 }
 0x3cf   : > { %v1046_v26 = vmul.f32 1.442695, %v1045_v23 }
 0x3d0   : > { %v6952_v30 = vpop.permute.xlu1 %6951 }
 0x3d1   : > { %7077 = vpow2.f32 %v1046_v26  ;;  %v6954_v33 = vunpack.i.h.bf16 %v6952_v30  ;;  %v6953_v36 = vunpack.i.l.bf16 %v6952_v30 }
 0x3d3   : > { %v6678_v39 = vpack.c.bf16 %v6954_v33, %v6953_v36 }
 0x3d5   : > { %6679 = vmatpush3.bf16.msra.mxu0 %v6678_v39 }
 0x3d6   : > { %6687 = vmatprep.subr.bf16.mxu0 %v7220_v4 }
 0x3db   : > { %v7078_v42 = vpop.eup %7077 }
 0x3dc   : > { %v1048_v45 = vsel %vm790_vm2, %v7078_v42, 0.0 }
 0x3dd   : > { %1049 = vadd.xlane.f32.xlu1 %v1048_v45 }
 0x3ee   : > { %6956 = vrot.lane.b32.xlu1 %v7420_v18, %s7225_s11  ;;  %v7539_v18 = vld [vmem:[%s8188_s2 + $0x58] sm:$0xff] }
 0x3ef   : > { %v7543_v61 = vpack.c.bf16 %v7539_v18, %v7534_v57 }
 0x3f2   : > { %6961 = vrot.lane.b32.xlu1 %v7435_v24, %s7223_s7 }
 0x3f3   : > { %v878_v48 = vpop.xlane.xlu0 %877 }
 0x3f4   : > { %7079 = vrcp.f32 %v878_v48 }
 0x3fe   : > { %v7080_v51 = vpop.eup %7079 }
 0x3ff   : > { %v880_v54 = vmul.f32 %v7080_v51, %v7076_v16 }
 0x401   : > { %6213 = vmatmul.mubr.msk.f32.vlgmr.msra.gmra.mrb[18].mxu0 %vm790_vm2, %v880_v54 }
 0x402   : > { %6233 = vmatprep.mubr.msk.f32.mxu0 %vm7221_vm1, %v7222_v5  ;;  %6689 = vmatpush3.bf16.msra.mxu0 %v7543_v61 }
 0x403   : > { %6693 = vmatprep.subr.bf16.mxu0 %v7220_v4 }
 0x46a   : > { %v1050_v62 = vpop.xlane.xlu1 %1049 }
 0x46b   : > { %7081 = vrcp.f32 %v1050_v62 }
 0x46e   : > { %v6957_v63 = vpop.permute.xlu1 %6956 }
 0x46f   : > { %v6959_v0 = vunpack.i.h.bf16 %v6957_v63  ;;  %v6958_v2 = vunpack.i.l.bf16 %v6957_v63 }
 0x471   : > { %v6685_v3 = vpack.c.bf16 %v6959_v0, %v6958_v2 }
 0x472   : > { %v6962_v14 = vpop.permute.xlu1 %6961 }
 0x473   : > { %6686 = vmatpush3.bf16.msra.mxu1 %v6685_v3  ;;  %v6964_v17 = vunpack.i.h.bf16 %v6962_v14  ;;  %v6963_v20 = vunpack.i.l.bf16 %v6962_v14 }
 0x474   : > { %6690 = vmatprep.subr.bf16.mxu1 %v7220_v4 }
 0x475   : > { %v7082_v10 = vpop.eup %7081  ;;  %v6707_v23 = vpack.c.bf16 %v6964_v17, %v6963_v20 }
 0x476   : > { %v1052_v12 = vmul.f32 %v7082_v10, %v7078_v42  ;;  %v1280_v42 = vsub.s32 1, %v7405_v7 }
 0x478   : > { %6227 = vmatmul.mubr.msk.f32.vlgmr.msra.gmra.mrb[18].mxu1 %vm790_vm2, %v1052_v12  ;;  %v7594_v45 = vrot.slane %v7411_v9, %v1280_v42 }
 0x479   : > { %6692 = vmatpush3.bf16.msra.mxu1 %v7560_v11  ;;  %6240 = vmatprep.mubr.msk.f32.mxu1 %vm7221_vm1, %v7222_v5 }
 0x47a   : > { %6699 = vmatprep.subr.bf16.mxu1 %v7220_v4 }
 0x4d4   : > { %v956_v13 = vpop.f32.mrb[18].mxu0 }
 0x4d5   : > { %v6214_v16 = vpop.f32.mrb[19].mxu0  ;;  %6241 = vmatmul.mubr.msk.f32.vlgmr.msra.gmra.mrb[20].mxu1 %vm790_vm2, %v956_v13 }
 0x4d6   : > { %6702 = vmatpush3.bf16.xpose.msk.msra.mxu1 %vm7416_vm3, %v6700_v22  ;;  %6258 = vmatprep.mubr.msk.f32.mxu1 %vm7221_vm1, %v7222_v5 }
 0x4d7   : > { %6706 = vmatprep.subr.bf16.mxu1 %v7220_v4 }
 0x4dd   : > { %6259 = vmatmul.mubr.msk.f32.vlgmr.msra.gmra.mrb[22].mxu1 %vm790_vm2, %v7442_v27 }
 0x4de   : > { %6709 = vmatpush3.bf16.xpose.msk.msra.mxu1 %vm7416_vm3, %v6707_v23  ;;  %6272 = vmatprep.mubr.msk.f32.mxu1 %vm7221_vm1, %v7222_v5 }
 0x4df   : > { %6716 = vmatprep.subr.bf16.mxu1 %v7220_v4 }
 0x4e5   : > { %6273 = vmatmul.mubr.msk.f32.vlgmr.msra.gmra.mrb[24].mxu1 %vm790_vm2, %v7511_v1 }
 0x4e6   : > { %6718 = vmatpush3.bf16.msra.mxu1 %v7560_v11  ;;  %6293 = vmatprep.mubr.msk.f32.mxu1 %vm7221_vm1, %v7222_v5 }
 0x4e7   : > { %6725 = vmatprep.subr.bf16.mxu1 %v7220_v4 }
 0x54b   : > { %v1128_v19 = vpop.f32.mrb[18].mxu1 }
 0x54c   : > { %v6228_v21 = vpop.f32.mrb[19].mxu1  ;;  %6234 = vmatmul.mubr.msk.f32.vlgmr.msra.gmra.mrb[20].mxu0 %vm790_vm2, %v1128_v19  ;;  %v1312_v19 = vsub.s32 2, %v7405_v7 }
 0x54d   : > { %6251 = vmatprep.mubr.msk.f32.mxu0 %vm7221_vm1, %v7222_v5 }
 0x54e   : > { %v7607_v21 = vrot.slane %v7411_v9, %v1312_v19 }
 0x5a8   : > { %v1274_v22 = vpop.f32.mrb[20].mxu1 }
 0x5a9   : > { %v6242_v26 = vpop.f32.mrb[21].mxu1 }
 0x5b0   : > { %v1494_v30 = vpop.f32.mrb[22].mxu1 }
 0x5b1   : > { %v6260_v33 = vpop.f32.mrb[23].mxu1  ;;  %v1498_v17 = vsel %vm790_vm2, %v1494_v30, -inf }
 0x5b8   : > { %v1662_v36 = vpop.f32.mrb[24].mxu1 }
 0x5b9   : > { %v6274_v39 = vpop.f32.mrb[25].mxu1  ;;  %v1666_v10 = vsel %vm790_vm2, %v1662_v36, -inf }
 0x61f   : > { %v1201_v48 = vpop.f32.mrb[20].mxu0 }
 0x620   : > { %v1275_v51 = vadd.f32 %v1274_v22, %v1201_v48  ;;  %v6235_v54 = vpop.f32.mrb[21].mxu0  ;;  %v6965_v22 = vpack.i.bf16 %v7555_v8, %v7550_v6  ;;  %v6970_v8 = vpack.i.bf16 %v7539_v18, %v7534_v57 }
 0x622   : > { %v1282_v62 = vadd.f32 %v7594_v45, %v1275_v51 }
 0x624   : > { %1284 = vrot.lane.b32.xlu1 %v1282_v62, %s7226_s29 }
 0x696   : > { %v1285_v63 = vpop.permute.xlu1 %1284 }
 0x697   : > { %v1287_v0 = vadd.f32 %v1285_v63, %v7442_v27 }
 0x699   : > { %1289 = vrot.lane.b32.xlu0 %v1287_v0, %s7224_s10 }
 0x70b   : > { %v1290_v2 = vpop.permute.xlu0 %1289 }
 0x70c   : > { %v1292_v3 = vsel %vm383_vm0, %v1290_v2, 0.0 }
 0x70d   : > { %1293 = vadd.xlane.f32.xlu1 %v1292_v3 }
 0x711   : > { %1667 = vmax.xlane.f32.xlu1 %v1666_v10 }
 0x79a   : > { %v1294_v12 = vpop.xlane.xlu1 %1293 }
 0x79b   : > { %v1296_v13 = vmul.f32 0.03125, %v1294_v12 }
 0x79d   : > { %v1297_v14 = vsub.f32 %v1287_v0, %v1296_v13 }
 0x79e   : > { %v1668_v26 = vpop.xlane.xlu1 %1667 }
 0x79f   : > { %v1298_v16 = vmul.f32 %v1297_v14, %v1297_v14  ;;  %v1669_v33 = vsub.f32 %v1662_v36, %v1668_v26 }
 0x7a1   : > { %1300 = vrot.lane.b32.xlu0 %v1298_v16, %s7224_s10  ;;  %v1670_v48 = vmul.f32 1.442695, %v1669_v33 }
 0x7c0   : > { %1499 = vmax.xlane.f32.xlu0 %v1498_v17 }
 0x813   : > { %v1301_v20 = vpop.permute.xlu0 %1300 }
 0x814   : > { %v1303_v23 = vsel %vm383_vm0, %v1301_v20, 0.0 }
 0x815   : > { %1304 = vadd.xlane.f32.xlu1 %v1303_v23 }
 0x826   : > { %1315 = vrot.lane.b32.xlu1 %v7607_v21, %s7226_s29 }
 0x82a   : > { %6966 = vrot.lane.b32.xlu1 %v6965_v22, %s7224_s10 }
 0x82e   : > { %6976 = vrot.lane.b32.xlu1 %v7435_v24, %s7224_s10 }
 0x84d   : > { %v1500_v39 = vpop.xlane.xlu0 %1499 }
 0x84e   : > { %v1501_v42 = vsub.f32 %v1494_v30, %v1500_v39 }
 0x850   : > { %v1502_v7 = vmul.f32 1.442695, %v1501_v42 }
 0x852   : > { %7083 = vpow2.f32 %v1502_v7 }
 0x853   : > { %7085 = vpow2.f32 %v1670_v48 }
 0x85c   : > { %v7084_v9 = vpop.eup %7083 }
 0x85d   : > { %v1504_v51 = vsel %vm790_vm2, %v7084_v9, 0.0  ;;  %v7086_v54 = vpop.eup %7085 }
 0x85e   : > { %1505 = vadd.xlane.f32.xlu0 %v1504_v51  ;;  %v1672_v6 = vsel %vm790_vm2, %v7086_v54, 0.0 }
 0x862   : > { %1673 = vadd.xlane.f32.xlu0 %v1672_v6 }
 0x878   : > { %6971 = vrot.lane.b32.xlu0 %v6970_v8, %s7224_s10 }
 0x8a2   : > { %v1305_v36 = vpop.xlane.xlu1 %1304 }
 0x8a3   : > { %v1306_v62 = vmul.f32 0.03125, %v1305_v36 }
 0x8a5   : > { %v1307_v30 = vadd.f32 1e-05, %v1306_v62 }
 0x8a6   : > { %v7621_v63 = vpop.permute.xlu1 %1315 }
 0x8a7   : > { %7087 = vrsqrt.f32 %v1307_v30 }
 0x8aa   : > { %v6967_v0 = vpop.permute.xlu1 %6966 }
 0x8ab   : > { %v6969_v2 = vunpack.i.h.bf16 %v6967_v0  ;;  %v6968_v3 = vunpack.i.l.bf16 %v6967_v0 }
 0x8ad   : > { %v7623_v10 = vpack.c.bf16 %v6969_v2, %v6968_v3 }
 0x8ae   : > { %v6977_v22 = vpop.permute.xlu1 %6976 }
 0x8af   : > { %6695 = vmatpush3.bf16.msra.mxu0 %v7623_v10  ;;  %v6979_v26 = vunpack.i.h.bf16 %v6977_v22  ;;  %v6978_v33 = vunpack.i.l.bf16 %v6977_v22 }
 0x8b0   : > { %6696 = vmatprep.subr.bf16.mxu0 %v7220_v4 }
 0x8b1   : > { %v7088_v12 = vpop.eup %7087  ;;  %v6704_v39 = vpack.c.bf16 %v6979_v26, %v6978_v33 }
 0x8b2   : > { %v1309_v13 = vmul.f32 %v7088_v12, %v1297_v14 }
 0x8b4   : > { %v1318_v57 = vmul.f32 %v7621_v63, %v1309_v13 }
 0x8b6   : > { %v7629_v18 = vadd.f32 %v1318_v57, %v7607_v21 }
 0x8b8   : > { %1321 = vrot.lane.b32.xlu1 %v7629_v18, %s7224_s10 }
 0x8bc   : > { %6981 = vrot.lane.b32.xlu1 %v7435_v24, %s7225_s11 }
 0x8c0   : > { %6986 = vrot.lane.b32.xlu1 %v7452_v31, %s7223_s7 }
 0x8eb   : > { %v1506_v16 = vpop.xlane.xlu0 %1505 }
 0x8ec   : > { %7089 = vrcp.f32 %v1506_v16 }
 0x8ef   : > { %v1674_v17 = vpop.xlane.xlu0 %1673 }
 0x8f0   : > { %7091 = vrcp.f32 %v1674_v17 }
 0x8f3   : > { %v6972_v20 = vpop.permute.xlu0 %6971 }
 0x8f4   : > { %v6974_v23 = vunpack.i.h.bf16 %v6972_v20  ;;  %v6973_v19 = vunpack.i.l.bf16 %v6972_v20 }
 0x8f6   : > { %v7637_v14 = vpack.c.bf16 %v6974_v23, %v6973_v19  ;;  %v7090_v24 = vpop.eup %7089 }
 0x8f7   : > { %v1508_v48 = vmul.f32 %v7090_v24, %v7084_v9 }
 0x8f8   : > { %6698 = vmatpush3.bf16.msra.mxu0 %v7637_v14 }
 0x8f9   : > { %6703 = vmatprep.subr.bf16.mxu0 %v7220_v4 }
 0x8fa   : > { %v7092_v8 = vpop.eup %7091 }
 0x8fb   : > { %v1676_v62 = vmul.f32 %v7092_v8, %v7086_v54 }
 0x92a   : > { %v1322_v42 = vpop.permute.xlu1 %1321 }
 0x92b   : > { %6252 = vmatmul.mubr.msk.f32.vlgmr.msra.gmra.mrb[22].mxu0 %vm383_vm0, %v1322_v42 }
 0x92c   : > { %6705 = vmatpush3.bf16.msra.mxu0 %v6704_v39  ;;  %6265 = vmatprep.mubr.msk.f32.mxu0 %vm7221_vm1, %v7222_v5 }
 0x92d   : > { %6710 = vmatprep.subr.bf16.mxu0 %v7220_v4 }
 0x92e   : > { %v6982_v7 = vpop.permute.xlu1 %6981 }
 0x92f   : > { %v6984_v51 = vunpack.i.h.bf16 %v6982_v7  ;;  %v6983_v6 = vunpack.i.l.bf16 %v6982_v7  ;;  %6266 = vmatmul.mubr.msk.f32.vlgmr.msra.gmra.mrb[24].mxu0 %vm790_vm2, %v1508_v48 }
 0x930   : > { %6279 = vmatprep.mubr.msk.f32.mxu0 %vm7221_vm1, %v7222_v5 }
 0x931   : > { %v6711_v36 = vpack.c.bf16 %v6984_v51, %v6983_v6 }
 0x932   : > { %v6987_v2 = vpop.permute.xlu1 %6986 }
 0x933   : > { %6712 = vmatpush3.bf16.msra.mxu0 %v6711_v36  ;;  %v6989_v54 = vunpack.i.h.bf16 %v6987_v2  ;;  %v6988_v12 = vunpack.i.l.bf16 %v6987_v2 }
 0x934   : > { %6713 = vmatprep.subr.bf16.mxu0 %v7220_v4 }
 0x935   : > { %v6733_v57 = vpack.c.bf16 %v6989_v54, %v6988_v12 }
 0x936   : > { %6280 = vmatmul.mubr.msk.f32.vlgmr.msra.gmra.mrb[26].mxu0 %vm790_vm2, %v1676_v62 }
 0x937   : > { %6715 = vmatpush3.bf16.msra.mxu0 %v7543_v61  ;;  %6286 = vmatprep.mubr.msk.f32.mxu0 %vm7221_vm1, %v7222_v5 }
 0x938   : > { %6719 = vmatprep.subr.bf16.mxu0 %v7220_v4 }
 0x9fe   : > { %v7654_v9 = vpop.f32.mrb[22].mxu0 }
 0x9ff   : > { %v6253_v30 = vpop.f32.mrb[23].mxu0 }
 0xa02   : > { %v1584_v0 = vpop.f32.mrb[24].mxu0 }
 0xa03   : > { %v6267_v3 = vpop.f32.mrb[25].mxu0  ;;  %6294 = vmatmul.mubr.msk.f32.vlgmr.msra.gmra.mrb[26].mxu1 %vm790_vm2, %v1584_v0 }
 0xa04   : > { %6728 = vmatpush3.bf16.xpose.msk.msra.mxu1 %vm7416_vm3, %v6726_v29  ;;  %6311 = vmatprep.mubr.msk.f32.mxu1 %vm7221_vm1, %v7222_v5 }
 0xa05   : > { %6732 = vmatprep.subr.bf16.mxu1 %v7220_v4 }
 0xa09   : > { %v1752_v13 = vpop.f32.mrb[26].mxu0 }
 0xa0a   : > { %v6281_v16 = vpop.f32.mrb[27].mxu0  ;;  %6287 = vmatmul.mubr.msk.f32.vlgmr.msra.gmra.mrb[28].mxu0 %vm790_vm2, %v1752_v13 }
 0xa0b   : > { %6721 = vmatpush3.bf16.msra.mxu0 %v7623_v10  ;;  %6312 = vmatmul.mubr.msk.f32.vlgmr.msra.gmra.mrb[28].mxu1 %vm790_vm2, %v7442_v27 }
 0xa0c   : > { %6735 = vmatpush3.bf16.xpose.msk.msra.mxu1 %vm7416_vm3, %v6733_v57  ;;  %6722 = vmatprep.subr.bf16.mxu0 %v7220_v4 }
 0xa0d   : > { %6325 = vmatprep.mubr.msk.f32.mxu1 %vm7221_vm1, %v7222_v5  ;;  %6304 = vmatprep.mubr.msk.f32.mxu0 %vm7221_vm1, %v7222_v5 }
 0xa0e   : > { %6742 = vmatprep.subr.bf16.mxu1 %v7220_v4 }
 0xa0f   : > { %6724 = vmatpush3.bf16.msra.mxu0 %v7637_v14 }
 0xa10   : > { %6729 = vmatprep.subr.bf16.mxu0 %v7220_v4 }
 0xa13   : > { %6326 = vmatmul.mubr.msk.f32.vlgmr.msra.gmra.mrb[30].mxu1 %vm790_vm2, %v7511_v1 }
 0xa14   : > { %6744 = vmatpush3.bf16.msra.mxu1 %v7560_v11  ;;  %6346 = vmatprep.mubr.msk.f32.mxu1 %vm7221_vm1, %v7222_v5 }
 0xa15   : > { %6751 = vmatprep.subr.bf16.mxu1 %v7220_v4 }
 0xad6   : > { %v1898_v25 = vpop.f32.mrb[26].mxu1 }
 0xad7   : > { %v6295_v28 = vpop.f32.mrb[27].mxu1 }
 0xadd   : > { %v1825_v29 = vpop.f32.mrb[28].mxu0 }
 0xade   : > { %v1899_v17 = vadd.f32 %v1898_v25, %v1825_v29  ;;  %v6288_v20 = vpop.f32.mrb[29].mxu0  ;;  %v2090_v23 = vpop.f32.mrb[28].mxu1 }
 0xadf   : > { %v6313_v19 = vpop.f32.mrb[29].mxu1  ;;  %v2094_v62 = vsel %vm790_vm2, %v2090_v23, -inf }
 0xae0   : > { %v1902_v22 = vadd.f32 %v1899_v17, %v7594_v45 }
 0xae2   : > { %1904 = vrot.lane.b32.xlu1 %v1902_v22, %s7226_s29 }
 0xae6   : > { %v2258_v26 = vpop.f32.mrb[30].mxu1 }
 0xae7   : > { %v6327_v33 = vpop.f32.mrb[31].mxu1  ;;  %v2262_v7 = vsel %vm790_vm2, %v2258_v26, -inf }
 0xb54   : > { %v1905_v24 = vpop.permute.xlu1 %1904 }
 0xb55   : > { %v1907_v39 = vadd.f32 %v1905_v24, %v7442_v27 }
 0xb57   : > { %1909 = vrot.lane.b32.xlu0 %v1907_v39, %s7224_s10 }
 0xbc9   : > { %v1910_v42 = vpop.permute.xlu0 %1909 }
 0xbca   : > { %v1912_v48 = vsel %vm383_vm0, %v1910_v42, 0.0 }
 0xbcb   : > { %1913 = vadd.xlane.f32.xlu1 %v1912_v48 }
 0xbcf   : > { %2263 = vmax.xlane.f32.xlu1 %v2262_v7 }
 0xc58   : > { %v1914_v51 = vpop.xlane.xlu1 %1913 }
 0xc59   : > { %v1915_v6 = vmul.f32 0.03125, %v1914_v51 }
 0xc5b   : > { %v1916_v8 = vsub.f32 %v1907_v39, %v1915_v6 }
 0xc5c   : > { %v2264_v30 = vpop.xlane.xlu1 %2263 }
 0xc5d   : > { %v1917_v36 = vmul.f32 %v1916_v8, %v1916_v8  ;;  %v2265_v0 = vsub.f32 %v2258_v26, %v2264_v30 }
 0xc5f   : > { %1919 = vrot.lane.b32.xlu0 %v1917_v36, %s7224_s10  ;;  %v2266_v2 = vmul.f32 1.442695, %v2265_v0 }
 0xc61   : > { %7093 = vpow2.f32 %v2266_v2 }
 0xc6b   : > { %v7094_v12 = vpop.eup %7093 }
 0xc6c   : > { %v2268_v13 = vsel %vm790_vm2, %v7094_v12, 0.0 }
 0xc7e   : > { %2095 = vmax.xlane.f32.xlu0 %v2094_v62 }
 0xcd1   : > { %v1920_v3 = vpop.permute.xlu0 %1919 }
 0xcd2   : > { %v1922_v54 = vsel %vm383_vm0, %v1920_v3, 0.0 }
 0xcd3   : > { %1923 = vadd.xlane.f32.xlu0 %v1922_v54 }
 0xcd7   : > { %2269 = vadd.xlane.f32.xlu0 %v2268_v13 }
 0xd0b   : > { %v2096_v57 = vpop.xlane.xlu0 %2095 }
 0xd0c   : > { %v2097_v16 = vsub.f32 %v2090_v23, %v2096_v57 }
 0xd0e   : > { %v2098_v25 = vmul.f32 1.442695, %v2097_v16 }
 0xd10   : > { %7095 = vpow2.f32 %v2098_v25 }
 0xd1a   : > { %v7096_v28 = vpop.eup %7095 }
 0xd1b   : > { %v2100_v29 = vsel %vm790_vm2, %v7096_v28, 0.0 }
 0xd1c   : > { %2101 = vadd.xlane.f32.xlu1 %v2100_v29 }
 0xd2d   : > { %6991 = vrot.lane.b32.xlu1 %v7452_v31, %s7224_s10 }
 0xd31   : > { %6996 = vrot.lane.b32.xlu1 %v7452_v31, %s7225_s11 }
 0xd35   : > { %7001 = vrot.lane.b32.xlu1 %v7466_v37, %s7223_s7 }
 0xd60   : > { %v1924_v17 = vpop.xlane.xlu0 %1923 }
 0xd61   : > { %v1925_v20 = vmul.f32 0.03125, %v1924_v17 }
 0xd63   : > { %v1926_v19 = vadd.f32 1e-05, %v1925_v20 }
 0xd64   : > { %v2270_v31 = vpop.xlane.xlu0 %2269 }
 0xd65   : > { %7097 = vrsqrt.f32 %v1926_v19 }
 0xd6f   : > { %v7098_v23 = vpop.eup %7097 }
 0xd70   : > { %v1928_v22 = vmul.f32 %v7098_v23, %v1916_v8 }
 0xd72   : > { %v1929_v26 = vmul.f32 %v1928_v22, %v7621_v63 }
 0xd74   : > { %v7704_v33 = vadd.f32 %v1929_v26, %v7607_v21 }
 0xd76   : > { %1932 = vrot.lane.b32.xlu0 %v7704_v33, %s7224_s10 }
 0xda9   : > { %v2102_v24 = vpop.xlane.xlu1 %2101 }
 0xdaa   : > { %7099 = vrcp.f32 %v2102_v24 }
 0xdab   : > { %7101 = vrcp.f32 %v2270_v31 }
 0xdad   : > { %v6992_v39 = vpop.permute.xlu1 %6991 }
 0xdae   : > { %v6994_v42 = vunpack.i.h.bf16 %v6992_v39  ;;  %v6993_v48 = vunpack.i.l.bf16 %v6992_v39 }
 0xdb0   : > { %v6730_v6 = vpack.c.bf16 %v6994_v42, %v6993_v48 }
 0xdb1   : > { %v6997_v7 = vpop.permute.xlu1 %6996 }
 0xdb2   : > { %v6999_v36 = vunpack.i.h.bf16 %v6997_v7  ;;  %v6998_v8 = vunpack.i.l.bf16 %v6997_v7 }
 0xdb4   : > { %v7100_v51 = vpop.eup %7099  ;;  %v6737_v2 = vpack.c.bf16 %v6999_v36, %v6998_v8 }
 0xdb5   : > { %v2104_v30 = vmul.f32 %v7100_v51, %v7096_v28  ;;  %v7102_v0 = vpop.eup %7101  ;;  %v7002_v16 = vpop.permute.xlu1 %7001 }
 0xdb6   : > { %v2272_v3 = vmul.f32 %v7102_v0, %v7094_v12  ;;  %v7004_v12 = vunpack.i.h.bf16 %v7002_v16  ;;  %v7003_v28 = vunpack.i.l.bf16 %v7002_v16 }
 0xdb8   : > { %v6759_v32 = vpack.c.bf16 %v7004_v12, %v7003_v28 }
 0xde8   : > { %v1933_v62 = vpop.permute.xlu0 %1932 }
 0xde9   : > { %6305 = vmatmul.mubr.msk.f32.vlgmr.msra.gmra.mrb[30].mxu0 %vm383_vm0, %v1933_v62 }
 0xdea   : > { %6731 = vmatpush3.bf16.msra.mxu0 %v6730_v6  ;;  %6318 = vmatprep.mubr.msk.f32.mxu0 %vm7221_vm1, %v7222_v5 }
 0xdeb   : > { %6736 = vmatprep.subr.bf16.mxu0 %v7220_v4 }
 0xded   : > { %6319 = vmatmul.mubr.msk.f32.vlgmr.msra.gmra.mrb[32].mxu0 %vm790_vm2, %v2104_v30 }
 0xdee   : > { %6738 = vmatpush3.bf16.msra.mxu0 %v6737_v2  ;;  %6332 = vmatprep.mubr.msk.f32.mxu0 %vm7221_vm1, %v7222_v5 }
 0xdef   : > { %6739 = vmatprep.subr.bf16.mxu0 %v7220_v4 }
 0xdf1   : > { %6333 = vmatmul.mubr.msk.f32.vlgmr.msra.gmra.mrb[34].mxu0 %vm790_vm2, %v2272_v3 }
 0xdf2   : > { %6741 = vmatpush3.bf16.msra.mxu0 %v7543_v61  ;;  %6339 = vmatprep.mubr.msk.f32.mxu0 %vm7221_vm1, %v7222_v5 }
 0xdf3   : > { %6745 = vmatprep.subr.bf16.mxu0 %v7220_v4 }
 0xebc   : > { %v7721_v54 = vpop.f32.mrb[30].mxu0 }
 0xebd   : > { %v6306_v13 = vpop.f32.mrb[31].mxu0 }
 0xec0   : > { %v2180_v57 = vpop.f32.mrb[32].mxu0 }
 0xec1   : > { %v6320_v25 = vpop.f32.mrb[33].mxu0  ;;  %6347 = vmatmul.mubr.msk.f32.vlgmr.msra.gmra.mrb[32].mxu1 %vm790_vm2, %v2180_v57 }
 0xec2   : > { %6754 = vmatpush3.bf16.xpose.msk.msra.mxu1 %vm7416_vm3, %v6752_v35  ;;  %6364 = vmatprep.mubr.msk.f32.mxu1 %vm7221_vm1, %v7222_v5 }
 0xec3   : > { %6758 = vmatprep.subr.bf16.mxu1 %v7220_v4 }
 0xec4   : > { %v2348_v29 = vpop.f32.mrb[34].mxu0 }
 0xec5   : > { %v6334_v17 = vpop.f32.mrb[35].mxu0  ;;  %6340 = vmatmul.mubr.msk.f32.vlgmr.msra.gmra.mrb[36].mxu0 %vm790_vm2, %v2348_v29 }
 0xec6   : > { %6747 = vmatpush3.bf16.msra.mxu0 %v7623_v10  ;;  %6357 = vmatprep.mubr.msk.f32.mxu0 %vm7221_vm1, %v7222_v5 }
 0xec7   : > { %6748 = vmatprep.subr.bf16.mxu0 %v7220_v4 }
 0xec9   : > { %6365 = vmatmul.mubr.msk.f32.vlgmr.msra.gmra.mrb[34].mxu1 %vm790_vm2, %v7442_v27 }
 0xeca   : > { %6750 = vmatpush3.bf16.msra.mxu0 %v7637_v14  ;;  %6761 = vmatpush3.bf16.xpose.msk.msra.mxu1 %vm7416_vm3, %v6759_v32 }
 0xecb   : > { %6378 = vmatprep.mubr.msk.f32.mxu1 %vm7221_vm1, %v7222_v5  ;;  %6755 = vmatprep.subr.bf16.mxu0 %v7220_v4 }
 0xecc   : > { %6768 = vmatprep.subr.bf16.mxu1 %v7220_v4 }
 0xed1   : > { %6379 = vmatmul.mubr.msk.f32.vlgmr.msra.gmra.mrb[36].mxu1 %vm790_vm2, %v7511_v1 }
 0xed2   : > { %6770 = vmatpush3.bf16.msra.mxu1 %v7560_v11  ;;  %6399 = vmatprep.mubr.msk.f32.mxu1 %vm7221_vm1, %v7222_v5 }
 0xed3   : > { %6777 = vmatprep.subr.bf16.mxu1 %v7220_v4 }
 0xf94   : > { %v2494_v34 = vpop.f32.mrb[32].mxu1 }
 0xf95   : > { %v6348_v35 = vpop.f32.mrb[33].mxu1 }
 0xf98   : > { %v2421_v20 = vpop.f32.mrb[36].mxu0 }
 0xf99   : > { %v2495_v19 = vadd.f32 %v2494_v34, %v2421_v20  ;;  %v6341_v23 = vpop.f32.mrb[37].mxu0 }
 0xf9b   : > { %v2498_v22 = vadd.f32 %v2495_v19, %v7594_v45 }
 0xf9c   : > { %v2686_v26 = vpop.f32.mrb[34].mxu1 }
 0xf9d   : > { %2500 = vrot.lane.b32.xlu0 %v2498_v22, %s7226_s29  ;;  %v6366_v24 = vpop.f32.mrb[35].mxu1  ;;  %v2690_v13 = vsel %vm790_vm2, %v2686_v26, -inf }
 0xfa4   : > { %v2854_v31 = vpop.f32.mrb[36].mxu1 }
 0xfa5   : > { %v6380_v39 = vpop.f32.mrb[37].mxu1  ;;  %v2858_v6 = vsel %vm790_vm2, %v2854_v31, -inf }
0x100f   : > { %v2501_v42 = vpop.permute.xlu0 %2500 }
0x1010   : > { %v2503_v48 = vadd.f32 %v2501_v42, %v7442_v27 }
0x1012   : > { %2505 = vrot.lane.b32.xlu1 %v2503_v48, %s7224_s10 }
0x1084   : > { %v2506_v7 = vpop.permute.xlu1 %2505 }
0x1085   : > { %v2508_v51 = vsel %vm383_vm0, %v2506_v7, 0.0 }
0x1086   : > { %2509 = vadd.xlane.f32.xlu0 %v2508_v51 }
0x108a   : > { %2859 = vmax.xlane.f32.xlu0 %v2858_v6 }
0x1113   : > { %v2510_v36 = vpop.xlane.xlu0 %2509 }
0x1114   : > { %v2511_v8 = vmul.f32 0.03125, %v2510_v36 }
0x1116   : > { %v2512_v62 = vsub.f32 %v2503_v48, %v2511_v8 }
0x1117   : > { %v2860_v0 = vpop.xlane.xlu0 %2859 }
0x1118   : > { %v2513_v30 = vmul.f32 %v2512_v62, %v2512_v62  ;;  %v2861_v2 = vsub.f32 %v2854_v31, %v2860_v0 }
0x111a   : > { %2515 = vrot.lane.b32.xlu1 %v2513_v30, %s7224_s10  ;;  %v2862_v3 = vmul.f32 1.442695, %v2861_v2 }
0x111c   : > { %7103 = vpow2.f32 %v2862_v3 }
0x1126   : > { %v7104_v57 = vpop.eup %7103 }
0x1127   : > { %v2864_v16 = vsel %vm790_vm2, %v7104_v57, 0.0 }
0x113e   : > { %2691 = vmax.xlane.f32.xlu1 %v2690_v13 }
0x1142   : > { %2865 = vadd.xlane.f32.xlu1 %v2864_v16 }
0x118c   : > { %v2516_v25 = vpop.permute.xlu1 %2515 }
0x118d   : > { %v2518_v12 = vsel %vm383_vm0, %v2516_v25, 0.0 }
0x118e   : > { %2519 = vadd.xlane.f32.xlu0 %v2518_v12 }
0x11cb   : > { %v2692_v28 = vpop.xlane.xlu1 %2691 }
0x11cc   : > { %v2693_v29 = vsub.f32 %v2686_v26, %v2692_v28 }
0x11ce   : > { %v2694_v17 = vmul.f32 1.442695, %v2693_v29 }
0x11cf   : > { %v2866_v42 = vpop.xlane.xlu1 %2865 }
0x11d0   : > { %7105 = vpow2.f32 %v2694_v17 }
0x11da   : > { %v7106_v32 = vpop.eup %7105 }
0x11db   : > { %v2696_v34 = vsel %vm790_vm2, %v7106_v32, 0.0 }
0x11dc   : > { %2697 = vadd.xlane.f32.xlu0 %v2696_v34 }
0x11f2   : > { %7006 = vrot.lane.b32.xlu0 %v7466_v37, %s7224_s10 }
0x11f6   : > { %7016 = vrot.lane.b32.xlu0 %v7476_v43, %s7223_s7 }
0x121b   : > { %v2520_v35 = vpop.xlane.xlu0 %2519 }
0x121c   : > { %v2521_v20 = vmul.f32 0.03125, %v2520_v35 }
0x121e   : > { %v2522_v19 = vadd.f32 1e-05, %v2521_v20 }
0x1220   : > { %7107 = vrsqrt.f32 %v2522_v19 }
0x122a   : > { %v7108_v23 = vpop.eup %7107 }
0x122b   : > { %v2524_v22 = vmul.f32 %v7108_v23, %v2512_v62 }
0x122d   : > { %v2525_v26 = vmul.f32 %v2524_v22, %v7621_v63 }
0x122f   : > { %v7769_v24 = vadd.f32 %v2525_v26, %v7607_v21 }
0x1231   : > { %2528 = vrot.lane.b32.xlu1 %v7769_v24, %s7224_s10 }
0x1235   : > { %7011 = vrot.lane.b32.xlu1 %v7466_v37, %s7225_s11 }
0x1269   : > { %v2698_v31 = vpop.xlane.xlu0 %2697 }
0x126a   : > { %7109 = vrcp.f32 %v2698_v31 }
0x126b   : > { %7111 = vrcp.f32 %v2866_v42 }
0x126d   : > { %v7007_v39 = vpop.permute.xlu0 %7006 }
0x126e   : > { %v7009_v48 = vunpack.i.h.bf16 %v7007_v39  ;;  %v7008_v7 = vunpack.i.l.bf16 %v7007_v39  ;;  %v7824_v39 = vld [vmem:[%s8188_s2 + $0x60] sm:$0xff] }
0x1270   : > { %v6756_v6 = vpack.c.bf16 %v7009_v48, %v7008_v7 }
0x1271   : > { %v7017_v12 = vpop.permute.xlu0 %7016 }
0x1272   : > { %v7018_v29 = vunpack.i.l.bf16 %v7017_v12 }
0x1274   : > { %v7110_v51 = vpop.eup %7109 }
0x1275   : > { %v2700_v8 = vmul.f32 %v7110_v51, %v7106_v32  ;;  %v7112_v0 = vpop.eup %7111 }
0x1276   : > { %v2868_v3 = vmul.f32 %v7112_v0, %v7104_v57  ;;  %v7019_v57 = vunpack.i.h.bf16 %v7017_v12 }
0x1278   : > { %v6785_v32 = vpack.c.bf16 %v7019_v57, %v7018_v29 }
0x12a3   : > { %v2529_v36 = vpop.permute.xlu1 %2528 }
0x12a4   : > { %6358 = vmatmul.mubr.msk.f32.vlgmr.msra.gmra.mrb[38].mxu0 %vm383_vm0, %v2529_v36 }
0x12a5   : > { %6757 = vmatpush3.bf16.msra.mxu0 %v6756_v6  ;;  %6371 = vmatprep.mubr.msk.f32.mxu0 %vm7221_vm1, %v7222_v5 }
0x12a6   : > { %6762 = vmatprep.subr.bf16.mxu0 %v7220_v4 }
0x12a7   : > { %v7012_v37 = vpop.permute.xlu1 %7011 }
0x12a8   : > { %v7014_v62 = vunpack.i.h.bf16 %v7012_v37  ;;  %v7013_v30 = vunpack.i.l.bf16 %v7012_v37  ;;  %6372 = vmatmul.mubr.msk.f32.vlgmr.msra.gmra.mrb[40].mxu0 %vm790_vm2, %v2700_v8 }
0x12a9   : > { %6385 = vmatprep.mubr.msk.f32.mxu0 %vm7221_vm1, %v7222_v5 }
0x12aa   : > { %v6763_v2 = vpack.c.bf16 %v7014_v62, %v7013_v30 }
0x12ac   : > { %6764 = vmatpush3.bf16.msra.mxu0 %v6763_v2 }
0x12ad   : > { %6765 = vmatprep.subr.bf16.mxu0 %v7220_v4 }
0x12af   : > { %6386 = vmatmul.mubr.msk.f32.vlgmr.msra.gmra.mrb[42].mxu0 %vm790_vm2, %v2868_v3 }
0x12b0   : > { %6767 = vmatpush3.bf16.msra.mxu0 %v7543_v61  ;;  %6392 = vmatprep.mubr.msk.f32.mxu0 %vm7221_vm1, %v7222_v5 }
0x12b1   : > { %6771 = vmatprep.subr.bf16.mxu0 %v7220_v4 }
0x1377   : > { %v7788_v13 = vpop.f32.mrb[38].mxu0 }
0x1378   : > { %v6359_v16 = vpop.f32.mrb[39].mxu0 }
0x137b   : > { %v2776_v25 = vpop.f32.mrb[40].mxu0 }
0x137c   : > { %v6373_v28 = vpop.f32.mrb[41].mxu0  ;;  %6400 = vmatmul.mubr.msk.f32.vlgmr.msra.gmra.mrb[38].mxu1 %vm790_vm2, %v2776_v25 }
0x137d   : > { %6780 = vmatpush3.bf16.xpose.msk.msra.mxu1 %vm7416_vm3, %v6778_v41  ;;  %6417 = vmatprep.mubr.msk.f32.mxu1 %vm7221_vm1, %v7222_v5 }
0x137e   : > { %6784 = vmatprep.subr.bf16.mxu1 %v7220_v4 }
0x1382   : > { %v2944_v17 = vpop.f32.mrb[42].mxu0 }
0x1383   : > { %v6387_v34 = vpop.f32.mrb[43].mxu0  ;;  %6393 = vmatmul.mubr.msk.f32.vlgmr.msra.gmra.mrb[44].mxu0 %vm790_vm2, %v2944_v17 }
0x1384   : > { %6773 = vmatpush3.bf16.msra.mxu0 %v7623_v10  ;;  %6418 = vmatmul.mubr.msk.f32.vlgmr.msra.gmra.mrb[40].mxu1 %vm790_vm2, %v7442_v27 }
0x1385   : > { %6787 = vmatpush3.bf16.xpose.msk.msra.mxu1 %vm7416_vm3, %v6785_v32  ;;  %6774 = vmatprep.subr.bf16.mxu0 %v7220_v4 }
0x1386   : > { %6431 = vmatprep.mubr.msk.f32.mxu1 %vm7221_vm1, %v7222_v5  ;;  %6410 = vmatprep.mubr.msk.f32.mxu0 %vm7221_vm1, %v7222_v5 }
0x1387   : > { %6794 = vmatprep.subr.bf16.mxu1 %v7220_v4 }
0x1388   : > { %6776 = vmatpush3.bf16.msra.mxu0 %v7637_v14 }
0x1389   : > { %6781 = vmatprep.subr.bf16.mxu0 %v7220_v4 }
0x138c   : > { %6432 = vmatmul.mubr.msk.f32.vlgmr.msra.gmra.mrb[42].mxu1 %vm790_vm2, %v7511_v1 }
0x138d   : > { %6796 = vmatpush3.bf16.msra.mxu1 %v7560_v11  ;;  %6452 = vmatprep.mubr.msk.f32.mxu1 %vm7221_vm1, %v7222_v5 }
0x138e   : > { %6803 = vmatprep.subr.bf16.mxu1 %v7220_v4 }
0x144f   : > { %v3090_v27 = vpop.f32.mrb[38].mxu1 }
0x1450   : > { %v6401_v38 = vpop.f32.mrb[39].mxu1 }
0x1456   : > { %v3017_v40 = vpop.f32.mrb[44].mxu0 }
0x1457   : > { %v3091_v41 = vadd.f32 %v3090_v27, %v3017_v40  ;;  %v6394_v35 = vpop.f32.mrb[45].mxu0  ;;  %v3282_v20 = vpop.f32.mrb[40].mxu1 }
0x1458   : > { %v6419_v19 = vpop.f32.mrb[41].mxu1  ;;  %v3286_v62 = vsel %vm790_vm2, %v3282_v20, -inf }
0x1459   : > { %v3094_v23 = vadd.f32 %v3091_v41, %v7594_v45 }
0x145b   : > { %3096 = vrot.lane.b32.xlu1 %v3094_v23, %s7226_s29 }
0x145f   : > { %v3450_v22 = vpop.f32.mrb[42].mxu1 }
0x1460   : > { %v6433_v26 = vpop.f32.mrb[43].mxu1  ;;  %v3454_v51 = vsel %vm790_vm2, %v3450_v22, -inf }
0x14cd   : > { %v3097_v31 = vpop.permute.xlu1 %3096 }
0x14ce   : > { %v3099_v42 = vadd.f32 %v7824_v39, %v3097_v31 }
0x14d0   : > { %3101 = vrot.lane.b32.xlu0 %v3099_v42, %s7224_s10 }
0x1542   : > { %v3102_v48 = vpop.permute.xlu0 %3101 }
0x1543   : > { %v3104_v7 = vsel %vm383_vm0, %v3102_v48, 0.0 }
0x1544   : > { %3105 = vadd.xlane.f32.xlu1 %v3104_v7 }
0x1548   : > { %3455 = vmax.xlane.f32.xlu1 %v3454_v51 }
0x15d1   : > { %v3106_v6 = vpop.xlane.xlu1 %3105 }
0x15d2   : > { %v3107_v36 = vmul.f32 0.03125, %v3106_v6 }
0x15d4   : > { %v3108_v8 = vsub.f32 %v3099_v42, %v3107_v36 }
0x15d5   : > { %v3456_v30 = vpop.xlane.xlu1 %3455 }
0x15d6   : > { %v3109_v37 = vmul.f32 %v3108_v8, %v3108_v8  ;;  %v3457_v0 = vsub.f32 %v3450_v22, %v3456_v30 }
0x15d8   : > { %3111 = vrot.lane.b32.xlu0 %v3109_v37, %s7224_s10  ;;  %v3458_v2 = vmul.f32 1.442695, %v3457_v0 }
0x15da   : > { %7113 = vpow2.f32 %v3458_v2 }
0x15e4   : > { %v7114_v25 = vpop.eup %7113 }
0x15e5   : > { %v3460_v12 = vsel %vm790_vm2, %v7114_v25, 0.0 }
0x15f7   : > { %3287 = vmax.xlane.f32.xlu0 %v3286_v62 }
0x164a   : > { %v3112_v3 = vpop.permute.xlu0 %3111 }
0x164b   : > { %v3114_v16 = vsel %vm383_vm0, %v3112_v3, 0.0 }
0x164c   : > { %3115 = vadd.xlane.f32.xlu0 %v3114_v16 }
0x1650   : > { %3461 = vadd.xlane.f32.xlu0 %v3460_v12 }
0x1684   : > { %v3288_v28 = vpop.xlane.xlu0 %3287 }
0x1685   : > { %v3289_v57 = vsub.f32 %v3282_v20, %v3288_v28 }
0x1687   : > { %v3290_v29 = vmul.f32 1.442695, %v3289_v57 }
0x1689   : > { %7115 = vpow2.f32 %v3290_v29 }
0x1693   : > { %v7116_v17 = vpop.eup %7115 }
0x1694   : > { %v3292_v32 = vsel %vm790_vm2, %v7116_v17, 0.0 }
0x1695   : > { %3293 = vadd.xlane.f32.xlu1 %v3292_v32 }
0x16a6   : > { %7021 = vrot.lane.b32.xlu1 %v7476_v43, %s7224_s10 }
0x16aa   : > { %7026 = vrot.lane.b32.xlu1 %v7476_v43, %s7225_s11 }
0x16ae   : > { %7031 = vrot.lane.b32.xlu1 %v7486_v49, %s7223_s7 }
0x16d9   : > { %v3116_v34 = vpop.xlane.xlu0 %3115 }
0x16da   : > { %v3117_v27 = vmul.f32 0.03125, %v3116_v34 }
0x16dc   : > { %v3118_v38 = vadd.f32 1e-05, %v3117_v27 }
0x16dd   : > { %v3462_v43 = vpop.xlane.xlu0 %3461 }
0x16de   : > { %7117 = vrsqrt.f32 %v3118_v38 }
0x16e8   : > { %v7118_v40 = vpop.eup %7117 }
0x16e9   : > { %v3120_v41 = vmul.f32 %v7118_v40, %v3108_v8 }
0x16eb   : > { %v3121_v35 = vmul.f32 %v3120_v41, %v7621_v63 }
0x16ed   : > { %v7843_v20 = vadd.f32 %v3121_v35, %v7607_v21 }
0x16ef   : > { %3124 = vrot.lane.b32.xlu0 %v7843_v20, %s7224_s10 }
0x1722   : > { %v3294_v19 = vpop.xlane.xlu1 %3293 }
0x1723   : > { %7119 = vrcp.f32 %v3294_v19 }
0x1724   : > { %7121 = vrcp.f32 %v3462_v43 }
0x1726   : > { %v7022_v23 = vpop.permute.xlu1 %7021 }
0x1727   : > { %v7024_v22 = vunpack.i.h.bf16 %v7022_v23  ;;  %v7023_v26 = vunpack.i.l.bf16 %v7022_v23 }
0x1729   : > { %v6782_v48 = vpack.c.bf16 %v7024_v22, %v7023_v26 }
0x172a   : > { %v7027_v31 = vpop.permute.xlu1 %7026 }
0x172b   : > { %v7029_v7 = vunpack.i.h.bf16 %v7027_v31  ;;  %v7028_v51 = vunpack.i.l.bf16 %v7027_v31 }
0x172d   : > { %v7120_v42 = vpop.eup %7119  ;;  %v6789_v37 = vpack.c.bf16 %v7029_v7, %v7028_v51 }
0x172e   : > { %v3296_v36 = vmul.f32 %v7120_v42, %v7116_v17  ;;  %v7122_v8 = vpop.eup %7121  ;;  %v7032_v3 = vpop.permute.xlu1 %7031 }
0x172f   : > { %v3464_v62 = vmul.f32 %v7122_v8, %v7114_v25  ;;  %v7034_v25 = vunpack.i.h.bf16 %v7032_v3  ;;  %v7033_v12 = vunpack.i.l.bf16 %v7032_v3 }
0x1731   : > { %v6811_v44 = vpack.c.bf16 %v7034_v25, %v7033_v12 }
0x1761   : > { %v3125_v6 = vpop.permute.xlu0 %3124 }
0x1762   : > { %6411 = vmatmul.mubr.msk.f32.vlgmr.msra.gmra.mrb[46].mxu0 %vm383_vm0, %v3125_v6 }
0x1763   : > { %6783 = vmatpush3.bf16.msra.mxu0 %v6782_v48  ;;  %6424 = vmatprep.mubr.msk.f32.mxu0 %vm7221_vm1, %v7222_v5 }
0x1764   : > { %6788 = vmatprep.subr.bf16.mxu0 %v7220_v4 }
0x1766   : > { %6425 = vmatmul.mubr.msk.f32.vlgmr.msra.gmra.mrb[48].mxu0 %vm790_vm2, %v3296_v36 }
0x1767   : > { %6790 = vmatpush3.bf16.msra.mxu0 %v6789_v37  ;;  %6438 = vmatprep.mubr.msk.f32.mxu0 %vm7221_vm1, %v7222_v5 }
0x1768   : > { %6791 = vmatprep.subr.bf16.mxu0 %v7220_v4 }
0x176a   : > { %6439 = vmatmul.mubr.msk.f32.vlgmr.msra.gmra.mrb[50].mxu0 %vm790_vm2, %v3464_v62 }
0x176b   : > { %6793 = vmatpush3.bf16.msra.mxu0 %v7543_v61  ;;  %6445 = vmatprep.mubr.msk.f32.mxu0 %vm7221_vm1, %v7222_v5 }
0x176c   : > { %6797 = vmatprep.subr.bf16.mxu0 %v7220_v4 }
0x1835   : > { %v7860_v30 = vpop.f32.mrb[46].mxu0 }
0x1836   : > { %v6412_v0 = vpop.f32.mrb[47].mxu0 }
0x1839   : > { %v3372_v2 = vpop.f32.mrb[48].mxu0 }
0x183a   : > { %v6426_v16 = vpop.f32.mrb[49].mxu0  ;;  %6453 = vmatmul.mubr.msk.f32.vlgmr.msra.gmra.mrb[44].mxu1 %vm790_vm2, %v3372_v2 }
0x183b   : > { %6806 = vmatpush3.bf16.xpose.msk.msra.mxu1 %vm7416_vm3, %v6804_v47  ;;  %6470 = vmatprep.mubr.msk.f32.mxu1 %vm7221_vm1, %v7222_v5 }
0x183c   : > { %6810 = vmatprep.subr.bf16.mxu1 %v7220_v4 }
0x183d   : > { %v3540_v28 = vpop.f32.mrb[50].mxu0 }
0x183e   : > { %v6440_v57 = vpop.f32.mrb[51].mxu0  ;;  %6446 = vmatmul.mubr.msk.f32.vlgmr.msra.gmra.mrb[52].mxu0 %vm790_vm2, %v3540_v28 }
0x183f   : > { %6799 = vmatpush3.bf16.msra.mxu0 %v7623_v10  ;;  %6463 = vmatprep.mubr.msk.f32.mxu0 %vm7221_vm1, %v7222_v5 }
0x1840   : > { %6800 = vmatprep.subr.bf16.mxu0 %v7220_v4 }
0x1842   : > { %6471 = vmatmul.mubr.msk.f32.vlgmr.msra.gmra.mrb[46].mxu1 %vm790_vm2, %v7824_v39 }
0x1843   : > { %6802 = vmatpush3.bf16.msra.mxu0 %v7637_v14  ;;  %6813 = vmatpush3.bf16.xpose.msk.msra.mxu1 %vm7416_vm3, %v6811_v44 }
0x1844   : > { %6484 = vmatprep.mubr.msk.f32.mxu1 %vm7221_vm1, %v7222_v5  ;;  %6807 = vmatprep.subr.bf16.mxu0 %v7220_v4 }
0x1845   : > { %6820 = vmatprep.subr.bf16.mxu1 %v7220_v4 }
0x184a   : > { %6485 = vmatmul.mubr.msk.f32.vlgmr.msra.gmra.mrb[48].mxu1 %vm790_vm2, %v7511_v1 }
0x184b   : > { %6822 = vmatpush3.bf16.msra.mxu1 %v7560_v11  ;;  %6505 = vmatprep.mubr.msk.f32.mxu1 %vm7221_vm1, %v7222_v5 }
0x184c   : > { %6829 = vmatprep.subr.bf16.mxu1 %v7220_v4 }
0x190d   : > { %v3686_v46 = vpop.f32.mrb[44].mxu1 }
0x190e   : > { %v6454_v47 = vpop.f32.mrb[45].mxu1 }
0x1911   : > { %v3613_v29 = vpop.f32.mrb[52].mxu0 }
0x1912   : > { %v3687_v17 = vadd.f32 %v3686_v46, %v3613_v29  ;;  %v6447_v32 = vpop.f32.mrb[53].mxu0 }
0x1914   : > { %v3690_v34 = vadd.f32 %v3687_v17, %v7594_v45 }
0x1915   : > { %v3878_v27 = vpop.f32.mrb[46].mxu1 }
0x1916   : > { %3692 = vrot.lane.b32.xlu0 %v3690_v34, %s7226_s29  ;;  %v6472_v38 = vpop.f32.mrb[47].mxu1  ;;  %v3882_v36 = vsel %vm790_vm2, %v3878_v27, -inf }
0x191d   : > { %v4046_v40 = vpop.f32.mrb[48].mxu1 }
0x191e   : > { %v6486_v41 = vpop.f32.mrb[49].mxu1  ;;  %v4050_v22 = vsel %vm790_vm2, %v4046_v40, -inf }
0x1988   : > { %v3693_v35 = vpop.permute.xlu0 %3692 }
0x1989   : > { %v3695_v19 = vadd.f32 %v7824_v39, %v3693_v35 }
0x198b   : > { %3697 = vrot.lane.b32.xlu1 %v3695_v19, %s7224_s10 }
0x19fd   : > { %v3698_v43 = vpop.permute.xlu1 %3697 }
0x19fe   : > { %v3700_v23 = vsel %vm383_vm0, %v3698_v43, 0.0 }
0x19ff   : > { %3701 = vadd.xlane.f32.xlu0 %v3700_v23 }
0x1a03   : > { %4051 = vmax.xlane.f32.xlu0 %v4050_v22 }
0x1a8c   : > { %v3702_v26 = vpop.xlane.xlu0 %3701 }
0x1a8d   : > { %v3703_v31 = vmul.f32 0.03125, %v3702_v26 }
0x1a8f   : > { %v3704_v42 = vsub.f32 %v3695_v19, %v3703_v31 }
0x1a90   : > { %v4052_v7 = vpop.xlane.xlu0 %4051 }
0x1a91   : > { %v3705_v48 = vmul.f32 %v3704_v42, %v3704_v42  ;;  %v4053_v51 = vsub.f32 %v4046_v40, %v4052_v7 }
0x1a93   : > { %3707 = vrot.lane.b32.xlu1 %v3705_v48, %s7224_s10  ;;  %v4054_v6 = vmul.f32 1.442695, %v4053_v51 }
0x1a95   : > { %7123 = vpow2.f32 %v4054_v6 }
0x1a9f   : > { %v7124_v8 = vpop.eup %7123 }
0x1aa0   : > { %v4056_v37 = vsel %vm790_vm2, %v7124_v8, 0.0 }
0x1ab7   : > { %3883 = vmax.xlane.f32.xlu1 %v3882_v36 }
0x1abb   : > { %4057 = vadd.xlane.f32.xlu1 %v4056_v37 }
0x1b05   : > { %v3708_v62 = vpop.permute.xlu1 %3707 }
0x1b06   : > { %v3710_v0 = vsel %vm383_vm0, %v3708_v62, 0.0 }
0x1b07   : > { %3711 = vadd.xlane.f32.xlu0 %v3710_v0 }
0x1b44   : > { %v3884_v2 = vpop.xlane.xlu1 %3883 }
0x1b45   : > { %v3885_v3 = vsub.f32 %v3878_v27, %v3884_v2 }
0x1b47   : > { %v3886_v16 = vmul.f32 1.442695, %v3885_v3 }
0x1b48   : > { %v4058_v27 = vpop.xlane.xlu1 %4057 }
0x1b49   : > { %7125 = vpow2.f32 %v3886_v16 }
0x1b53   : > { %v7126_v25 = vpop.eup %7125 }
0x1b54   : > { %v3888_v12 = vsel %vm790_vm2, %v7126_v25, 0.0 }
0x1b55   : > { %3889 = vadd.xlane.f32.xlu0 %v3888_v12 }
0x1b6b   : > { %7036 = vrot.lane.b32.xlu0 %v7486_v49, %s7224_s10 }
0x1b6f   : > { %7046 = vrot.lane.b32.xlu0 %v7496_v55, %s7223_s7 }
0x1b94   : > { %v3712_v28 = vpop.xlane.xlu0 %3711 }
0x1b95   : > { %v3713_v57 = vmul.f32 0.03125, %v3712_v28 }
0x1b97   : > { %v3714_v44 = vadd.f32 1e-05, %v3713_v57 }
0x1b99   : > { %7127 = vrsqrt.f32 %v3714_v44 }
0x1ba3   : > { %v7128_v46 = vpop.eup %7127 }
0x1ba4   : > { %v3716_v47 = vmul.f32 %v7128_v46, %v3704_v42 }
0x1ba6   : > { %v3717_v29 = vmul.f32 %v3716_v47, %v7621_v63 }
0x1ba8   : > { %v7908_v17 = vadd.f32 %v3717_v29, %v7607_v21 }
0x1baa   : > { %3720 = vrot.lane.b32.xlu1 %v7908_v17, %s7224_s10 }
0x1bae   : > { %7041 = vrot.lane.b32.xlu1 %v7486_v49, %s7225_s11 }
0x1be2   : > { %v3890_v32 = vpop.xlane.xlu0 %3889 }
0x1be3   : > { %7129 = vrcp.f32 %v3890_v32 }
0x1be4   : > { %7131 = vrcp.f32 %v4058_v27 }
0x1be6   : > { %v7037_v34 = vpop.permute.xlu0 %7036 }
0x1be7   : > { %v7039_v38 = vunpack.i.h.bf16 %v7037_v34  ;;  %v7038_v40 = vunpack.i.l.bf16 %v7037_v34 }
0x1be9   : > { %v6808_v35 = vpack.c.bf16 %v7039_v38, %v7038_v40 }
0x1bea   : > { %v7047_v6 = vpop.permute.xlu0 %7046 }
0x1beb   : > { %v7048_v37 = vunpack.i.l.bf16 %v7047_v6 }
0x1bed   : > { %v7130_v41 = vpop.eup %7129 }
0x1bee   : > { %v3892_v43 = vmul.f32 %v7130_v41, %v7126_v25  ;;  %v7132_v26 = vpop.eup %7131 }
0x1bef   : > { %v4060_v42 = vmul.f32 %v7132_v26, %v7124_v8  ;;  %v7049_v8 = vunpack.i.h.bf16 %v7047_v6 }
0x1bf1   : > { %v6837_v0 = vpack.c.bf16 %v7049_v8, %v7048_v37 }
0x1c1c   : > { %v3721_v19 = vpop.permute.xlu1 %3720 }
0x1c1d   : > { %6464 = vmatmul.mubr.msk.f32.vlgmr.msra.gmra.mrb[54].mxu0 %vm383_vm0, %v3721_v19 }
0x1c1e   : > { %6809 = vmatpush3.bf16.msra.mxu0 %v6808_v35  ;;  %6477 = vmatprep.mubr.msk.f32.mxu0 %vm7221_vm1, %v7222_v5 }
0x1c1f   : > { %6814 = vmatprep.subr.bf16.mxu0 %v7220_v4 }
0x1c20   : > { %v7042_v49 = vpop.permute.xlu1 %7041 }
0x1c21   : > { %v7044_v23 = vunpack.i.h.bf16 %v7042_v49  ;;  %v7043_v22 = vunpack.i.l.bf16 %v7042_v49  ;;  %6478 = vmatmul.mubr.msk.f32.vlgmr.msra.gmra.mrb[56].mxu0 %vm790_vm2, %v3892_v43 }
0x1c22   : > { %6491 = vmatprep.mubr.msk.f32.mxu0 %vm7221_vm1, %v7222_v5 }
0x1c23   : > { %v6815_v31 = vpack.c.bf16 %v7044_v23, %v7043_v22 }
0x1c25   : > { %6816 = vmatpush3.bf16.msra.mxu0 %v6815_v31 }
0x1c26   : > { %6817 = vmatprep.subr.bf16.mxu0 %v7220_v4 }
0x1c28   : > { %6492 = vmatmul.mubr.msk.f32.vlgmr.msra.gmra.mrb[58].mxu0 %vm790_vm2, %v4060_v42 }
0x1c29   : > { %6819 = vmatpush3.bf16.msra.mxu0 %v7543_v61  ;;  %6498 = vmatprep.mubr.msk.f32.mxu0 %vm7221_vm1, %v7222_v5 }
0x1c2a   : > { %6823 = vmatprep.subr.bf16.mxu0 %v7220_v4 }
0x1cf0   : > { %v7927_v48 = vpop.f32.mrb[54].mxu0 }
0x1cf1   : > { %v6465_v7 = vpop.f32.mrb[55].mxu0 }
0x1cf4   : > { %v3968_v51 = vpop.f32.mrb[56].mxu0 }
0x1cf5   : > { %v6479_v36 = vpop.f32.mrb[57].mxu0  ;;  %6506 = vmatmul.mubr.msk.f32.vlgmr.msra.gmra.mrb[50].mxu1 %vm790_vm2, %v3968_v51 }
0x1cf6   : > { %6832 = vmatpush3.bf16.xpose.msk.msra.mxu1 %vm7416_vm3, %v6830_v53  ;;  %6523 = vmatprep.mubr.msk.f32.mxu1 %vm7221_vm1, %v7222_v5 }
0x1cf7   : > { %6836 = vmatprep.subr.bf16.mxu1 %v7220_v4 }
0x1cfb   : > { %v4136_v62 = vpop.f32.mrb[58].mxu0 }
0x1cfc   : > { %v6493_v2 = vpop.f32.mrb[59].mxu0  ;;  %6499 = vmatmul.mubr.msk.f32.vlgmr.msra.gmra.mrb[60].mxu0 %vm790_vm2, %v4136_v62 }
0x1cfd   : > { %6825 = vmatpush3.bf16.msra.mxu0 %v7623_v10  ;;  %6524 = vmatmul.mubr.msk.f32.vlgmr.msra.gmra.mrb[52].mxu1 %vm790_vm2, %v7824_v39 }
0x1cfe   : > { %6839 = vmatpush3.bf16.xpose.msk.msra.mxu1 %vm7416_vm3, %v6837_v0  ;;  %6826 = vmatprep.subr.bf16.mxu0 %v7220_v4 }
0x1cff   : > { %6537 = vmatprep.mubr.msk.f32.mxu1 %vm7221_vm1, %v7222_v5  ;;  %6516 = vmatprep.mubr.msk.f32.mxu0 %vm7221_vm1, %v7222_v5 }
0x1d00   : > { %6846 = vmatprep.subr.bf16.mxu1 %v7220_v4 }
0x1d01   : > { %6828 = vmatpush3.bf16.msra.mxu0 %v7637_v14 }
0x1d02   : > { %6833 = vmatprep.subr.bf16.mxu0 %v7220_v4 }
0x1d05   : > { %6538 = vmatmul.mubr.msk.f32.vlgmr.msra.gmra.mrb[54].mxu1 %vm790_vm2, %v7511_v1 }
0x1d06   : > { %6848 = vmatpush3.bf16.msra.mxu1 %v7560_v11  ;;  %6558 = vmatprep.mubr.msk.f32.mxu1 %vm7221_vm1, %v7222_v5 }
0x1d07   : > { %6855 = vmatprep.subr.bf16.mxu1 %v7220_v4 }
0x1dc8   : > { %v4282_v50 = vpop.f32.mrb[50].mxu1 }
0x1dc9   : > { %v6507_v52 = vpop.f32.mrb[51].mxu1 }
0x1dcf   : > { %v4209_v53 = vpop.f32.mrb[60].mxu0 }
0x1dd0   : > { %v4283_v3 = vadd.f32 %v4282_v50, %v4209_v53  ;;  %v6500_v16 = vpop.f32.mrb[61].mxu0  ;;  %v4474_v25 = vpop.f32.mrb[52].mxu1 }
0x1dd1   : > { %v6525_v12 = vpop.f32.mrb[53].mxu1  ;;  %v4478_v35 = vsel %vm790_vm2, %v4474_v25, -inf }
0x1dd2   : > { %v4286_v28 = vadd.f32 %v4283_v3, %v7594_v45 }
0x1dd4   : > { %4288 = vrot.lane.b32.xlu1 %v4286_v28, %s7226_s29 }
0x1dd8   : > { %v4642_v57 = vpop.f32.mrb[54].mxu1 }
0x1dd9   : > { %v6539_v44 = vpop.f32.mrb[55].mxu1  ;;  %v4646_v34 = vsel %vm790_vm2, %v4642_v57, -inf }
0x1e46   : > { %v4289_v46 = vpop.permute.xlu1 %4288 }
0x1e47   : > { %v4291_v47 = vadd.f32 %v7824_v39, %v4289_v46 }
0x1e49   : > { %4293 = vrot.lane.b32.xlu0 %v4291_v47, %s7224_s10 }
0x1ebb   : > { %v4294_v29 = vpop.permute.xlu0 %4293 }
0x1ebc   : > { %v4296_v32 = vsel %vm383_vm0, %v4294_v29, 0.0 }
0x1ebd   : > { %4297 = vadd.xlane.f32.xlu1 %v4296_v32 }
0x1ec1   : > { %4647 = vmax.xlane.f32.xlu1 %v4646_v34 }
0x1f4a   : > { %v4298_v27 = vpop.xlane.xlu1 %4297 }
0x1f4b   : > { %v4299_v38 = vmul.f32 0.03125, %v4298_v27 }
0x1f4d   : > { %v4300_v40 = vsub.f32 %v4291_v47, %v4299_v38 }
0x1f4e   : > { %v4648_v19 = vpop.xlane.xlu1 %4647 }
0x1f4f   : > { %v4301_v41 = vmul.f32 %v4300_v40, %v4300_v40  ;;  %v4649_v43 = vsub.f32 %v4642_v57, %v4648_v19 }
0x1f51   : > { %4303 = vrot.lane.b32.xlu0 %v4301_v41, %s7224_s10  ;;  %v4650_v49 = vmul.f32 1.442695, %v4649_v43 }
0x1f53   : > { %7133 = vpow2.f32 %v4650_v49 }
0x1f5d   : > { %v7134_v26 = vpop.eup %7133 }
0x1f5e   : > { %v4652_v31 = vsel %vm790_vm2, %v7134_v26, 0.0 }
0x1f70   : > { %4479 = vmax.xlane.f32.xlu0 %v4478_v35 }
0x1fc3   : > { %v4304_v23 = vpop.permute.xlu0 %4303 }
0x1fc4   : > { %v4306_v22 = vsel %vm383_vm0, %v4304_v23, 0.0 }
0x1fc5   : > { %4307 = vadd.xlane.f32.xlu0 %v4306_v22 }
0x1fc9   : > { %4653 = vadd.xlane.f32.xlu0 %v4652_v31 }
0x1ffd   : > { %v4480_v42 = vpop.xlane.xlu0 %4479 }
0x1ffe   : > { %v4481_v7 = vsub.f32 %v4474_v25, %v4480_v42 }
0x2000   : > { %v4482_v51 = vmul.f32 1.442695, %v4481_v7 }
0x2002   : > { %7135 = vpow2.f32 %v4482_v51 }
0x200c   : > { %v7136_v6 = vpop.eup %7135 }
0x200d   : > { %v4484_v36 = vsel %vm790_vm2, %v7136_v6, 0.0 }
0x200e   : > { %4485 = vadd.xlane.f32.xlu1 %v4484_v36 }
0x201f   : > { %7051 = vrot.lane.b32.xlu1 %v7496_v55, %s7224_s10 }
0x2023   : > { %7056 = vrot.lane.b32.xlu1 %v7496_v55, %s7225_s11 }
0x2027   : > { %7061 = vrot.lane.b32.xlu1 %v7506_v60, %s7223_s7  ;;  %s8095_s7 = scalar_lea.vmem [#allocation2], %s5686_s6 }
0x2028   : > { %s5608_s9 = sshll.u32 %s8095_s7, 4  ;;  %s8139_s9 = int_to_ptr.vmem [resolvable:$true] %s5608_s9 }
0x2029   : > { %s7156_s25 = scalar_lea.vmem %s8139_s9, 1024 }
0x202a   : > { %p7157_p12 = scmp.ne.s32.totalorder %s8139_s9, %s7156_s25 }
0x202c   : > { %p7158_p13 = pnand %p7157_p12, %p7288_p5 }
0x202e   : > { %p7159_p0 = pneg %p7158_p13 }
0x2052   : > { %v4308_v8 = vpop.xlane.xlu0 %4307 }
0x2053   : > { %v4309_v37 = vmul.f32 0.03125, %v4308_v8 }
0x2055   : > { %v4310_v62 = vadd.f32 1e-05, %v4309_v37 }
0x2056   : > { %v4654_v55 = vpop.xlane.xlu0 %4653 }
0x2057   : > { %7137 = vrsqrt.f32 %v4310_v62 }
0x2061   : > { %v7138_v0 = vpop.eup %7137 }
0x2062   : > { %v4312_v2 = vmul.f32 %v7138_v0, %v4300_v40 }
0x2064   : > { %v4313_v50 = vmul.f32 %v4312_v2, %v7621_v63 }
0x2066   : > { %v7977_v52 = vadd.f32 %v4313_v50, %v7607_v21 }
0x2068   : > { %4316 = vrot.lane.b32.xlu0 %v7977_v52, %s7224_s10 }
0x209b   : > { %v4486_v53 = vpop.xlane.xlu1 %4485 }
0x209c   : > { %7139 = vrcp.f32 %v4486_v53 }
0x209d   : > { %7141 = vrcp.f32 %v4654_v55 }
0x209f   : > { %v7052_v3 = vpop.permute.xlu1 %7051 }
0x20a0   : > { %v7054_v16 = vunpack.i.h.bf16 %v7052_v3  ;;  %v7053_v25 = vunpack.i.l.bf16 %v7052_v3 }
0x20a2   : > { %v6834_v57 = vpack.c.bf16 %v7054_v16, %v7053_v25 }
0x20a3   : > { %v7057_v12 = vpop.permute.xlu1 %7056 }
0x20a4   : > { %v7059_v44 = vunpack.i.h.bf16 %v7057_v12  ;;  %v7058_v46 = vunpack.i.l.bf16 %v7057_v12 }
0x20a6   : > { %v7140_v28 = vpop.eup %7139  ;;  %v6841_v34 = vpack.c.bf16 %v7059_v44, %v7058_v46 }
0x20a7   : > { %v4488_v29 = vmul.f32 %v7140_v28, %v7136_v6  ;;  %v7142_v32 = vpop.eup %7141  ;;  %v7062_v35 = vpop.permute.xlu1 %7061 }
0x20a8   : > { %v4656_v27 = vmul.f32 %v7142_v32, %v7134_v26  ;;  %v7064_v43 = vunpack.i.h.bf16 %v7062_v35  ;;  %v7063_v49 = vunpack.i.l.bf16 %v7062_v35 }
0x20aa   : > { %v6863_v56 = vpack.c.bf16 %v7064_v43, %v7063_v49 }
0x20da   : > { %v4317_v47 = vpop.permute.xlu0 %4316 }
0x20db   : > { %6517 = vmatmul.mubr.msk.f32.vlgmr.msra.gmra.mrb[62].mxu0 %vm383_vm0, %v4317_v47 }
0x20dc   : > { %6835 = vmatpush3.bf16.msra.mxu0 %v6834_v57  ;;  %6530 = vmatprep.mubr.msk.f32.mxu0 %vm7221_vm1, %v7222_v5 }
0x20dd   : > { %6840 = vmatprep.subr.bf16.mxu0 %v7220_v4 }
0x20df   : > { %6531 = vmatmul.mubr.msk.f32.vlgmr.msra.gmra.mrb[64].mxu0 %vm790_vm2, %v4488_v29 }
0x20e0   : > { %6842 = vmatpush3.bf16.msra.mxu0 %v6841_v34  ;;  %6544 = vmatprep.mubr.msk.f32.mxu0 %vm7221_vm1, %v7222_v5 }
0x20e1   : > { %6843 = vmatprep.subr.bf16.mxu0 %v7220_v4 }
0x20e3   : > { %6545 = vmatmul.mubr.msk.f32.vlgmr.msra.gmra.mrb[66].mxu0 %vm790_vm2, %v4656_v27 }
0x20e4   : > { %6845 = vmatpush3.bf16.msra.mxu0 %v7543_v61  ;;  %6551 = vmatprep.mubr.msk.f32.mxu0 %vm7221_vm1, %v7222_v5 }
0x20e5   : > { %6849 = vmatprep.subr.bf16.mxu0 %v7220_v4 }
0x21ae   : > { %v7994_v38 = vpop.f32.mrb[62].mxu0 }
0x21af   : > { %v6518_v40 = vpop.f32.mrb[63].mxu0 }
0x21b2   : > { %v4564_v41 = vpop.f32.mrb[64].mxu0 }
0x21b3   : > { %v6532_v19 = vpop.f32.mrb[65].mxu0  ;;  %6559 = vmatmul.mubr.msk.f32.vlgmr.msra.gmra.mrb[56].mxu1 %vm790_vm2, %v4564_v41 }
0x21b4   : > { %6858 = vmatpush3.bf16.xpose.msk.msra.mxu1 %vm7416_vm3, %v6856_v59  ;;  %6576 = vmatprep.mubr.msk.f32.mxu1 %vm7221_vm1, %v7222_v5 }
0x21b5   : > { %6862 = vmatprep.subr.bf16.mxu1 %v7220_v4 }
0x21b6   : > { %v4732_v23 = vpop.f32.mrb[66].mxu0 }
0x21b7   : > { %v6546_v22 = vpop.f32.mrb[67].mxu0  ;;  %6552 = vmatmul.mubr.msk.f32.vlgmr.msra.gmra.mrb[68].mxu0 %vm790_vm2, %v4732_v23 }
0x21b8   : > { %6851 = vmatpush3.bf16.msra.mxu0 %v7623_v10  ;;  %6569 = vmatprep.mubr.msk.f32.mxu0 %vm7221_vm1, %v7222_v5 }
0x21b9   : > { %6852 = vmatprep.subr.bf16.mxu0 %v7220_v4 }
0x21bb   : > { %6577 = vmatmul.mubr.msk.f32.vlgmr.msra.gmra.mrb[58].mxu1 %vm790_vm2, %v7824_v39 }
0x21bc   : > { %6854 = vmatpush3.bf16.msra.mxu0 %v7637_v14  ;;  %6865 = vmatpush3.bf16.xpose.msk.msra.mxu1 %vm7416_vm3, %v6863_v56 }
0x21bd   : > { %6590 = vmatprep.mubr.msk.f32.mxu1 %vm7221_vm1, %v7222_v5  ;;  %6859 = vmatprep.subr.bf16.mxu0 %v7220_v4 }
0x21be   : > { %6872 = vmatprep.subr.bf16.mxu1 %v7220_v4 }
0x21c3   : > { %6591 = vmatmul.mubr.msk.f32.vlgmr.msra.gmra.mrb[60].mxu1 %vm790_vm2, %v7511_v1 }
0x21c4   : > { %6874 = vmatpush3.bf16.msra.mxu1 %v7560_v11  ;;  %6611 = vmatprep.mubr.msk.f32.mxu1 %vm7221_vm1, %v7222_v5 }
0x2286   : > { %v4878_v58 = vpop.f32.mrb[56].mxu1 }
0x2287   : > { %v6560_v59 = vpop.f32.mrb[57].mxu1 }
0x228a   : > { %v4805_v26 = vpop.f32.mrb[68].mxu0 }
0x228b   : > { %v4879_v15 = vadd.f32 %v4878_v58, %v4805_v26  ;;  %v6553_v31 = vpop.f32.mrb[69].mxu0 }
0x228d   : > { %v4882_v42 = vadd.f32 %v4879_v15, %v7594_v45 }
0x228e   : > { %v5070_v7 = vpop.f32.mrb[58].mxu1 }
0x228f   : > { %4884 = vrot.lane.b32.xlu0 %v4882_v42, %s7226_s29  ;;  %v6578_v51 = vpop.f32.mrb[59].mxu1  ;;  %v5074_v25 = vsel %vm790_vm2, %v5070_v7, -inf }
0x2296   : > { %v5238_v6 = vpop.f32.mrb[60].mxu1 }
0x2297   : > { %v6592_v36 = vpop.f32.mrb[61].mxu1  ;;  %v5242_v62 = vsel %vm790_vm2, %v5238_v6, -inf }
0x2301   : > { %v4885_v8 = vpop.permute.xlu0 %4884 }
0x2302   : > { %v4887_v1 = vadd.f32 %v7824_v39, %v4885_v8 }
0x2304   : > { %4889 = vrot.lane.b32.xlu1 %v4887_v1, %s7224_s10 }
0x2376   : > { %v4890_v11 = vpop.permute.xlu1 %4889 }
0x2377   : > { %v4892_v37 = vsel %vm383_vm0, %v4890_v11, 0.0 }
0x2378   : > { %4893 = vadd.xlane.f32.xlu0 %v4892_v37 }
0x237c   : > { %5243 = vmax.xlane.f32.xlu0 %v5242_v62 }
0x2405   : > { %v4894_v0 = vpop.xlane.xlu0 %4893 }
0x2406   : > { %v4895_v2 = vmul.f32 0.03125, %v4894_v0 }
0x2408   : > { %v4896_v50 = vsub.f32 %v4887_v1, %v4895_v2 }
0x2409   : > { %v5244_v55 = vpop.xlane.xlu0 %5243 }
0x240a   : > { %v4897_v53 = vmul.f32 %v4896_v50, %v4896_v50  ;;  %v5245_v3 = vsub.f32 %v5238_v6, %v5244_v55 }
0x240c   : > { %4899 = vrot.lane.b32.xlu1 %v4897_v53, %s7224_s10  ;;  %v5246_v16 = vmul.f32 1.442695, %v5245_v3 }
0x240e   : > { %7143 = vpow2.f32 %v5246_v16 }
0x2418   : > { %v7144_v12 = vpop.eup %7143 }
0x2419   : > { %v5248_v28 = vsel %vm790_vm2, %v7144_v12, 0.0 }
0x2430   : > { %5075 = vmax.xlane.f32.xlu1 %v5074_v25 }
0x2434   : > { %5249 = vadd.xlane.f32.xlu1 %v5248_v28 }
0x247e   : > { %v4900_v57 = vpop.permute.xlu1 %4899 }
0x247f   : > { %v4902_v44 = vsel %vm383_vm0, %v4900_v57, 0.0 }
0x2480   : > { %4903 = vadd.xlane.f32.xlu0 %v4902_v44 }
0x24bd   : > { %v5076_v46 = vpop.xlane.xlu1 %5075 }
0x24be   : > { %v5077_v47 = vsub.f32 %v5070_v7, %v5076_v46 }
0x24c0   : > { %v5078_v29 = vmul.f32 1.442695, %v5077_v47 }
0x24c1   : > { %v5250_v56 = vpop.xlane.xlu1 %5249 }
0x24c2   : > { %7145 = vpow2.f32 %v5078_v29 }
0x24cc   : > { %v7146_v32 = vpop.eup %7145 }
0x24cd   : > { %v5080_v34 = vsel %vm790_vm2, %v7146_v32, 0.0 }
0x24ce   : > { %5081 = vadd.xlane.f32.xlu0 %v5080_v34 }
0x24e4   : > { %7066 = vrot.lane.b32.xlu0 %v7506_v60, %s7224_s10 }
0x250d   : > { %v4904_v27 = vpop.xlane.xlu0 %4903 }
0x250e   : > { %v4905_v40 = vmul.f32 0.03125, %v4904_v27 }
0x2510   : > { %v4906_v41 = vadd.f32 1e-05, %v4905_v40 }
0x2512   : > { %7147 = vrsqrt.f32 %v4906_v41 }
0x251c   : > { %v7148_v35 = vpop.eup %7147 }
0x251d   : > { %v4908_v19 = vmul.f32 %v7148_v35, %v4896_v50 }
0x251f   : > { %v4909_v43 = vmul.f32 %v4908_v19, %v7621_v63 }
0x2521   : > { %v8039_v49 = vadd.f32 %v4909_v43, %v7607_v21 }
0x2523   : > { %4912 = vrot.lane.b32.xlu1 %v8039_v49, %s7224_s10 }
0x2527   : > { %7071 = vrot.lane.b32.xlu1 %v7506_v60, %s7225_s11 }
0x255b   : > { %v5082_v23 = vpop.xlane.xlu0 %5081 }
0x255c   : > { %7149 = vrcp.f32 %v5082_v23 }
0x255d   : > { %7151 = vrcp.f32 %v5250_v56 }
0x255f   : > { %v7067_v22 = vpop.permute.xlu0 %7066 }
0x2560   : > { %v7069_v58 = vunpack.i.h.bf16 %v7067_v22  ;;  %v7068_v59 = vunpack.i.l.bf16 %v7067_v22 }
0x2562   : > { %v6860_v15 = vpack.c.bf16 %v7069_v58, %v7068_v59 }
0x2566   : > { %v7150_v26 = vpop.eup %7149 }
0x2567   : > { %v5084_v42 = vmul.f32 %v7150_v26, %v7146_v32  ;;  %v7152_v6 = vpop.eup %7151 }
0x2568   : > { %v5252_v8 = vmul.f32 %v7152_v6, %v7144_v12 }
0x2595   : > { %v4913_v31 = vpop.permute.xlu1 %4912 }
0x2596   : > { %6570 = vmatmul.mubr.msk.f32.vlgmr.msra.gmra.mrb[70].mxu0 %vm383_vm0, %v4913_v31 }
0x2597   : > { %6861 = vmatpush3.bf16.msra.mxu0 %v6860_v15  ;;  %6583 = vmatprep.mubr.msk.f32.mxu0 %vm7221_vm1, %v7222_v5 }
0x2598   : > { %6866 = vmatprep.subr.bf16.mxu0 %v7220_v4 }
0x2599   : > { %v7072_v60 = vpop.permute.xlu1 %7071 }
0x259a   : > { %v7074_v7 = vunpack.i.h.bf16 %v7072_v60  ;;  %v7073_v51 = vunpack.i.l.bf16 %v7072_v60  ;;  %6584 = vmatmul.mubr.msk.f32.vlgmr.msra.gmra.mrb[72].mxu0 %vm790_vm2, %v5084_v42 }
0x259b   : > { %6597 = vmatprep.mubr.msk.f32.mxu0 %vm7221_vm1, %v7222_v5 }
0x259c   : > { %v6867_v36 = vpack.c.bf16 %v7074_v7, %v7073_v51 }
0x259e   : > { %6868 = vmatpush3.bf16.msra.mxu0 %v6867_v36 }
0x259f   : > { %6869 = vmatprep.subr.bf16.mxu0 %v7220_v4 }
0x25a1   : > { %6598 = vmatmul.mubr.msk.f32.vlgmr.msra.gmra.mrb[74].mxu0 %vm790_vm2, %v5252_v8 }
0x25a2   : > { %6871 = vmatpush3.bf16.msra.mxu0 %v7543_v61  ;;  %6604 = vmatprep.mubr.msk.f32.mxu0 %vm7221_vm1, %v7222_v5 }
0x25a3   : > { %6875 = vmatprep.subr.bf16.mxu0 %v7220_v4 }
0x2669   : > { %v4982_v1 = vpop.f32.mrb[70].mxu0 }
0x266a   : > { %v6571_v11 = vpop.f32.mrb[71].mxu0 }
0x266d   : > { %v5160_v37 = vpop.f32.mrb[72].mxu0 }
0x266e   : > { %v6585_v62 = vpop.f32.mrb[73].mxu0  ;;  %6612 = vmatmul.mubr.msk.f32.vlgmr.msra.gmra.mrb[62].mxu1 %vm790_vm2, %v5160_v37 }
0x2674   : > { %v5328_v0 = vpop.f32.mrb[74].mxu0 }
0x2675   : > { %v6599_v2 = vpop.f32.mrb[75].mxu0  ;;  %6605 = vmatmul.mubr.msk.f32.vlgmr.msra.gmra.mrb[76].mxu0 %vm790_vm2, %v5328_v0 }
0x2676   : > { %6877 = vmatpush3.bf16.msra.mxu0 %v7623_v10  ;;  %6622 = vmatprep.mubr.msk.f32.mxu0 %vm7221_vm1, %v7222_v5 }
0x2677   : > { %6878 = vmatprep.subr.bf16.mxu0 %v7220_v4 }
0x267a   : > { %6880 = vmatpush3.bf16.msra.mxu0 %v7637_v14 }
0x2741   : > { %v5474_v61 = vpop.f32.mrb[62].mxu1 }
0x2742   : > { %v6613_v50 = vpop.f32.mrb[63].mxu1 }
0x2748   : > { %v5401_v53 = vpop.f32.mrb[76].mxu0 }
0x2749   : > { %v5475_v55 = vadd.f32 %v5474_v61, %v5401_v53  ;;  %v6606_v3 = vpop.f32.mrb[77].mxu0 }
0x274b   : > { %v5478_v16 = vadd.f32 %v5475_v55, %v7594_v45 }
0x274d   : > { %5480 = vrot.lane.b32.xlu0 %v5478_v16, %s7226_s29 }
0x27bf   : > { %v5481_v25 = vpop.permute.xlu0 %5480 }
0x27c0   : > { %v5483_v12 = vadd.f32 %v7824_v39, %v5481_v25 }
0x27c2   : > { %5485 = vrot.lane.b32.xlu1 %v5483_v12, %s7224_s10 }
0x2834   : > { %v5486_v10 = vpop.permute.xlu1 %5485 }
0x2835   : > { %v5488_v5 = vsel %vm383_vm0, %v5486_v10, 0.0 }
0x2836   : > { %5489 = vadd.xlane.f32.xlu0 %v5488_v5 }
0x28c3   : > { %v5490_v4 = vpop.xlane.xlu0 %5489 }
0x28c4   : > { %v5491_v14 = vmul.f32 0.03125, %v5490_v4 }
0x28c6   : > { %v5492_v28 = vsub.f32 %v5483_v12, %v5491_v14 }
0x28c8   : > { %v5493_v57 = vmul.f32 %v5492_v28, %v5492_v28 }
0x28ca   : > { %5495 = vrot.lane.b32.xlu1 %v5493_v57, %s7224_s10 }
0x293c   : > { %v5496_v44 = vpop.permute.xlu1 %5495 }
0x293d   : > { %v5498_v46 = vsel %vm383_vm0, %v5496_v44, 0.0 }
0x293e   : > { %5499 = vadd.xlane.f32.xlu1 %v5498_v46 }
0x294f   : > { %1412 = vrot.lane.b32.xlu1 %v7654_v9, %s7226_s29 }
0x29cb   : > { %v5500_v39 = vpop.xlane.xlu1 %5499 }
0x29cc   : > { %v5501_v47 = vmul.f32 0.03125, %v5500_v39 }
0x29ce   : > { %v5502_v29 = vadd.f32 1e-05, %v5501_v47 }
0x29cf   : > { %v1413_v27 = vpop.permute.xlu1 %1412 }
0x29d0   : > { %7153 = vrsqrt.f32 %v5502_v29  ;;  %v1415_v41 = vadd.f32 %v1413_v27, %v7629_v18 }
0x29d2   : > { %v1416_v19 = vadd.f32 %v1415_v41, %v7594_v45 }
0x29da   : > { %v7154_v32 = vpop.eup %7153 }
0x29db   : > { %v5504_v34 = vmul.f32 %v7154_v32, %v5492_v28 }
0x29dd   : > { %v5505_v40 = vmul.f32 %v5504_v34, %v7621_v63 }
0x29df   : > { %v5506_v35 = vadd.f32 %v5505_v40, %v7607_v21 }
0x29e1   : > { %5508 = vrot.lane.b32.xlu0 %v5506_v35, %s7224_s10 }
0x29e5   : > { %1418 = vrot.lane.b32.xlu0 %v1416_v19, %s7224_s10 }
0x29e9   : > { %2007 = vrot.lane.b32.xlu0 %v7721_v54, %s7226_s29 }
0x29ed   : > { %2603 = vrot.lane.b32.xlu0 %v7788_v13, %s7226_s29 }
0x29f1   : > { %3199 = vrot.lane.b32.xlu0 %v7860_v30, %s7226_s29 }
0x29f5   : > { %3795 = vrot.lane.b32.xlu0 %v7927_v48, %s7226_s29 }
0x29f9   : > { %4391 = vrot.lane.b32.xlu0 %v7994_v38, %s7226_s29 }
0x29fd   : > { %4987 = vrot.lane.b32.xlu0 %v4982_v1, %s7226_s29 }
0x2a53   : > { %v5509_v21 = vpop.permute.xlu0 %5508 }
0x2a54   : > { %6623 = vmatmul.mubr.msk.f32.vlgmr.msra.gmra.mrb[78].mxu0 %vm383_vm0, %v5509_v21 }
0x2a57   : > { %v1419_v63 = vpop.permute.xlu0 %1418 }
0x2a58   : > { %1421 = vst.msk [vmem:[%s8095_s7] sm:$0xff] %vm383_vm0, %v1419_v63 }
0x2a5b   : > { %v2008_v18 = vpop.permute.xlu0 %2007 }
0x2a5c   : > { %v2010_v9 = vadd.f32 %v2008_v18, %v7704_v33 }
0x2a5e   : > { %v2011_v54 = vadd.f32 %v2010_v9, %v7594_v45 }
0x2a5f   : > { %v2604_v13 = vpop.permute.xlu0 %2603 }
0x2a60   : > { %v2606_v30 = vadd.f32 %v2604_v13, %v7769_v24  ;;  %2013 = vrot.lane.b32.xlu1 %v2011_v54, %s7224_s10 }
0x2a62   : > { %v2607_v48 = vadd.f32 %v2606_v30, %v7594_v45 }
0x2a63   : > { %v3200_v38 = vpop.permute.xlu0 %3199 }
0x2a64   : > { %v3202_v43 = vadd.f32 %v3200_v38, %v7843_v20  ;;  %2609 = vrot.lane.b32.xlu1 %v2607_v48, %s7224_s10 }
0x2a66   : > { %v3203_v23 = vadd.f32 %v3202_v43, %v7594_v45 }
0x2a67   : > { %v3796_v22 = vpop.permute.xlu0 %3795 }
0x2a68   : > { %v3798_v33 = vadd.f32 %v3796_v22, %v7908_v17  ;;  %3205 = vrot.lane.b32.xlu1 %v3203_v23, %s7224_s10 }
0x2a6a   : > { %v3799_v24 = vadd.f32 %v3798_v33, %v7594_v45 }
0x2a6b   : > { %v4392_v56 = vpop.permute.xlu0 %4391 }
0x2a6c   : > { %v4394_v58 = vadd.f32 %v4392_v56, %v7977_v52  ;;  %3801 = vrot.lane.b32.xlu1 %v3799_v24, %s7224_s10 }
0x2a6e   : > { %v4395_v20 = vadd.f32 %v4394_v58, %v7594_v45 }
0x2a6f   : > { %v4988_v59 = vpop.permute.xlu0 %4987 }
0x2a70   : > { %v4990_v26 = vadd.f32 %v4988_v59, %v8039_v49  ;;  %4397 = vrot.lane.b32.xlu1 %v4395_v20, %s7224_s10 }
0x2a72   : > { %v4991_v17 = vadd.f32 %v4990_v26, %v7594_v45 }
0x2a74   : > { %4993 = vrot.lane.b32.xlu1 %v4991_v17, %s7224_s10 }
0x2ad2   : > { %v2014_v15 = vpop.permute.xlu1 %2013 }
0x2ad3   : > { %5745 = vst.msk [vmem:[%s8095_s7 + $0x8] sm:$0xff] %vm383_vm0, %v2014_v15 }
0x2ad6   : > { %v2610_v31 = vpop.permute.xlu1 %2609 }
0x2ad7   : > { %5757 = vst.msk [vmem:[%s8095_s7 + $0x10] sm:$0xff] %vm383_vm0, %v2610_v31 }
0x2ada   : > { %v3206_v52 = vpop.permute.xlu1 %3205 }
0x2adb   : > { %5769 = vst.msk [vmem:[%s8095_s7 + $0x18] sm:$0xff] %vm383_vm0, %v3206_v52 }
0x2ade   : > { %v3802_v42 = vpop.permute.xlu1 %3801 }
0x2adf   : > { %5781 = vst.msk [vmem:[%s8095_s7 + $0x20] sm:$0xff] %vm383_vm0, %v3802_v42 }
0x2ae2   : > { %v4398_v49 = vpop.permute.xlu1 %4397 }
0x2ae3   : > { %5793 = vst.msk [vmem:[%s8095_s7 + $0x28] sm:$0xff] %vm383_vm0, %v4398_v49 }
0x2ae6   : > { %v4994_v60 = vpop.permute.xlu1 %4993 }
0x2ae7   : > { %5805 = vst.msk [vmem:[%s8095_s7 + $0x30] sm:$0xff] %vm383_vm0, %v4994_v60 }
0x2b27   : > { %v5578_v7 = vpop.f32.mrb[78].mxu0 }
0x2b28   : > { %v6624_v51 = vpop.f32.mrb[79].mxu0  ;;  %5583 = vrot.lane.b32.xlu0 %v5578_v7, %s7226_s29 }
0x2b9a   : > { %v5584_v6 = vpop.permute.xlu0 %5583 }
0x2b9b   : > { %v5586_v36 = vadd.f32 %v5584_v6, %v5506_v35 }
0x2b9d   : > { %v5587_v8 = vadd.f32 %v5586_v36, %v7594_v45 }
0x2b9f   : > { %5589 = vrot.lane.b32.xlu1 %v5587_v8, %s7224_s10  ;;  %s7160_s10 = sshll.u32 %s7227_s16, 4  ;;  %s7161_s10 = int_to_ptr.vmem [resolvable:$false] %s7160_s10 }
0x2ba0   : > { %s7162_s26 = scalar_lea.vmem %s7161_s10, 2048  ;;  %p7163_p1 = scmp.lt.s32.totalorder %s8139_s9, %s7161_s10 }
0x2ba1   : > { %p7164_p2 = scmp.lt.s32.totalorder %s7162_s26, %s7156_s25 }
0x2ba3   : > { %p7165_p3 = por %p7164_p2, %p7163_p1 }
0x2ba5   : > { %p7166_p4 = pnand %p7165_p3, %p7159_p0 }
0x2c11   : > { %v5590_v1 = vpop.permute.xlu1 %5589 }
0x2c12   : > { %5817 = vst.msk [vmem:[%s8095_s7 + $0x38] sm:$0xff] %vm383_vm0, %v5590_v1 }
0x2c13   : > { %7169 = shalt.err (!%p7166_p4)
}
0x2c14   : > { %s7170_s27 = scalar_lea.hbm %s8137_s19, 1024  ;;  %s7174_s29 = scalar_lea.hbm %s8189_s3, 2048 }
0x2c15   : > { %p7171_p7 = scmp.ne.s32.totalorder %s8137_s19, %s7170_s27  ;;  %p7175_p10 = scmp.lt.u32.totalorder %s8137_s19, %s8189_s3 }
0x2c16   : > { %p7176_p11 = scmp.lt.u32.totalorder %s7174_s29, %s7170_s27  ;;  %p7178_p13 = scmp.lt.u32.totalorder %s7170_s27, %s8137_s19 }
0x2c17   : > { %p7172_p8 = pnand %p7171_p7, %p7288_p5 }
0x2c18   : > { %p7177_p12 = por %p7176_p11, %p7175_p10 }
0x2c19   : > { %p7173_p9 = pneg %p7172_p8 }
0x2c1a   : > { %p7179_p0 = por %p7178_p13, %p7177_p12 }
0x2c1c   : > { %p7180_p1 = pnand %p7179_p0, %p7173_p9 }
0x2c1e   : > { %7183 = shalt.err (!%p7180_p1)
}
0x2c1f   : > { %s7228_s5 = smov 128   ;;  %s7229_s6 = smov 8  }
0x2c20   : > { %6897 = dma.vmem_to_hbm [thread:$0]  (%p7288_p5), %s8139_s9, 1024, %s8137_s19, %s8145_s20, %s7228_s5, %s7228_s5, %s7229_s6  }
0x2c21 PF: > { %p6903_p2 = scmp.ge.s32.totalorder %s7218_s15, 2  ;;  %s5623_s7 = sand.u32 1, %s7206_s12  }
0x2c22   : > { %s5624_s8 = scalar_lea.sflag [#allocation3], %s5623_s7 }
0x2c23   : > { %p6900_p3 = pnand %p6903_p2, %p7292_p6 }
0x2c25   : > { %7201 = dma.done.wait (!%p6900_p3), %s5624_s8, 1024  }
0x2c26   : > { %7203 = vsyncadd (!%p6900_p3), %s5624_s8, 4294966272  ;;  %p13_p4 = scmp.ge.s32.totalorder %s7275_s18, 4   ;;  %s8194_s12 = smov %s7210_s13 }
0x2c27   : > { %s8195_s13 = smov %s7214_s14  ;;  %s8196_s14 = smov %s7286_s21 }
0x2c28   : > { %s8197_s15 = smov %s7275_s18  ;;  %15 = sbr.rel (!%p13_p4) target bundleno = 3 (0x3), region = 77 }
0x2c2f   :  { %5629 = vsyncpa [#allocation3], 1 }
0x2c30   :  { %5631 = vsyncpa [#allocation3 + $0x1], 1 }

</bundles_post_ra>
